<compile_context>
chip_gen: v6e
topology: v6e:2x2x1
jax: 0.10.0
libtpu: 0.0.40
codegen_flags: <defaults>
</compile_context>

<pallas_src>
import functools

import jax
import jax.numpy as jnp
from jax import lax
from jax.experimental import pallas as pl
from jax.experimental.pallas import tpu as pltpu


# --------------------------------------------------------------------------
# Fused kernel: conv(im2col) + folded BN/GAP + ReLU + sum-pool + all heads
# --------------------------------------------------------------------------
def _fused_kernel(*refs, with_aux, HW, Cout):
    if with_aux:
        (patches_ref, wconv_ref, bconv_ref,
         fcw_ref, fcb_ref, hw1_ref, hb1_ref, hw2_ref, hb2_ref,
         aw1_ref, ab1_ref, aw2_ref, ab2_ref, aw3_ref, ab3_ref,
         logits_ref, emb_ref, aux_ref) = refs
    else:
        (patches_ref, wconv_ref, bconv_ref,
         fcw_ref, fcb_ref, hw1_ref, hb1_ref, hw2_ref, hb2_ref,
         logits_ref, emb_ref) = refs

    rows = patches_ref.shape[0]            # batch_tile * HW
    nt = rows // HW                        # batch_tile

    # ---- backbone stand-in: conv3x3 as ONE matmul, bf16 -> f32 accumulation.
    # BN scale/shift and 1/(H*W) are already folded into wconv / bconv.
    y = jnp.dot(patches_ref[...], wconv_ref[...],
                preferred_element_type=jnp.float32)            # (rows, Cout)
    y = jnp.maximum(y + bconv_ref[...], 0.0)
    # global average pool == sum (1/HW folded); HW is a multiple of 8, so the
    # reshape only splits the sublane axis -> relayout-free.
    feats = jnp.sum(y.reshape(nt, HW, Cout), axis=1)           # (nt, Cout) f32
    featsb = feats.astype(jnp.bfloat16)

    # ---- logits = fc(feats) ----
    logits_ref[...] = (jnp.dot(featsb, fcw_ref[...],
                               preferred_element_type=jnp.float32)
                       + fcb_ref[...])

    # ---- embedding = head(feats); F.normalize (p=2, dim=1, eps=1e-12) ----
    h = jnp.maximum(jnp.dot(featsb, hw1_ref[...],
                            preferred_element_type=jnp.float32)
                    + hb1_ref[...], 0.0)
    emb = (jnp.dot(h.astype(jnp.bfloat16), hw2_ref[...],
                   preferred_element_type=jnp.float32)
           + hb2_ref[...])
    norm = jnp.sqrt(jnp.sum(emb * emb, axis=1, keepdims=True))
    emb_ref[...] = emb / jnp.maximum(norm, 1e-12)

    if with_aux:
        # head_aux: Linear(+folded BN1) -> ReLU -> Linear(+folded BN2) -> ReLU
        #           -> Linear
        a = jnp.maximum(jnp.dot(featsb, aw1_ref[...],
                                preferred_element_type=jnp.float32)
                        + ab1_ref[...], 0.0)
        a = jnp.maximum(jnp.dot(a.astype(jnp.bfloat16), aw2_ref[...],
                                preferred_element_type=jnp.float32)
                        + ab2_ref[...], 0.0)
        aux_ref[...] = (jnp.dot(a.astype(jnp.bfloat16), aw3_ref[...],
                                preferred_element_type=jnp.float32)
                        + ab3_ref[...])


# --------------------------------------------------------------------------
# Wrapper helpers
# --------------------------------------------------------------------------
def _resident_spec(a):
    """Full-array block whose index never changes -> stays resident in VMEM."""
    nd = a.ndim
    return pl.BlockSpec(a.shape, lambda *_: (0,) * nd)


def _pick_batch_tile(N, HW, k9, itemsize=2, budget_bytes=8 << 20):
    """Largest 8-aligned (or full-batch) divisor of N whose double-buffered
    patches tile fits a conservative VMEM budget (safe on v7x's 64 MiB)."""
    per_row = HW * k9 * itemsize
    cands = [t for t in range(1, N + 1) if N % t == 0 and (t % 8 == 0 or t == N)]
    fitting = [t for t in cands if 2 * t * per_row <= budget_bytes]
    return max(fitting) if fitting else min(cands)


def _im2col_3x3(x_nchw):
    """NCHW -> (N*H*W, 9*Cin) bf16 patches for a pad=1, stride=1, 3x3 conv.
    Tap order (dh, dw, cin) matches conv_w.reshape(9*Cin, Cout)."""
    N, Cin, H, W = x_nchw.shape
    x = jnp.transpose(x_nchw, (0, 2, 3, 1))                    # NHWC
    xp = jnp.pad(x, ((0, 0), (1, 1), (1, 1), (0, 0)))
    taps = [xp[:, dh:dh + H, dw:dw + W, :]
            for dh in range(3) for dw in range(3)]
    patches = jnp.concatenate(taps, axis=-1)                   # (N, H, W, 9*Cin)
    return patches.reshape(N * H * W, 9 * Cin).astype(jnp.bfloat16)


def _fold_bn_into_linear(w, b, g, beta, m, v, eps=1e-5):
    """BN1d (inference) after Linear  ==  Linear with folded weight/bias."""
    s = g * lax.rsqrt(v + eps)                                  # (1, c)
    return w * s, b * s + (beta - m * s)


# --------------------------------------------------------------------------
# Forward
# --------------------------------------------------------------------------
@functools.partial(jax.jit, static_argnames=("bs", "batch_tile"))
def resnet_forward(x_nchw, params, bs=None, batch_tile=None):
    """Reproduces ResNet.forward(x, bs).  Returns (logits, normalized_embedding)
    if bs is None, else (logits, normalized_embedding, logits_aux).
    NOTE: bs must be a static Python int (or None)."""
    assert bs is None or isinstance(bs, int)
    N, Cin, H, W = x_nchw.shape
    Cout = params["conv_w"].shape[-1]
    nc = params["fc_w"].shape[-1]
    dim = params["h_w2"].shape[-1]
    HW = H * W
    k9 = 9 * Cin
    with_aux = bs is not None

    # ---- trace-time param prep (all outside the kernel) ----
    # Fold BN2d (inference) and the 1/(H*W) GAP factor into conv weight/bias.
    scale = params["bn_g"] * lax.rsqrt(params["bn_v"] + 1e-5)        # (1, Cout)
    shift = params["bn_b"] - params["bn_m"] * scale
    inv_hw = 1.0 / float(HW)
    w_conv = (params["conv_w"].reshape(k9, Cout)
              * (scale * inv_hw)).astype(jnp.bfloat16)
    b_conv = (shift * inv_hw).astype(jnp.float32)

    fc_w = params["fc_w"].astype(jnp.bfloat16)
    fc_b = params["fc_b"].astype(jnp.float32)
    h_w1 = params["h_w1"].astype(jnp.bfloat16)
    h_b1 = params["h_b1"].astype(jnp.float32)
    h_w2 = params["h_w2"].astype(jnp.bfloat16)
    h_b2 = params["h_b2"].astype(jnp.float32)

    patches = _im2col_3x3(x_nchw)                               # (N*HW, 9*Cin)

    if batch_tile is None:
        batch_tile = _pick_batch_tile(N, HW, k9)
    assert N % batch_tile == 0
    grid = (N // batch_tile,)

    # ---- args / specs ----
    args = [patches, w_conv, b_conv, fc_w, fc_b, h_w1, h_b1, h_w2, h_b2]
    if with_aux:
        # Fold the two BatchNorm1d layers of head_aux into the Linears.
        a_w1, a_b1 = _fold_bn_into_linear(params["a_w1"], params["a_b1"],
                                          params["a_g1"], params["a_be1"],
                                          params["a_m1"], params["a_v1"])
        a_w2, a_b2 = _fold_bn_into_linear(params["a_w2"], params["a_b2"],
                                          params["a_g2"], params["a_be2"],
                                          params["a_m2"], params["a_v2"])
        args += [a_w1.astype(jnp.bfloat16), a_b1.astype(jnp.float32),
                 a_w2.astype(jnp.bfloat16), a_b2.astype(jnp.float32),
                 params["a_w3"].astype(jnp.bfloat16),
                 params["a_b3"].astype(jnp.float32)]

    in_specs = [pl.BlockSpec((batch_tile * HW, k9), lambda i: (i, 0))]
    in_specs += [_resident_spec(a) for a in args[1:]]

    out_shapes = [jax.ShapeDtypeStruct((N, nc), jnp.float32),
                  jax.ShapeDtypeStruct((N, dim), jnp.float32)]
    out_specs = [pl.BlockSpec((batch_tile, nc), lambda i: (i, 0)),
                 pl.BlockSpec((batch_tile, dim), lambda i: (i, 0))]
    if with_aux:
        out_shapes.append(jax.ShapeDtypeStruct((N, nc), jnp.float32))
        out_specs.append(pl.BlockSpec((batch_tile, nc), lambda i: (i, 0)))

    outs = pl.pallas_call(
        functools.partial(_fused_kernel, with_aux=with_aux, HW=HW, Cout=Cout),
        grid=grid,
        out_shape=tuple(out_shapes),
        in_specs=in_specs,
        out_specs=tuple(out_specs),
        compiler_params=pltpu.CompilerParams(
            dimension_semantics=("parallel",)),
    )(*args)

    if not with_aux:
        logits, emb = outs
        return logits, emb
    logits, emb, aux_full = outs
    # aux head is computed for all rows (inference BN uses running stats, so
    # rows >= bs give identical results); slice here to keep the kernel's
    # sublane tiling 8-aligned.
    return logits, emb, aux_full[bs:]


# --------------------------------------------------------------------------
# Deterministic parameter construction
# --------------------------------------------------------------------------
def make_params(key, Cin, Cout, num_classes, dim):
    caux = Cout // 4
    keys = jax.random.split(key, 16)

    def w(k, shape, fan_in):
        return jax.random.normal(k, shape, jnp.float32) / jnp.sqrt(fan_in)

    def bn_params(k, c):
        k1, k2, k3, k4 = jax.random.split(k, 4)
        g = 1.0 + 0.1 * jax.random.normal(k1, (1, c), jnp.float32)
        b = 0.1 * jax.random.normal(k2, (1, c), jnp.float32)
        m = 0.1 * jax.random.normal(k3, (1, c), jnp.float32)
        v = 1.0 + 0.1 * jnp.abs(jax.random.normal(k4, (1, c), jnp.float32))
        return g, b, m, v

    bn_g, bn_b, bn_m, bn_v = bn_params(keys[1], Cout)
    a_g1, a_be1, a_m1, a_v1 = bn_params(keys[9], caux)
    a_g2, a_be2, a_m2, a_v2 = bn_params(keys[12], caux)

    return dict(
        conv_w=w(keys[0], (3, 3, Cin, Cout), 9 * Cin),
        bn_g=bn_g, bn_b=bn_b, bn_m=bn_m, bn_v=bn_v,
        fc_w=w(keys[2], (Cout, num_classes), Cout),
        fc_b=0.01 * jax.random.normal(keys[3], (1, num_classes), jnp.float32),
        h_w1=w(keys[4], (Cout, Cout), Cout),
        h_b1=0.01 * jax.random.normal(keys[5], (1, Cout), jnp.float32),
        h_w2=w(keys[6], (Cout, dim), Cout),
        h_b2=0.01 * jax.random.normal(keys[7], (1, dim), jnp.float32),
        a_w1=w(keys[8], (Cout, caux), Cout),
        a_b1=0.01 * jax.random.normal(keys[10], (1, caux), jnp.float32),
        a_g1=a_g1, a_be1=a_be1, a_m1=a_m1, a_v1=a_v1,
        a_w2=w(keys[11], (caux, caux), caux),
        a_b2=0.01 * jax.random.normal(keys[13], (1, caux), jnp.float32),
        a_g2=a_g2, a_be2=a_be2, a_m2=a_m2, a_v2=a_v2,
        a_w3=w(keys[14], (caux, num_classes), caux),
        a_b3=0.01 * jax.random.normal(keys[15], (1, num_classes), jnp.float32),
    )


if __name__ == "__main__":
    N, Cin, H, W = 16, 4, 16, 16
    Cout, num_classes, dim = 32, 8, 16
    bs = 8

    x = jax.random.normal(jax.random.PRNGKey(0), (N, Cin, H, W), jnp.float32)
    params = make_params(jax.random.PRNGKey(42), Cin, Cout, num_classes, dim)

    # bs path: batch_tile=8 -> 2-step grid (pipelined, TC-parallel on v7x)
    logits, emb, logits_aux = resnet_forward(x, params, bs=bs, batch_tile=8)
    jax.block_until_ready((logits, emb, logits_aux))

    assert logits.shape == (N, num_classes)
    assert emb.shape == (N, dim)
    assert logits_aux.shape == (N - bs, num_classes)
    # embedding rows are L2-normalized
    assert jnp.allclose(jnp.linalg.norm(emb, axis=1), 1.0, atol=1e-4)
    assert bool(jnp.all(jnp.isfinite(logits)))
    assert bool(jnp.all(jnp.isfinite(logits_aux)))

    # bs=None path (aux branch is skipped entirely at trace time)
    logits2, emb2 = resnet_forward(x, params, bs=None)
    jax.block_until_ready((logits2, emb2))
    assert logits2.shape == (N, num_classes)
    assert emb2.shape == (N, dim)
    assert jnp.allclose(logits2, logits, atol=1e-5)

    print("KERNEL_OK")
</pallas_src>

<mosaic_0001>
module attributes {stable_mosaic.version = 11 : i64} {
  func.func @_fused_kernel(%arg0: i32, %arg1: memref<2048x36xbf16, #tpu.memory_space<vmem>>, %arg2: memref<36x32xbf16, #tpu.memory_space<vmem>>, %arg3: memref<1x32xf32, #tpu.memory_space<vmem>>, %arg4: memref<32x8xbf16, #tpu.memory_space<vmem>>, %arg5: memref<1x8xf32, #tpu.memory_space<vmem>>, %arg6: memref<32x32xbf16, #tpu.memory_space<vmem>>, %arg7: memref<1x32xf32, #tpu.memory_space<vmem>>, %arg8: memref<32x16xbf16, #tpu.memory_space<vmem>>, %arg9: memref<1x16xf32, #tpu.memory_space<vmem>>, %arg10: memref<32x8xbf16, #tpu.memory_space<vmem>>, %arg11: memref<1x8xf32, #tpu.memory_space<vmem>>, %arg12: memref<8x8xbf16, #tpu.memory_space<vmem>>, %arg13: memref<1x8xf32, #tpu.memory_space<vmem>>, %arg14: memref<8x8xbf16, #tpu.memory_space<vmem>>, %arg15: memref<1x8xf32, #tpu.memory_space<vmem>>, %arg16: memref<8x8xf32, #tpu.memory_space<vmem>>, %arg17: memref<8x16xf32, #tpu.memory_space<vmem>>, %arg18: memref<8x8xf32, #tpu.memory_space<vmem>>) attributes {dimension_semantics = [#tpu.dimension_semantics<parallel>], iteration_bounds = array<i64: 2>, scalar_prefetch = 0 : i64, scratch_operands = 0 : i64, tpu.core_type = #tpu.core_type<tc>, window_params = [{transform_indices = @transform_0, window_bounds = array<i64: 2048, 36>}, {pipeline_mode = #tpu.pipeline_mode<synchronous>, transform_indices = @transform_1, window_bounds = array<i64: 36, 32>}, {pipeline_mode = #tpu.pipeline_mode<synchronous>, transform_indices = @transform_2, window_bounds = array<i64: 1, 32>}, {pipeline_mode = #tpu.pipeline_mode<synchronous>, transform_indices = @transform_3, window_bounds = array<i64: 32, 8>}, {pipeline_mode = #tpu.pipeline_mode<synchronous>, transform_indices = @transform_4, window_bounds = array<i64: 1, 8>}, {pipeline_mode = #tpu.pipeline_mode<synchronous>, transform_indices = @transform_5, window_bounds = array<i64: 32, 32>}, {pipeline_mode = #tpu.pipeline_mode<synchronous>, transform_indices = @transform_6, window_bounds = array<i64: 1, 32>}, {pipeline_mode = #tpu.pipeline_mode<synchronous>, transform_indices = @transform_7, window_bounds = array<i64: 32, 16>}, {pipeline_mode = #tpu.pipeline_mode<synchronous>, transform_indices = @transform_8, window_bounds = array<i64: 1, 16>}, {pipeline_mode = #tpu.pipeline_mode<synchronous>, transform_indices = @transform_9, window_bounds = array<i64: 32, 8>}, {pipeline_mode = #tpu.pipeline_mode<synchronous>, transform_indices = @transform_10, window_bounds = array<i64: 1, 8>}, {pipeline_mode = #tpu.pipeline_mode<synchronous>, transform_indices = @transform_11, window_bounds = array<i64: 8, 8>}, {pipeline_mode = #tpu.pipeline_mode<synchronous>, transform_indices = @transform_12, window_bounds = array<i64: 1, 8>}, {pipeline_mode = #tpu.pipeline_mode<synchronous>, transform_indices = @transform_13, window_bounds = array<i64: 8, 8>}, {pipeline_mode = #tpu.pipeline_mode<synchronous>, transform_indices = @transform_14, window_bounds = array<i64: 1, 8>}, {transform_indices = @transform_15, window_bounds = array<i64: 8, 8>}, {transform_indices = @transform_16, window_bounds = array<i64: 8, 16>}, {transform_indices = @transform_17, window_bounds = array<i64: 8, 8>}]} {
    %c0 = arith.constant 0 : index
    %c0_0 = arith.constant 0 : index
    %0 = vector.load %arg1[%c0, %c0_0] : memref<2048x36xbf16, #tpu.memory_space<vmem>>, vector<2048x36xbf16>
    %c0_1 = arith.constant 0 : index
    %c0_2 = arith.constant 0 : index
    %1 = vector.load %arg2[%c0_1, %c0_2] : memref<36x32xbf16, #tpu.memory_space<vmem>>, vector<36x32xbf16>
    %cst = arith.constant dense<0.000000e+00> : vector<2048x32xf32>
    %2 = tpu.matmul %0, %1, %cst {dimension_numbers = #tpu.dot_dimension_numbers<[1], [0], [0], [1], [0, 0, 1, 1], [], []>} : vector<2048x36xbf16>, vector<36x32xbf16>, vector<2048x32xf32> -> vector<2048x32xf32>
    %c0_3 = arith.constant 0 : index
    %c0_4 = arith.constant 0 : index
    %3 = vector.load %arg3[%c0_3, %c0_4] : memref<1x32xf32, #tpu.memory_space<vmem>>, vector<1x32xf32>
    %4 = vector.broadcast %3 : vector<1x32xf32> to vector<2048x32xf32>
    %5 = arith.addf %2, %4 : vector<2048x32xf32>
    %cst_5 = arith.constant 0.000000e+00 : f32
    %6 = vector.broadcast %cst_5 : f32 to vector<2048x32xf32>
    %7 = arith.maximumf %5, %6 : vector<2048x32xf32>
    %8 = vector.shape_cast %7 : vector<2048x32xf32> to vector<8x256x32xf32>
    %cst_6 = arith.constant dense<0.000000e+00> : vector<8x32xf32>
    %9 = vector.multi_reduction <add>, %8, %cst_6 [1] : vector<8x256x32xf32> to vector<8x32xf32>
    %10 = arith.truncf %9 : vector<8x32xf32> to vector<8x32xbf16>
    %c0_7 = arith.constant 0 : index
    %c0_8 = arith.constant 0 : index
    %11 = vector.load %arg4[%c0_7, %c0_8] : memref<32x8xbf16, #tpu.memory_space<vmem>>, vector<32x8xbf16>
    %cst_9 = arith.constant dense<0.000000e+00> : vector<8x8xf32>
    %12 = tpu.matmul %10, %11, %cst_9 {dimension_numbers = #tpu.dot_dimension_numbers<[1], [0], [0], [1], [0, 0, 1, 1], [], []>} : vector<8x32xbf16>, vector<32x8xbf16>, vector<8x8xf32> -> vector<8x8xf32>
    %c0_10 = arith.constant 0 : index
    %c0_11 = arith.constant 0 : index
    %13 = vector.load %arg5[%c0_10, %c0_11] : memref<1x8xf32, #tpu.memory_space<vmem>>, vector<1x8xf32>
    %14 = vector.broadcast %13 : vector<1x8xf32> to vector<8x8xf32>
    %15 = arith.addf %12, %14 : vector<8x8xf32>
    %c0_12 = arith.constant 0 : index
    %c0_13 = arith.constant 0 : index
    %16 = vector.load %arg16[%c0_12, %c0_13] : memref<8x8xf32, #tpu.memory_space<vmem>>, vector<8x8xf32>
    tpu.vector_store %arg16[%c0_12, %c0_13], %15 {strides = array<i32>} : memref<8x8xf32, #tpu.memory_space<vmem>>, vector<8x8xf32>,
    %c0_14 = arith.constant 0 : index
    %c0_15 = arith.constant 0 : index
    %17 = vector.load %arg6[%c0_14, %c0_15] : memref<32x32xbf16, #tpu.memory_space<vmem>>, vector<32x32xbf16>
    %cst_16 = arith.constant dense<0.000000e+00> : vector<8x32xf32>
    %18 = tpu.matmul %10, %17, %cst_16 {dimension_numbers = #tpu.dot_dimension_numbers<[1], [0], [0], [1], [0, 0, 1, 1], [], []>} : vector<8x32xbf16>, vector<32x32xbf16>, vector<8x32xf32> -> vector<8x32xf32>
    %c0_17 = arith.constant 0 : index
    %c0_18 = arith.constant 0 : index
    %19 = vector.load %arg7[%c0_17, %c0_18] : memref<1x32xf32, #tpu.memory_space<vmem>>, vector<1x32xf32>
    %20 = vector.broadcast %19 : vector<1x32xf32> to vector<8x32xf32>
    %21 = arith.addf %18, %20 : vector<8x32xf32>
    %cst_19 = arith.constant 0.000000e+00 : f32
    %22 = vector.broadcast %cst_19 : f32 to vector<8x32xf32>
    %23 = arith.maximumf %21, %22 : vector<8x32xf32>
    %24 = arith.truncf %23 : vector<8x32xf32> to vector<8x32xbf16>
    %c0_20 = arith.constant 0 : index
    %c0_21 = arith.constant 0 : index
    %25 = vector.load %arg8[%c0_20, %c0_21] : memref<32x16xbf16, #tpu.memory_space<vmem>>, vector<32x16xbf16>
    %cst_22 = arith.constant dense<0.000000e+00> : vector<8x16xf32>
    %26 = tpu.matmul %24, %25, %cst_22 {dimension_numbers = #tpu.dot_dimension_numbers<[1], [0], [0], [1], [0, 0, 1, 1], [], []>} : vector<8x32xbf16>, vector<32x16xbf16>, vector<8x16xf32> -> vector<8x16xf32>
    %c0_23 = arith.constant 0 : index
    %c0_24 = arith.constant 0 : index
    %27 = vector.load %arg9[%c0_23, %c0_24] : memref<1x16xf32, #tpu.memory_space<vmem>>, vector<1x16xf32>
    %28 = vector.broadcast %27 : vector<1x16xf32> to vector<8x16xf32>
    %29 = arith.addf %26, %28 : vector<8x16xf32>
    %30 = arith.mulf %29, %29 : vector<8x16xf32>
    %cst_25 = arith.constant dense<0.000000e+00> : vector<8xf32>
    %31 = vector.multi_reduction <add>, %30, %cst_25 [1] : vector<8x16xf32> to vector<8xf32>
    %32 = vector.shape_cast %31 : vector<8xf32> to vector<8x1xf32>
    %33 = math.sqrt %32 : vector<8x1xf32>
    %cst_26 = arith.constant 9.99999996E-13 : f32
    %34 = vector.broadcast %cst_26 : f32 to vector<8x1xf32>
    %35 = arith.maximumf %33, %34 : vector<8x1xf32>
    %36 = vector.broadcast %35 : vector<8x1xf32> to vector<8x16xf32>
    %37 = arith.divf %29, %36 : vector<8x16xf32>
    %c0_27 = arith.constant 0 : index
    %c0_28 = arith.constant 0 : index
    %38 = vector.load %arg17[%c0_27, %c0_28] : memref<8x16xf32, #tpu.memory_space<vmem>>, vector<8x16xf32>
    tpu.vector_store %arg17[%c0_27, %c0_28], %37 {strides = array<i32>} : memref<8x16xf32, #tpu.memory_space<vmem>>, vector<8x16xf32>,
    %c0_29 = arith.constant 0 : index
    %c0_30 = arith.constant 0 : index
    %39 = vector.load %arg10[%c0_29, %c0_30] : memref<32x8xbf16, #tpu.memory_space<vmem>>, vector<32x8xbf16>
    %cst_31 = arith.constant dense<0.000000e+00> : vector<8x8xf32>
    %40 = tpu.matmul %10, %39, %cst_31 {dimension_numbers = #tpu.dot_dimension_numbers<[1], [0], [0], [1], [0, 0, 1, 1], [], []>} : vector<8x32xbf16>, vector<32x8xbf16>, vector<8x8xf32> -> vector<8x8xf32>
    %c0_32 = arith.constant 0 : index
    %c0_33 = arith.constant 0 : index
    %41 = vector.load %arg11[%c0_32, %c0_33] : memref<1x8xf32, #tpu.memory_space<vmem>>, vector<1x8xf32>
    %42 = vector.broadcast %41 : vector<1x8xf32> to vector<8x8xf32>
    %43 = arith.addf %40, %42 : vector<8x8xf32>
    %cst_34 = arith.constant 0.000000e+00 : f32
    %44 = vector.broadcast %cst_34 : f32 to vector<8x8xf32>
    %45 = arith.maximumf %43, %44 : vector<8x8xf32>
    %46 = arith.truncf %45 : vector<8x8xf32> to vector<8x8xbf16>
    %c0_35 = arith.constant 0 : index
    %c0_36 = arith.constant 0 : index
    %47 = vector.load %arg12[%c0_35, %c0_36] : memref<8x8xbf16, #tpu.memory_space<vmem>>, vector<8x8xbf16>
    %cst_37 = arith.constant dense<0.000000e+00> : vector<8x8xf32>
    %48 = tpu.matmul %46, %47, %cst_37 {dimension_numbers = #tpu.dot_dimension_numbers<[1], [0], [0], [1], [0, 0, 1, 1], [], []>} : vector<8x8xbf16>, vector<8x8xbf16>, vector<8x8xf32> -> vector<8x8xf32>
    %c0_38 = arith.constant 0 : index
    %c0_39 = arith.constant 0 : index
    %49 = vector.load %arg13[%c0_38, %c0_39] : memref<1x8xf32, #tpu.memory_space<vmem>>, vector<1x8xf32>
    %50 = vector.broadcast %49 : vector<1x8xf32> to vector<8x8xf32>
    %51 = arith.addf %48, %50 : vector<8x8xf32>
    %cst_40 = arith.constant 0.000000e+00 : f32
    %52 = vector.broadcast %cst_40 : f32 to vector<8x8xf32>
    %53 = arith.maximumf %51, %52 : vector<8x8xf32>
    %54 = arith.truncf %53 : vector<8x8xf32> to vector<8x8xbf16>
    %c0_41 = arith.constant 0 : index
    %c0_42 = arith.constant 0 : index
    %55 = vector.load %arg14[%c0_41, %c0_42] : memref<8x8xbf16, #tpu.memory_space<vmem>>, vector<8x8xbf16>
    %cst_43 = arith.constant dense<0.000000e+00> : vector<8x8xf32>
    %56 = tpu.matmul %54, %55, %cst_43 {dimension_numbers = #tpu.dot_dimension_numbers<[1], [0], [0], [1], [0, 0, 1, 1], [], []>} : vector<8x8xbf16>, vector<8x8xbf16>, vector<8x8xf32> -> vector<8x8xf32>
    %c0_44 = arith.constant 0 : index
    %c0_45 = arith.constant 0 : index
    %57 = vector.load %arg15[%c0_44, %c0_45] : memref<1x8xf32, #tpu.memory_space<vmem>>, vector<1x8xf32>
    %58 = vector.broadcast %57 : vector<1x8xf32> to vector<8x8xf32>
    %59 = arith.addf %56, %58 : vector<8x8xf32>
    %c0_46 = arith.constant 0 : index
    %c0_47 = arith.constant 0 : index
    %60 = vector.load %arg18[%c0_46, %c0_47] : memref<8x8xf32, #tpu.memory_space<vmem>>, vector<8x8xf32>
    tpu.vector_store %arg18[%c0_46, %c0_47], %59 {strides = array<i32>} : memref<8x8xf32, #tpu.memory_space<vmem>>, vector<8x8xf32>,
    return
  }
  func.func @transform_0(%arg0: i32) -> (i32, i32) {
    %c0_i32 = arith.constant 0 : i32
    %c0_i32_0 = arith.constant 0 : i32
    return %arg0, %c0_i32 : i32, i32
  }
  func.func @transform_1(%arg0: i32) -> (i32, i32) {
    %c0_i32 = arith.constant 0 : i32
    %c0_i32_0 = arith.constant 0 : i32
    %c0_i32_1 = arith.constant 0 : i32
    return %c0_i32, %c0_i32_0 : i32, i32
  }
  func.func @transform_2(%arg0: i32) -> (i32, i32) {
    %c0_i32 = arith.constant 0 : i32
    %c0_i32_0 = arith.constant 0 : i32
    %c0_i32_1 = arith.constant 0 : i32
    return %c0_i32, %c0_i32_0 : i32, i32
  }
  func.func @transform_3(%arg0: i32) -> (i32, i32) {
    %c0_i32 = arith.constant 0 : i32
    %c0_i32_0 = arith.constant 0 : i32
    %c0_i32_1 = arith.constant 0 : i32
    return %c0_i32, %c0_i32_0 : i32, i32
  }
  func.func @transform_4(%arg0: i32) -> (i32, i32) {
    %c0_i32 = arith.constant 0 : i32
    %c0_i32_0 = arith.constant 0 : i32
    %c0_i32_1 = arith.constant 0 : i32
    return %c0_i32, %c0_i32_0 : i32, i32
  }
  func.func @transform_5(%arg0: i32) -> (i32, i32) {
    %c0_i32 = arith.constant 0 : i32
    %c0_i32_0 = arith.constant 0 : i32
    %c0_i32_1 = arith.constant 0 : i32
    return %c0_i32, %c0_i32_0 : i32, i32
  }
  func.func @transform_6(%arg0: i32) -> (i32, i32) {
    %c0_i32 = arith.constant 0 : i32
    %c0_i32_0 = arith.constant 0 : i32
    %c0_i32_1 = arith.constant 0 : i32
    return %c0_i32, %c0_i32_0 : i32, i32
  }
  func.func @transform_7(%arg0: i32) -> (i32, i32) {
    %c0_i32 = arith.constant 0 : i32
    %c0_i32_0 = arith.constant 0 : i32
    %c0_i32_1 = arith.constant 0 : i32
    return %c0_i32, %c0_i32_0 : i32, i32
  }
  func.func @transform_8(%arg0: i32) -> (i32, i32) {
    %c0_i32 = arith.constant 0 : i32
    %c0_i32_0 = arith.constant 0 : i32
    %c0_i32_1 = arith.constant 0 : i32
    return %c0_i32, %c0_i32_0 : i32, i32
  }
  func.func @transform_9(%arg0: i32) -> (i32, i32) {
    %c0_i32 = arith.constant 0 : i32
    %c0_i32_0 = arith.constant 0 : i32
    %c0_i32_1 = arith.constant 0 : i32
    return %c0_i32, %c0_i32_0 : i32, i32
  }
  func.func @transform_10(%arg0: i32) -> (i32, i32) {
    %c0_i32 = arith.constant 0 : i32
    %c0_i32_0 = arith.constant 0 : i32
    %c0_i32_1 = arith.constant 0 : i32
    return %c0_i32, %c0_i32_0 : i32, i32
  }
  func.func @transform_11(%arg0: i32) -> (i32, i32) {
    %c0_i32 = arith.constant 0 : i32
    %c0_i32_0 = arith.constant 0 : i32
    %c0_i32_1 = arith.constant 0 : i32
    return %c0_i32, %c0_i32_0 : i32, i32
  }
  func.func @transform_12(%arg0: i32) -> (i32, i32) {
    %c0_i32 = arith.constant 0 : i32
    %c0_i32_0 = arith.constant 0 : i32
    %c0_i32_1 = arith.constant 0 : i32
    return %c0_i32, %c0_i32_0 : i32, i32
  }
  func.func @transform_13(%arg0: i32) -> (i32, i32) {
    %c0_i32 = arith.constant 0 : i32
    %c0_i32_0 = arith.constant 0 : i32
    %c0_i32_1 = arith.constant 0 : i32
    return %c0_i32, %c0_i32_0 : i32, i32
  }
  func.func @transform_14(%arg0: i32) -> (i32, i32) {
    %c0_i32 = arith.constant 0 : i32
    %c0_i32_0 = arith.constant 0 : i32
    %c0_i32_1 = arith.constant 0 : i32
    return %c0_i32, %c0_i32_0 : i32, i32
  }
  func.func @transform_15(%arg0: i32) -> (i32, i32) {
    %c0_i32 = arith.constant 0 : i32
    %c0_i32_0 = arith.constant 0 : i32
    return %arg0, %c0_i32 : i32, i32
  }
  func.func @transform_16(%arg0: i32) -> (i32, i32) {
    %c0_i32 = arith.constant 0 : i32
    %c0_i32_0 = arith.constant 0 : i32
    return %arg0, %c0_i32 : i32, i32
  }
  func.func @transform_17(%arg0: i32) -> (i32, i32) {
    %c0_i32 = arith.constant 0 : i32
    %c0_i32_0 = arith.constant 0 : i32
    return %arg0, %c0_i32 : i32, i32
  }
}

</mosaic_0001>

<bundles_post_ra>
// kernel: resnet_forward.1
= control target key start
LH: loop header
LB: loop body
LE: loop exit
PB: predicated region body
PF: predicated region fallthrough
CT: control target
= control target key end

     0   :  { %s6582_s0 = inlined_call_operand.vmem [shape: bf16[4096,36], index: 0, kind: input, shape index: {}]   ;;  %s6583_s1 = inlined_call_operand.vmem [shape: bf16[36,32], index: 1, kind: input, shape index: {}]   ;;  %s6584_s2 = inlined_call_operand.vmem [shape: f32[1,32], index: 2, kind: input, shape index: {}]   ;;  %s6585_s3 = inlined_call_operand.vmem [shape: bf16[32,8], index: 3, kind: input, shape index: {}]   ;;  %s6586_s4 = inlined_call_operand.vmem [shape: f32[1,8], index: 4, kind: input, shape index: {}]   ;;  %s6587_s5 = inlined_call_operand.vmem [shape: bf16[32,32], index: 5, kind: input, shape index: {}]   ;;  %s6588_s6 = inlined_call_operand.vmem [shape: f32[1,32], index: 6, kind: input, shape index: {}]   ;;  %s6589_s7 = inlined_call_operand.vmem [shape: bf16[32,16], index: 7, kind: input, shape index: {}]   ;;  %s6590_s8 = inlined_call_operand.vmem [shape: f32[1,16], index: 8, kind: input, shape index: {}]   ;;  %s6591_s9 = inlined_call_operand.vmem [shape: bf16[32,8], index: 9, kind: input, shape index: {}]   ;;  %s6592_s10 = inlined_call_operand.vmem [shape: f32[1,8], index: 10, kind: input, shape index: {}]   ;;  %s6593_s11 = inlined_call_operand.vmem [shape: bf16[8,8], index: 11, kind: input, shape index: {}]   ;;  %s6594_s12 = inlined_call_operand.vmem [shape: f32[1,8], index: 12, kind: input, shape index: {}]   ;;  %s6595_s13 = inlined_call_operand.vmem [shape: bf16[8,8], index: 13, kind: input, shape index: {}]   ;;  %s6596_s14 = inlined_call_operand.vmem [shape: f32[1,8], index: 14, kind: input, shape index: {}]   ;;  %s6597_s15 = inlined_call_operand.vmem [shape: f32[16,8], index: 15, kind: output, shape index: {0}]   ;;  %s6598_s16 = inlined_call_operand.hbm [shape: f32[16,16], index: 16, kind: output, shape index: {1}]   ;;  %s6599_s17 = inlined_call_operand.vmem [shape: f32[16,8], index: 17, kind: output, shape index: {2}]  }
   0x1   :  { %6605 = sst [smem:[#allocation8_spill]] %s6582_s0 }
   0x2   :  { %6606 = sst [smem:[#allocation9_spill]] %s6583_s1 }
   0x3   :  { %6607 = sst [smem:[#allocation10_spill]] %s6584_s2 }
   0x4   :  { %6608 = sst [smem:[#allocation11_spill]] %s6585_s3 }
   0x5   :  { %6609 = sst [smem:[#allocation12_spill]] %s6586_s4 }
   0x6   :  { %6610 = sst [smem:[#allocation13_spill]] %s6587_s5 }
   0x7   :  { %6611 = sst [smem:[#allocation14_spill]] %s6588_s6 }
   0x8   :  { %23 = vsyncpa [#allocation3], 0 }
   0x9   :  { %25 = vsyncpa [#allocation3 + $0x1], 0  ;;  %s5410_s24 = smov 0   ;;  %s5412_s25 = smov 0  }
   0xa   :  { %s5414_s26 = smov 0   ;;  %s5416_s27 = smov 0  }
   0xb LB: > { %6612 = sst [smem:[#allocation5_spill]] %s5311_s26  ;;  %s5431_s28 = sadd.s32 4294967295, %s5315_s27   ;;  %s5315_s27 = sphi %s5416_s27, %s6625_s27   ;;  %s5311_s26 = sphi %s5414_s26, %s6627_s26   ;;  %s5307_s25 = sphi %s5412_s25, %s6629_s25   ;;  %s5303_s24 = sphi %s5410_s24, %s6628_s24  }
   0xc   : > { %s4315_s29 = sadd.s32 4294967294, %s5315_s27   ;;  %s5435_s0 = sadd.s32 1, %s5315_s27  }
   0xd   : > { %6613 = sst [smem:[#allocation6_spill]] %s5435_s0  ;;  %s384_s30 = sadd.s32 1, %s5311_s26 }
   0xe   : > { %s381_s18 = ssub.s32 %s5315_s27, %s5435_s0  ;;  %p394_p0 = scmp.ne.s32.totalorder %s5311_s26, %s5307_s25 }
   0xf   : > { %p382_p1 = scmp.eq.s32.totalorder %s381_s18, 0  ;;  %p395_p2 = scmp.eq.s32.totalorder %s5431_s28, 1 }
  0x10   : > { %p400_p3 = scmp.ne.s32.totalorder %s5307_s25, %s5303_s24  ;;  %p401_p4 = scmp.eq.s32.totalorder %s4315_s29, 1 }
  0x11   : > { %s5446_s19 = scalar_select %p382_p1, %s5311_s26, %s384_s30  }
  0x12   : > { %p5448_p5 = por %p395_p2, %p394_p0  ;;  %p5452_p6 = por %p401_p4, %p400_p3 }
  0x13   : > { %6614 = sst [smem:[#allocation7_spill]] %s5446_s19  ;;  %p4318_p7 = scmp.ge.s32.totalorder %s5315_s27, 1 }
  0x14   : > { %p496_p8 = scmp.lt.s32.totalorder %s5315_s27, 3 }
  0x16   : > { %p497_p9 = pnand %p4318_p7, %p496_p8 }
  0x17   : > { %s6617_s23 = sld [smem:[#allocation9_spill]] (!%p497_p9)  ;;  %s4320_s18 = sshll.u32 (!%p497_p9), %s5431_s28, 8 }
  0x18   : > { %500 = sbr.rel (%p497_p9) target bundleno = 1398 (0x576), region = 80  ;;  %p557_p10 = scmp.lt.s32.totalorder (!%p497_p9), %s4320_s18, 511 }
  0x19   : > { %s6618_s30 = sld [smem:[#allocation8_spill]] (!%p497_p9)  ;;  %p562_p11 = scmp.lt.s32.totalorder (!%p497_p9), %s5431_s28, 1 }
  0x1a   : > { %s6619_s3 = sld [smem:[#allocation11_spill]] (!%p497_p9)  ;;  %s547_s26 = sand.u32 (!%p497_p9), 1, %s5307_s25  }
  0x1b   : > { %s6620_s2 = sld [smem:[#allocation10_spill]] (!%p497_p9)  ;;  %s4319_s19 = sshll.u32 (!%p497_p9), %s547_s26, 3 }
  0x1c   : > { %s6621_s5 = sld [smem:[#allocation13_spill]] (!%p497_p9)  ;;  %s4605_s29 = sshll.u32 (!%p497_p9), %s5431_s28, 7 }
  0x1d   : > { %v5110_v0 = vld [vmem:[%s6617_s23 + $0x10] ss:$0 sps:$4 sm:$0x33]   ;;  %vm1879_vm0 = vcmask 1041408   ;;  %v5111_v1 = vld [vmem:[%s6617_s23 + $0x8] sm:$0xff]   ;;  %v5112_v3 = vld [vmem:[%s6617_s23] sm:$0xff]  }
  0x1e   : > { %5067 = vmatprep.subr.msk.bf16.mxu0 %vm1879_vm0, %v5110_v0  ;;  %v1881_v2 = vsel %vm1879_vm0, %v5110_v0, 0  ;;  %5068 = vmatprep.subr.msk.bf16.mxu1 %vm1879_vm0, %v5110_v0  ;;  %s6631_s18 = smov (!%p557_p10, %s4320_s18), 511  ;;  %vm1494_vm1 = vcmask 293888   ;;  %vm3196_vm2 = vcmask 261120   ;;  %vm3784_vm3 = vcmask 1041409   ;;  %s6622_s4 = sld [smem:[#allocation12_spill]] }
  0x1f   : > { %4756 = vmatpush3.bf16.msra.mxu0 %v1881_v2  ;;  %5064 = vmatpush3.bf16.msra.mxu1 %v1881_v2  ;;  %s4321_s21 = sshll.u32 %s6631_s18, 2  ;;  %vm3786_vm4 = vcmask 1042434   ;;  %vm3788_vm5 = vcmask 1043459   ;;  %vm5318_vm6 = vmmov 0   ;;  %vm3790_vm7 = vcmask 1044484   ;;  %s6623_s6 = sld [smem:[#allocation14_spill]] }
  0x20   : > { %4757 = vmatprep.subr.bf16.mxu0 %v5111_v1  ;;  %5062 = vmatprep.subr.bf16.mxu1 %v5111_v1  ;;  %s5471_s0 = scalar_lea.vmem %s6618_s30, %s4321_s21  ;;  %vm3792_vm8 = vcmask 1045509   ;;  %vm3794_vm9 = vcmask 1046534   ;;  %vm3796_vm10 = vcmask 1047559   ;;  %vm3854_vm11 = vcmask 64512  }
  0x21   : > { %v5113_v4 = vld [vmem:[%s5471_s0] sm:$0xff]   ;;  %v5114_v5 = vld [vmem:[%s5471_s0 + $0x8] sm:$0xff]   ;;  %v5115_v6 = vld [vmem:[%s5471_s0 + $0x10] sm:$0xff]   ;;  %s6486_s18 = scalar_select %p562_p11, %s5431_s28, 1  ;;  %vm4079_vm12 = vcmask 1043456   ;;  %vm3988_vm13 = vcmask 130048  }
  0x22   : > { %4761 = vmatprep.mubr.msk.bf16.mxu0 %vm1494_vm1, %v5113_v4  ;;  %v5116_v7 = vld [vmem:[%s5471_s0 + $0x18] sm:$0xff]   ;;  %v5117_v8 = vld [vmem:[%s5471_s0 + $0x20] sm:$0xff]   ;;  %v5118_v9 = vld [vmem:[%s5471_s0 + $0x28] sm:$0xff]  }
  0x23   : > { %4758 = vmatpush3.bf16.msra.mxu0 %v5111_v1  ;;  %5065 = vmatpush3.bf16.msra.mxu1 %v5111_v1  ;;  %v5119_v10 = vld [vmem:[%s5471_s0 + $0x30] sm:$0xff]   ;;  %v5134_v12 = vld [vmem:[%s5471_s0 + $0x238] sm:$0xff]   ;;  %v5137_v13 = vld [vmem:[%s5471_s0 + $0x240] sm:$0xff]   ;;  %s6604_s21 = sshll.u32 %s6486_s18, 3 }
  0x24   : > { %4759 = vmatprep.subr.bf16.mxu0 %v5112_v3  ;;  %5063 = vmatprep.subr.bf16.mxu1 %v5112_v3  ;;  %v5133_v11 = vld [vmem:[%s5471_s0 + $0x230] sm:$0xff]   ;;  %v5120_v14 = vld [vmem:[%s5471_s0 + $0x38] sm:$0xff]   ;;  %v5121_v15 = vld [vmem:[%s5471_s0 + $0x40] sm:$0xff]  }
  0x25   : > { %4901 = vmatprep.mubr.msk.bf16.mxu1 %vm1494_vm1, %v5133_v11  ;;  %v5138_v16 = vld [vmem:[%s5471_s0 + $0x248] sm:$0xff]   ;;  %v5141_v17 = vld [vmem:[%s5471_s0 + $0x250] sm:$0xff]   ;;  %v5142_v20 = vld [vmem:[%s5471_s0 + $0x258] sm:$0xff]  }
  0x26   : > { %v5122_v18 = vld [vmem:[%s5471_s0 + $0x48] sm:$0xff]   ;;  %v5123_v19 = vld [vmem:[%s5471_s0 + $0x50] sm:$0xff]   ;;  %v5145_v21 = vld [vmem:[%s5471_s0 + $0x260] sm:$0xff]  }
  0x27   : > { %4760 = vmatpush3.bf16.msra.mxu0 %v5112_v3  ;;  %5066 = vmatpush3.bf16.msra.mxu1 %v5112_v3  ;;  %v5124_v22 = vld [vmem:[%s5471_s0 + $0x58] sm:$0xff]   ;;  %v5125_v23 = vld [vmem:[%s5471_s0 + $0x60] sm:$0xff]   ;;  %v5146_v24 = vld [vmem:[%s5471_s0 + $0x268] sm:$0xff]  }
  0x28   : > { %v5149_v25 = vld [vmem:[%s5471_s0 + $0x270] sm:$0xff]   ;;  %v5126_v26 = vld [vmem:[%s5471_s0 + $0x68] sm:$0xff]   ;;  %v5150_v28 = vld [vmem:[%s5471_s0 + $0x278] sm:$0xff]  }
  0x29   : > { %v5127_v27 = vld [vmem:[%s5471_s0 + $0x70] sm:$0xff]   ;;  %v5153_v29 = vld [vmem:[%s5471_s0 + $0x280] sm:$0xff]   ;;  %v5128_v30 = vld [vmem:[%s5471_s0 + $0x78] sm:$0xff]  }
  0x2a   : > { %4762 = vmatmul.mubr.msk.bf16.vlgmr.msra.gmra.mxu0 %vm1494_vm1, %v5114_v5  ;;  %4902 = vmatmul.mubr.msk.bf16.vlgmr.msra.gmra.mxu1 %vm1494_vm1, %v5134_v12  ;;  %v5129_v31 = vld [vmem:[%s5471_s0 + $0x80] sm:$0xff]   ;;  %v5154_v32 = vld [vmem:[%s5471_s0 + $0x288] sm:$0xff]   ;;  %v5157_v33 = vld [vmem:[%s5471_s0 + $0x290] sm:$0xff]  }
  0x2b   : > { %4765 = vmatprep.mubr.msk.bf16.mxu0 %vm1494_vm1, %v5115_v6  ;;  %4905 = vmatprep.mubr.msk.bf16.mxu1 %vm1494_vm1, %v5137_v13  ;;  %v5130_v34 = vld [vmem:[%s5471_s0 + $0x88] sm:$0xff]   ;;  %v5131_v35 = vld [vmem:[%s5471_s0 + $0x90] sm:$0xff]   ;;  %v5158_v36 = vld [vmem:[%s5471_s0 + $0x298] sm:$0xff]  }
  0x2c   : > { %v5161_v37 = vld [vmem:[%s5471_s0 + $0x2a0] sm:$0xff]   ;;  %v5132_v38 = vld [vmem:[%s5471_s0 + $0x98] sm:$0xff]   ;;  %v5162_v40 = vld [vmem:[%s5471_s0 + $0x2a8] sm:$0xff]  }
  0x2d   : > { %v5135_v39 = vld [vmem:[%s5471_s0 + $0xa0] sm:$0xff]   ;;  %v5165_v41 = vld [vmem:[%s5471_s0 + $0x2b0] sm:$0xff]   ;;  %v5136_v42 = vld [vmem:[%s5471_s0 + $0xa8] sm:$0xff]  }
  0x2e   : > { %v5139_v43 = vld [vmem:[%s5471_s0 + $0xb0] sm:$0xff]   ;;  %v5166_v44 = vld [vmem:[%s5471_s0 + $0x2b8] sm:$0xff]   ;;  %v5169_v45 = vld [vmem:[%s5471_s0 + $0x2c0] sm:$0xff]  }
  0x2f   : > { %v5140_v46 = vld [vmem:[%s5471_s0 + $0xb8] sm:$0xff]   ;;  %v5143_v47 = vld [vmem:[%s5471_s0 + $0xc0] sm:$0xff]   ;;  %v5170_v48 = vld [vmem:[%s5471_s0 + $0x2c8] sm:$0xff]  }
  0x30   : > { %v5173_v49 = vld [vmem:[%s5471_s0 + $0x2d0] sm:$0xff]   ;;  %v5144_v50 = vld [vmem:[%s5471_s0 + $0xc8] sm:$0xff]   ;;  %v5174_v52 = vld [vmem:[%s5471_s0 + $0x2d8] sm:$0xff]  }
  0x31   : > { %v5147_v51 = vld [vmem:[%s5471_s0 + $0xd0] sm:$0xff]   ;;  %v5177_v53 = vld [vmem:[%s5471_s0 + $0x2e0] sm:$0xff]   ;;  %v5148_v54 = vld [vmem:[%s5471_s0 + $0xd8] sm:$0xff]  }
  0x32   : > { %4766 = vmatmul.mubr.msk.bf16.gmra.mxu0 %vm1494_vm1, %v5116_v7  ;;  %4906 = vmatmul.mubr.msk.bf16.gmra.mxu1 %vm1494_vm1, %v5138_v16  ;;  %v5151_v55 = vld [vmem:[%s5471_s0 + $0xe0] sm:$0xff]   ;;  %v5178_v56 = vld [vmem:[%s5471_s0 + $0x2e8] sm:$0xff]   ;;  %v5181_v57 = vld [vmem:[%s5471_s0 + $0x2f0] sm:$0xff]  }
  0x33   : > { %4769 = vmatprep.mubr.msk.bf16.mxu0 %vm1494_vm1, %v5117_v8  ;;  %4909 = vmatprep.mubr.msk.bf16.mxu1 %vm1494_vm1, %v5141_v17  ;;  %v5152_v58 = vld [vmem:[%s5471_s0 + $0xe8] sm:$0xff]   ;;  %v5155_v59 = vld [vmem:[%s5471_s0 + $0xf0] sm:$0xff]   ;;  %v5182_v60 = vld [vmem:[%s5471_s0 + $0x2f8] sm:$0xff]  }
  0x34   : > { %v5185_v61 = vld [vmem:[%s5471_s0 + $0x300] sm:$0xff]   ;;  %v5156_v62 = vld [vmem:[%s5471_s0 + $0xf8] sm:$0xff]   ;;  %v5186_v0 = vld [vmem:[%s5471_s0 + $0x308] sm:$0xff]  }
  0x35   : > { %v5159_v63 = vld [vmem:[%s5471_s0 + $0x100] sm:$0xff]   ;;  %v5189_v1 = vld [vmem:[%s5471_s0 + $0x310] sm:$0xff]   ;;  %v5160_v2 = vld [vmem:[%s5471_s0 + $0x108] sm:$0xff]  }
  0x36   : > { %v5163_v3 = vld [vmem:[%s5471_s0 + $0x110] sm:$0xff]   ;;  %v5190_v4 = vld [vmem:[%s5471_s0 + $0x318] sm:$0xff]   ;;  %v5193_v5 = vld [vmem:[%s5471_s0 + $0x320] sm:$0xff]  }
  0x37   : > { %v5164_v6 = vld [vmem:[%s5471_s0 + $0x118] sm:$0xff]   ;;  %v5167_v7 = vld [vmem:[%s5471_s0 + $0x120] sm:$0xff]   ;;  %v5194_v8 = vld [vmem:[%s5471_s0 + $0x328] sm:$0xff]  }
  0x38   : > { %v5171_v11 = vld [vmem:[%s5471_s0 + $0x130] sm:$0xff]   ;;  %v5198_v12 = vld [vmem:[%s5471_s0 + $0x338] sm:$0xff]   ;;  %v5201_v13 = vld [vmem:[%s5471_s0 + $0x340] sm:$0xff]  }
  0x39   : > { %v5202_v16 = vld [vmem:[%s5471_s0 + $0x348] sm:$0xff]   ;;  %v5205_v17 = vld [vmem:[%s5471_s0 + $0x350] sm:$0xff]  }
  0x3a   : > { %4770 = vmatmul.mubr.msk.bf16.gmra.mxu0 %vm1494_vm1, %v5118_v9  ;;  %4910 = vmatmul.mubr.msk.bf16.gmra.mxu1 %vm1494_vm1, %v5142_v20  ;;  %v5197_v9 = vld [vmem:[%s5471_s0 + $0x330] sm:$0xff]   ;;  %v5206_v20 = vld [vmem:[%s5471_s0 + $0x358] sm:$0xff]  }
  0x3b   : > { %4773 = vmatprep.mubr.msk.bf16.mxu0 %vm1494_vm1, %v5119_v10  ;;  %4913 = vmatprep.mubr.msk.bf16.mxu1 %vm1494_vm1, %v5145_v21  ;;  %v5168_v10 = vld [vmem:[%s5471_s0 + $0x128] sm:$0xff]   ;;  %v5209_v21 = vld [vmem:[%s5471_s0 + $0x360] sm:$0xff]  }
  0x42   : > { %4774 = vmatmul.mubr.msk.bf16.gmra.mxu0 %vm1494_vm1, %v5120_v14  ;;  %4914 = vmatmul.mubr.msk.bf16.gmra.mxu1 %vm1494_vm1, %v5146_v24  ;;  %v5172_v14 = vld [vmem:[%s5471_s0 + $0x138] sm:$0xff]   ;;  %v5210_v24 = vld [vmem:[%s5471_s0 + $0x368] sm:$0xff]  }
  0x43   : > { %4777 = vmatprep.mubr.msk.bf16.mxu0 %vm1494_vm1, %v5121_v15  ;;  %4917 = vmatprep.mubr.msk.bf16.mxu1 %vm1494_vm1, %v5149_v25  ;;  %v5175_v15 = vld [vmem:[%s5471_s0 + $0x140] sm:$0xff]   ;;  %v5213_v25 = vld [vmem:[%s5471_s0 + $0x370] sm:$0xff]  }
  0x4a   : > { %4778 = vmatmul.mubr.msk.bf16.gmra.mxu0 %vm1494_vm1, %v5122_v18  ;;  %4918 = vmatmul.mubr.msk.bf16.gmra.mxu1 %vm1494_vm1, %v5150_v28  ;;  %v5176_v18 = vld [vmem:[%s5471_s0 + $0x148] sm:$0xff]   ;;  %v5214_v28 = vld [vmem:[%s5471_s0 + $0x378] sm:$0xff]  }
  0x4b   : > { %4781 = vmatprep.mubr.msk.bf16.mxu0 %vm1494_vm1, %v5123_v19  ;;  %4921 = vmatprep.mubr.msk.bf16.mxu1 %vm1494_vm1, %v5153_v29  ;;  %v5179_v19 = vld [vmem:[%s5471_s0 + $0x150] sm:$0xff]   ;;  %v5217_v29 = vld [vmem:[%s5471_s0 + $0x380] sm:$0xff]  }
  0x52   : > { %4782 = vmatmul.mubr.msk.bf16.gmra.mxu0 %vm1494_vm1, %v5124_v22  ;;  %4922 = vmatmul.mubr.msk.bf16.gmra.mxu1 %vm1494_vm1, %v5154_v32  ;;  %v5180_v22 = vld [vmem:[%s5471_s0 + $0x158] sm:$0xff]   ;;  %v5218_v32 = vld [vmem:[%s5471_s0 + $0x388] sm:$0xff]  }
  0x53   : > { %4785 = vmatprep.mubr.msk.bf16.mxu0 %vm1494_vm1, %v5125_v23  ;;  %4925 = vmatprep.mubr.msk.bf16.mxu1 %vm1494_vm1, %v5157_v33  ;;  %v5183_v23 = vld [vmem:[%s5471_s0 + $0x160] sm:$0xff]   ;;  %v5221_v33 = vld [vmem:[%s5471_s0 + $0x390] sm:$0xff]  }
  0x5a   : > { %4786 = vmatmul.mubr.msk.bf16.gmra.mxu0 %vm1494_vm1, %v5126_v26  ;;  %4926 = vmatmul.mubr.msk.bf16.gmra.mxu1 %vm1494_vm1, %v5158_v36  ;;  %v5184_v26 = vld [vmem:[%s5471_s0 + $0x168] sm:$0xff]   ;;  %v5222_v36 = vld [vmem:[%s5471_s0 + $0x398] sm:$0xff]  }
  0x5b   : > { %4789 = vmatprep.mubr.msk.bf16.mxu0 %vm1494_vm1, %v5127_v27  ;;  %4929 = vmatprep.mubr.msk.bf16.mxu1 %vm1494_vm1, %v5161_v37  ;;  %v5187_v27 = vld [vmem:[%s5471_s0 + $0x170] sm:$0xff]   ;;  %v5241_v37 = vld [vmem:[%s6619_s3 + $0x8] sm:$0xff]  }
  0x62   : > { %4790 = vmatmul.mubr.msk.bf16.gmra.mxu0 %vm1494_vm1, %v5128_v30  ;;  %4930 = vmatmul.mubr.msk.bf16.gmra.mxu1 %vm1494_vm1, %v5162_v40  ;;  %v5188_v30 = vld [vmem:[%s5471_s0 + $0x178] sm:$0xff]  }
  0x63   : > { %4793 = vmatprep.mubr.msk.bf16.mxu0 %vm1494_vm1, %v5129_v31  ;;  %4933 = vmatprep.mubr.msk.bf16.mxu1 %vm1494_vm1, %v5165_v41  ;;  %v5191_v31 = vld [vmem:[%s5471_s0 + $0x180] sm:$0xff]  }
  0x64   : > { %v5675_v41 = vld [vmem:[%s6620_s2] ss:$0 sm:$0xff] }
  0x6a   : > { %4794 = vmatmul.mubr.msk.bf16.gmra.mxu0 %vm1494_vm1, %v5130_v34  ;;  %4934 = vmatmul.mubr.msk.bf16.gmra.mxu1 %vm1494_vm1, %v5166_v44  ;;  %v5192_v34 = vld [vmem:[%s5471_s0 + $0x188] sm:$0xff]  }
  0x6b   : > { %4797 = vmatprep.mubr.msk.bf16.mxu0 %vm1494_vm1, %v5131_v35  ;;  %4937 = vmatprep.mubr.msk.bf16.mxu1 %vm1494_vm1, %v5169_v45  ;;  %v5195_v35 = vld [vmem:[%s5471_s0 + $0x190] sm:$0xff]   ;;  %v5196_v45 = vld [vmem:[%s5471_s0 + $0x198] sm:$0xff]  }
  0x72   : > { %4798 = vmatmul.mubr.msk.bf16.gmra.mxu0 %vm1494_vm1, %v5132_v38  ;;  %4938 = vmatmul.mubr.msk.bf16.gmra.mxu1 %vm1494_vm1, %v5170_v48  ;;  %v5225_v38 = vld [vmem:[%s5471_s0 + $0x3a0] sm:$0xff]  }
  0x73   : > { %4801 = vmatprep.mubr.msk.bf16.mxu0 %vm1494_vm1, %v5135_v39  ;;  %4941 = vmatprep.mubr.msk.bf16.mxu1 %vm1494_vm1, %v5173_v49  ;;  %v5317_v39 = vmov 0.0   ;;  %v5226_v49 = vld [vmem:[%s5471_s0 + $0x3a8] sm:$0xff]  }
  0x74   : > { %5017 = vmatprep.subr.bf16.mxu1 %v5317_v39 }
  0x75   : > { %5018 = vmatpush3.bf16.msra.mxu1 %v5241_v37 }
  0x76   : > { %5019 = vmatprep.subr.bf16.mxu1 %v5317_v39 }
  0x7a   : > { %4802 = vmatmul.mubr.msk.bf16.gmra.mxu0 %vm1494_vm1, %v5136_v42  ;;  %4942 = vmatmul.mubr.msk.bf16.gmra.mxu1 %vm1494_vm1, %v5174_v52 }
  0x7b   : > { %4805 = vmatprep.mubr.msk.bf16.mxu0 %vm1494_vm1, %v5139_v43  ;;  %4945 = vmatprep.mubr.msk.bf16.mxu1 %vm1494_vm1, %v5177_v53  ;;  %v5229_v53 = vld [vmem:[%s5471_s0 + $0x3b0] sm:$0xff]  }
  0x82   : > { %4806 = vmatmul.mubr.msk.bf16.gmra.mxu0 %vm1494_vm1, %v5140_v46  ;;  %4946 = vmatmul.mubr.msk.bf16.gmra.mxu1 %vm1494_vm1, %v5178_v56 }
  0x83   : > { %4809 = vmatprep.mubr.msk.bf16.mxu0 %vm1494_vm1, %v5143_v47  ;;  %4949 = vmatprep.mubr.msk.bf16.mxu1 %vm1494_vm1, %v5181_v57  ;;  %v5199_v47 = vld [vmem:[%s5471_s0 + $0x1a0] sm:$0xff]  }
  0x8a   : > { %4810 = vmatmul.mubr.msk.bf16.gmra.mxu0 %vm1494_vm1, %v5144_v50  ;;  %4950 = vmatmul.mubr.msk.bf16.gmra.mxu1 %vm1494_vm1, %v5182_v60 }
  0x8b   : > { %4813 = vmatprep.mubr.msk.bf16.mxu0 %vm1494_vm1, %v5147_v51  ;;  %4953 = vmatprep.mubr.msk.bf16.mxu1 %vm1494_vm1, %v5185_v61 }
  0x92   : > { %4814 = vmatmul.mubr.msk.bf16.gmra.mxu0 %vm1494_vm1, %v5148_v54  ;;  %4954 = vmatmul.mubr.msk.bf16.gmra.mxu1 %vm1494_vm1, %v5186_v0  ;;  %v5200_v0 = vld [vmem:[%s5471_s0 + $0x1a8] sm:$0xff]  }
  0x93   : > { %4817 = vmatprep.mubr.msk.bf16.mxu0 %vm1494_vm1, %v5151_v55  ;;  %4957 = vmatprep.mubr.msk.bf16.mxu1 %vm1494_vm1, %v5189_v1 }
  0x9a   : > { %4818 = vmatmul.mubr.msk.bf16.gmra.mxu0 %vm1494_vm1, %v5152_v58  ;;  %4958 = vmatmul.mubr.msk.bf16.gmra.mxu1 %vm1494_vm1, %v5190_v4  ;;  %v5203_v4 = vld [vmem:[%s5471_s0 + $0x1b0] sm:$0xff]  }
  0x9b   : > { %4821 = vmatprep.mubr.msk.bf16.mxu0 %vm1494_vm1, %v5155_v59  ;;  %4961 = vmatprep.mubr.msk.bf16.mxu1 %vm1494_vm1, %v5193_v5 }
  0xa2   : > { %4822 = vmatmul.mubr.msk.bf16.gmra.mxu0 %vm1494_vm1, %v5156_v62  ;;  %4962 = vmatmul.mubr.msk.bf16.gmra.mxu1 %vm1494_vm1, %v5194_v8 }
  0xa3   : > { %4825 = vmatprep.mubr.msk.bf16.mxu0 %vm1494_vm1, %v5159_v63  ;;  %4965 = vmatprep.mubr.msk.bf16.mxu1 %vm1494_vm1, %v5197_v9 }
  0xaa   : > { %4826 = vmatmul.mubr.msk.bf16.gmra.mxu0 %vm1494_vm1, %v5160_v2  ;;  %4966 = vmatmul.mubr.msk.bf16.gmra.mxu1 %vm1494_vm1, %v5198_v12 }
  0xab   : > { %4829 = vmatprep.mubr.msk.bf16.mxu0 %vm1494_vm1, %v5163_v3  ;;  %4969 = vmatprep.mubr.msk.bf16.mxu1 %vm1494_vm1, %v5201_v13 }
  0xb2   : > { %4830 = vmatmul.mubr.msk.bf16.gmra.mxu0 %vm1494_vm1, %v5164_v6  ;;  %4970 = vmatmul.mubr.msk.bf16.gmra.mxu1 %vm1494_vm1, %v5202_v16 }
  0xb3   : > { %4833 = vmatprep.mubr.msk.bf16.mxu0 %vm1494_vm1, %v5167_v7  ;;  %4973 = vmatprep.mubr.msk.bf16.mxu1 %vm1494_vm1, %v5205_v17  ;;  %v5230_v7 = vld [vmem:[%s5471_s0 + $0x3b8] sm:$0xff]  }
  0xba   : > { %4834 = vmatmul.mubr.msk.bf16.gmra.mxu0 %vm1494_vm1, %v5168_v10  ;;  %4974 = vmatmul.mubr.msk.bf16.gmra.mxu1 %vm1494_vm1, %v5206_v20 }
  0xbb   : > { %4837 = vmatprep.mubr.msk.bf16.mxu0 %vm1494_vm1, %v5171_v11  ;;  %4977 = vmatprep.mubr.msk.bf16.mxu1 %vm1494_vm1, %v5209_v21  ;;  %v5233_v11 = vld [vmem:[%s5471_s0 + $0x3c0] sm:$0xff]  }
  0xc2   : > { %4838 = vmatmul.mubr.msk.bf16.gmra.mxu0 %vm1494_vm1, %v5172_v14  ;;  %4978 = vmatmul.mubr.msk.bf16.gmra.mxu1 %vm1494_vm1, %v5210_v24 }
  0xc3   : > { %4841 = vmatprep.mubr.msk.bf16.mxu0 %vm1494_vm1, %v5175_v15  ;;  %4981 = vmatprep.mubr.msk.bf16.mxu1 %vm1494_vm1, %v5213_v25  ;;  %v5204_v25 = vld [vmem:[%s5471_s0 + $0x1b8] sm:$0xff]  }
  0xca   : > { %4842 = vmatmul.mubr.msk.bf16.gmra.mxu0 %vm1494_vm1, %v5176_v18  ;;  %4982 = vmatmul.mubr.msk.bf16.gmra.mxu1 %vm1494_vm1, %v5214_v28 }
  0xcb   : > { %4845 = vmatprep.mubr.msk.bf16.mxu0 %vm1494_vm1, %v5179_v19  ;;  %4985 = vmatprep.mubr.msk.bf16.mxu1 %vm1494_vm1, %v5217_v29 }
  0xd2   : > { %4846 = vmatmul.mubr.msk.bf16.gmra.mxu0 %vm1494_vm1, %v5180_v22  ;;  %4986 = vmatmul.mubr.msk.bf16.gmra.mxu1 %vm1494_vm1, %v5218_v32 }
  0xd3   : > { %4849 = vmatprep.mubr.msk.bf16.mxu0 %vm1494_vm1, %v5183_v23  ;;  %4989 = vmatprep.mubr.msk.bf16.mxu1 %vm1494_vm1, %v5221_v33 }
  0xda   : > { %4850 = vmatmul.mubr.msk.bf16.gmra.mxu0 %vm1494_vm1, %v5184_v26  ;;  %4990 = vmatmul.mubr.msk.bf16.gmra.mxu1 %vm1494_vm1, %v5222_v36 }
  0xdb   : > { %4853 = vmatprep.mubr.msk.bf16.mxu0 %vm1494_vm1, %v5187_v27  ;;  %4993 = vmatprep.mubr.msk.bf16.mxu1 %vm1494_vm1, %v5225_v38  ;;  %v5235_v38 = vld [vmem:[%s5471_s0 + $0x3d0] sm:$0xff]  }
  0xe2   : > { %4854 = vmatmul.mubr.msk.bf16.gmra.mxu0 %vm1494_vm1, %v5188_v30  ;;  %4994 = vmatmul.mubr.msk.bf16.gmra.mxu1 %vm1494_vm1, %v5226_v49  ;;  %v5207_v30 = vld [vmem:[%s5471_s0 + $0x1c0] sm:$0xff]  }
  0xe3   : > { %4857 = vmatprep.mubr.msk.bf16.mxu0 %vm1494_vm1, %v5191_v31  ;;  %4997 = vmatprep.mubr.msk.bf16.mxu1 %vm1494_vm1, %v5229_v53 }
  0xea   : > { %v4763_v40 = vpop.f32.mrf.mxu0  ;;  %4858 = vmatmul.mubr.msk.bf16.gmra.mxu0 %vm1494_vm1, %v5192_v34  ;;  %v5706_v19 = vpop.f32.mrf.mxu1  ;;  %4998 = vmatmul.mubr.msk.bf16.gmra.mxu1 %vm1494_vm1, %v5230_v7  ;;  %v5234_v34 = vld [vmem:[%s5471_s0 + $0x3c8] sm:$0xff]  }
  0xeb   : > { %4861 = vmatprep.mubr.msk.bf16.mxu0 %vm1494_vm1, %v5195_v35  ;;  %v1926_v46 = vadd.f32 %v4763_v40, %v5675_v41  ;;  %5001 = vmatprep.mubr.msk.bf16.mxu1 %vm1494_vm1, %v5233_v11 }
  0xec   : > { %v1917_v42 = vpop.f32.mrf.mxu0  ;;  %v5713_v26 = vpop.f32.mrf.mxu1 }
  0xed   : > { %v1918_v43 = vadd.f32 %v5675_v41, %v1917_v42  ;;  %v2942_v55 = vmax.f32 %v1926_v46, 0.0 }
  0xee   : > { %v4764_v44 = vpop.f32.mrf.mxu0  ;;  %v5718_v33 = vpop.f32.mrf.mxu1 }
  0xef   : > { %v2940_v50 = vmax.f32 %v1918_v43, 0.0  ;;  %v1929_v51 = vadd.f32 %v4764_v44, %v5675_v41  ;;  %v3200_v1 = vsel %vm3196_vm2, %v2942_v55, 0.0  ;;  %v5208_v55 = vld [vmem:[%s5471_s0 + $0x1c8] sm:$0xff]  }
  0xf0   : > { %v1920_v48 = vpop.f32.mrf.mxu0  ;;  %v5726_v43 = vpop.f32.mrf.mxu1 }
  0xf1   : > { %v1921_v52 = vadd.f32 %v5675_v41, %v1920_v48  ;;  %v3197_v58 = vsel %vm3196_vm2, %v2940_v50, 0.0  ;;  %v2943_v59 = vmax.f32 %v1929_v51, 0.0 }
  0xf2   : > { %v4767_v54 = vpop.f32.mrf.mxu0  ;;  %4862 = vmatmul.mubr.msk.bf16.gmra.mxu0 %vm1494_vm1, %v5196_v45  ;;  %v5730_v49 = vpop.f32.mrf.mxu1  ;;  %5002 = vmatmul.mubr.msk.bf16.gmra.mxu1 %vm1494_vm1, %v5234_v34 }
  0xf3   : > { %v2941_v56 = vmax.f32 %v1921_v52, 0.0  ;;  %4865 = vmatprep.mubr.msk.bf16.mxu0 %vm1494_vm1, %v5199_v47  ;;  %v1942_v2 = vadd.f32 %v4767_v54, %v5675_v41  ;;  %v3202_v8 = vsel %vm3196_vm2, %v2943_v59, 0.0  ;;  %5005 = vmatprep.mubr.msk.bf16.mxu1 %vm1494_vm1, %v5235_v38 }
  0xf4   : > { %v1933_v57 = vpop.f32.mrf.mxu0 }
  0xf5   : > { %v3198_v60 = vsel %vm3196_vm2, %v2941_v56, 0.0  ;;  %v1934_v61 = vadd.f32 %v5675_v41, %v1933_v57  ;;  %v2946_v14 = vmax.f32 %v1942_v2, 0.0  ;;  %v5737_v56 = vpop.f32.mrf.mxu1 }
  0xf6   : > { %v3199_v62 = vadd.f32 %v3198_v60, %v3197_v58  ;;  %v4768_v63 = vpop.f32.mrf.mxu0  ;;  %v5211_v60 = vld [vmem:[%s5471_s0 + $0x1d0] sm:$0xff]  }
  0xf7   : > { %v2944_v3 = vmax.f32 %v1934_v61, 0.0  ;;  %v1945_v9 = vadd.f32 %v4768_v63, %v5675_v41  ;;  %v3208_v27 = vsel %vm3196_vm2, %v2946_v14, 0.0  ;;  %v5742_v63 = vpop.f32.mrf.mxu1 }
  0xf8   : > { %v3201_v5 = vadd.f32 %v3200_v1, %v3199_v62  ;;  %v1936_v6 = vpop.f32.mrf.mxu0 }
  0xf9   : > { %v1937_v10 = vadd.f32 %v5675_v41, %v1936_v6  ;;  %v3204_v15 = vsel %vm3196_vm2, %v2944_v3, 0.0  ;;  %v2947_v20 = vmax.f32 %v1945_v9, 0.0  ;;  %v5750_v7 = vpop.f32.mrf.mxu1 }
  0xfa   : > { %v3203_v12 = vadd.f32 %v3202_v8, %v3201_v5  ;;  %v4771_v13 = vpop.f32.mrf.mxu0  ;;  %4866 = vmatmul.mubr.msk.bf16.gmra.mxu0 %vm1494_vm1, %v5200_v0  ;;  %v5236_v0 = vld [vmem:[%s5471_s0 + $0x3d8] sm:$0xff]  }
  0xfb   : > { %v2945_v16 = vmax.f32 %v1937_v10, 0.0  ;;  %4869 = vmatprep.mubr.msk.bf16.mxu0 %vm1494_vm1, %v5203_v4  ;;  %v1958_v28 = vadd.f32 %v4771_v13, %v5675_v41  ;;  %v3210_v35 = vsel %vm3196_vm2, %v2947_v20, 0.0  ;;  %v5237_v4 = vld [vmem:[%s5471_s0 + $0x3e0] sm:$0xff]   ;;  %v5754_v13 = vpop.f32.mrf.mxu1  ;;  %5006 = vmatmul.mubr.msk.bf16.gmra.mxu1 %vm1494_vm1, %v5236_v0  ;;  %v5212_v20 = vld [vmem:[%s5471_s0 + $0x1d8] sm:$0xff]  }
  0xfc   : > { %v3205_v17 = vadd.f32 %v3204_v15, %v3203_v12  ;;  %v1949_v18 = vpop.f32.mrf.mxu0  ;;  %5009 = vmatprep.mubr.msk.bf16.mxu1 %vm1494_vm1, %v5237_v4 }
  0xfd   : > { %v3206_v21 = vsel %vm3196_vm2, %v2945_v16, 0.0  ;;  %v1950_v22 = vadd.f32 %v5675_v41, %v1949_v18  ;;  %v2950_v44 = vmax.f32 %v1958_v28, 0.0 }
  0xfe   : > { %v3207_v23 = vadd.f32 %v3206_v21, %v3205_v17  ;;  %v4772_v24 = vpop.f32.mrf.mxu0  ;;  %v5761_v21 = vpop.f32.mrf.mxu1 }
  0xff   : > { %v2948_v29 = vmax.f32 %v1950_v22, 0.0  ;;  %v1961_v36 = vadd.f32 %v4772_v24, %v5675_v41  ;;  %v3216_v57 = vsel %vm3196_vm2, %v2950_v44, 0.0 }
 0x100   : > { %v3209_v31 = vadd.f32 %v3208_v27, %v3207_v23  ;;  %v1952_v32 = vpop.f32.mrf.mxu0 }
 0x101   : > { %v1953_v37 = vadd.f32 %v5675_v41, %v1952_v32  ;;  %v3212_v45 = vsel %vm3196_vm2, %v2948_v29, 0.0  ;;  %v2951_v50 = vmax.f32 %v1961_v36, 0.0  ;;  %v5766_v29 = vpop.f32.mrf.mxu1 }
 0x102   : > { %v3211_v40 = vadd.f32 %v3210_v35, %v3209_v31  ;;  %v4775_v42 = vpop.f32.mrf.mxu0  ;;  %4870 = vmatmul.mubr.msk.bf16.gmra.mxu0 %vm1494_vm1, %v5204_v25  ;;  %v5215_v25 = vld [vmem:[%s5471_s0 + $0x1e0] sm:$0xff]   ;;  %v5239_v35 = vld [vmem:[%s5471_s0 + $0x3f0] sm:$0xff]  }
 0x103   : > { %v2949_v46 = vmax.f32 %v1953_v37, 0.0  ;;  %4873 = vmatprep.mubr.msk.bf16.mxu0 %vm1494_vm1, %v5207_v30  ;;  %v1974_v58 = vadd.f32 %v4775_v42, %v5675_v41  ;;  %v3218_v1 = vsel %vm3196_vm2, %v2951_v50, 0.0  ;;  %v5238_v30 = vld [vmem:[%s5471_s0 + $0x3e8] sm:$0xff]   ;;  %v5774_v38 = vpop.f32.mrf.mxu1 }
 0x104   : > { %v3213_v47 = vadd.f32 %v3212_v45, %v3211_v40  ;;  %v1965_v48 = vpop.f32.mrf.mxu0  ;;  %5010 = vmatmul.mubr.msk.bf16.gmra.mxu1 %vm1494_vm1, %v5238_v30  ;;  %v5223_v30 = vld [vmem:[%s5471_s0 + $0x200] sm:$0xff]  }
 0x105   : > { %v3214_v51 = vsel %vm3196_vm2, %v2949_v46, 0.0  ;;  %v1966_v52 = vadd.f32 %v5675_v41, %v1965_v48  ;;  %v2954_v8 = vmax.f32 %v1974_v58, 0.0  ;;  %5013 = vmatprep.mubr.msk.bf16.mxu1 %vm1494_vm1, %v5239_v35 }
 0x106   : > { %v3215_v53 = vadd.f32 %v3214_v51, %v3213_v47  ;;  %v4776_v54 = vpop.f32.mrf.mxu0  ;;  %v5778_v47 = vpop.f32.mrf.mxu1 }
 0x107   : > { %v2952_v59 = vmax.f32 %v1966_v52, 0.0  ;;  %v1977_v2 = vadd.f32 %v4776_v54, %v5675_v41  ;;  %v3224_v22 = vsel %vm3196_vm2, %v2954_v8, 0.0  ;;  %v5216_v54 = vld [vmem:[%s5471_s0 + $0x1e8] sm:$0xff]  }
 0x108   : > { %v3217_v61 = vadd.f32 %v3216_v57, %v3215_v53  ;;  %v1968_v62 = vpop.f32.mrf.mxu0 }
 0x109   : > { %v1969_v3 = vadd.f32 %v5675_v41, %v1968_v62  ;;  %v3220_v9 = vsel %vm3196_vm2, %v2952_v59, 0.0  ;;  %v2955_v14 = vmax.f32 %v1977_v2, 0.0 }
 0x10a   : > { %v3219_v5 = vadd.f32 %v3218_v1, %v3217_v61  ;;  %v4779_v6 = vpop.f32.mrf.mxu0  ;;  %4874 = vmatmul.mubr.msk.bf16.gmra.mxu0 %vm1494_vm1, %v5208_v55  ;;  %v5785_v55 = vpop.f32.mrf.mxu1  ;;  %v5240_v1 = vld [vmem:[%s5471_s0 + $0x3f8] sm:$0xff]  }
 0x10b   : > { %v2953_v10 = vmax.f32 %v1969_v3, 0.0  ;;  %4877 = vmatprep.mubr.msk.bf16.mxu0 %vm1494_vm1, %v5211_v60  ;;  %v1990_v23 = vadd.f32 %v4779_v6, %v5675_v41  ;;  %v3226_v31 = vsel %vm3196_vm2, %v2955_v14, 0.0  ;;  %v5219_v60 = vld [vmem:[%s5471_s0 + $0x1f0] sm:$0xff]  }
 0x10c   : > { %v3221_v11 = vadd.f32 %v3220_v9, %v3219_v5  ;;  %v1981_v12 = vpop.f32.mrf.mxu0  ;;  %v5790_v0 = vpop.f32.mrf.mxu1  ;;  %5014 = vmatmul.mubr.msk.bf16.gmra.mxu1 %vm1494_vm1, %v5240_v1 }
 0x10d   : > { %v3222_v15 = vsel %vm3196_vm2, %v2953_v10, 0.0  ;;  %v1982_v16 = vadd.f32 %v5675_v41, %v1981_v12  ;;  %v2958_v40 = vmax.f32 %v1990_v23, 0.0  ;;  %5021 = vmatprep.mubr.msk.bf16.mxu1 %vm5318_vm6, %v5317_v39 }
 0x10e   : > { %v3223_v17 = vadd.f32 %v3222_v15, %v3221_v11  ;;  %v4780_v18 = vpop.f32.mrf.mxu0  ;;  %v5797_v8 = vpop.f32.mrf.mxu1 }
 0x10f   : > { %v2956_v24 = vmax.f32 %v1982_v16, 0.0  ;;  %v1993_v32 = vadd.f32 %v4780_v18, %v5675_v41  ;;  %v3232_v57 = vsel %vm3196_vm2, %v2958_v40, 0.0 }
 0x110   : > { %v3225_v27 = vadd.f32 %v3224_v22, %v3223_v17  ;;  %v1984_v28 = vpop.f32.mrf.mxu0  ;;  %v5801_v15 = vpop.f32.mrf.mxu1 }
 0x111   : > { %v1985_v34 = vadd.f32 %v5675_v41, %v1984_v28  ;;  %v3228_v42 = vsel %vm3196_vm2, %v2956_v24, 0.0  ;;  %v2959_v48 = vmax.f32 %v1993_v32, 0.0  ;;  %v5220_v24 = vld [vmem:[%s5471_s0 + $0x1f8] sm:$0xff]  }
 0x112   : > { %v3227_v36 = vadd.f32 %v3226_v31, %v3225_v27  ;;  %v4783_v37 = vpop.f32.mrf.mxu0  ;;  %4878 = vmatmul.mubr.msk.bf16.gmra.mxu0 %vm1494_vm1, %v5212_v20 }
 0x113   : > { %v2957_v44 = vmax.f32 %v1985_v34, 0.0  ;;  %4881 = vmatprep.mubr.msk.bf16.mxu0 %vm1494_vm1, %v5215_v25  ;;  %v2006_v58 = vadd.f32 %v4783_v37, %v5675_v41  ;;  %v3234_v2 = vsel %vm3196_vm2, %v2959_v48, 0.0  ;;  %v5808_v25 = vpop.f32.mrf.mxu1 }
 0x114   : > { %v3229_v45 = vadd.f32 %v3228_v42, %v3227_v36  ;;  %v1997_v46 = vpop.f32.mrf.mxu0 }
 0x115   : > { %v3230_v50 = vsel %vm3196_vm2, %v2957_v44, 0.0  ;;  %v1998_v51 = vadd.f32 %v5675_v41, %v1997_v46  ;;  %v2962_v9 = vmax.f32 %v2006_v58, 0.0  ;;  %v5812_v34 = vpop.f32.mrf.mxu1 }
 0x116   : > { %v3231_v52 = vadd.f32 %v3230_v50, %v3229_v45  ;;  %v4784_v53 = vpop.f32.mrf.mxu0 }
 0x117   : > { %v2960_v59 = vmax.f32 %v1998_v51, 0.0  ;;  %v2009_v3 = vadd.f32 %v4784_v53, %v5675_v41  ;;  %v3240_v27 = vsel %vm3196_vm2, %v2962_v9, 0.0  ;;  %v5818_v45 = vpop.f32.mrf.mxu1 }
 0x118   : > { %v3233_v61 = vadd.f32 %v3232_v57, %v3231_v52  ;;  %v2000_v62 = vpop.f32.mrf.mxu0 }
 0x119   : > { %v2001_v4 = vadd.f32 %v5675_v41, %v2000_v62  ;;  %v3236_v10 = vsel %vm3196_vm2, %v2960_v59, 0.0  ;;  %v2963_v16 = vmax.f32 %v2009_v3, 0.0  ;;  %v4923_v52 = vpop.f32.mrf.mxu1  ;;  %v5224_v62 = vld [vmem:[%s5471_s0 + $0x208] sm:$0xff]  }
 0x11a   : > { %v3235_v5 = vadd.f32 %v3234_v2, %v3233_v61  ;;  %v4787_v6 = vpop.f32.mrf.mxu0  ;;  %4882 = vmatmul.mubr.msk.bf16.gmra.mxu0 %vm1494_vm1, %v5216_v54 }
 0x11b   : > { %v2961_v11 = vmax.f32 %v2001_v4, 0.0  ;;  %4885 = vmatprep.mubr.msk.bf16.mxu0 %vm1494_vm1, %v5219_v60  ;;  %v2022_v22 = vadd.f32 %v4787_v6, %v5675_v41  ;;  %v3242_v35 = vsel %vm3196_vm2, %v2963_v16, 0.0  ;;  %v2557_v1 = vpop.f32.mrf.mxu1  ;;  %v5227_v4 = vld [vmem:[%s5471_s0 + $0x210] sm:$0xff]  }
 0x11c   : > { %v3237_v12 = vadd.f32 %v3236_v10, %v3235_v5  ;;  %v2013_v14 = vpop.f32.mrf.mxu0  ;;  %v2566_v5 = vadd.f32 %v4923_v52, %v5675_v41  ;;  %v2558_v6 = vadd.f32 %v5675_v41, %v2557_v1 }
 0x11d   : > { %v3238_v17 = vsel %vm3196_vm2, %v2961_v11, 0.0  ;;  %v2014_v18 = vadd.f32 %v5675_v41, %v2013_v14  ;;  %v2966_v40 = vmax.f32 %v2022_v22, 0.0  ;;  %v4924_v11 = vpop.f32.mrf.mxu1 }
 0x11e   : > { %v3239_v20 = vadd.f32 %v3238_v17, %v3237_v12  ;;  %v4788_v23 = vpop.f32.mrf.mxu0  ;;  %v2569_v22 = vadd.f32 %v4924_v11, %v5675_v41 }
 0x11f   : > { %v2964_v28 = vmax.f32 %v2014_v18, 0.0  ;;  %v2025_v36 = vadd.f32 %v4788_v23, %v5675_v41  ;;  %v3248_v58 = vsel %vm3196_vm2, %v2966_v40, 0.0  ;;  %v2560_v23 = vpop.f32.mrf.mxu1 }
 0x120   : > { %v3241_v31 = vadd.f32 %v3240_v27, %v3239_v20  ;;  %v2016_v32 = vpop.f32.mrf.mxu0  ;;  %v3100_v20 = vmax.f32 %v2558_v6, 0.0 }
 0x121   : > { %v2017_v37 = vadd.f32 %v5675_v41, %v2016_v32  ;;  %v3244_v46 = vsel %vm3196_vm2, %v2964_v28, 0.0  ;;  %v2967_v53 = vmax.f32 %v2025_v36, 0.0  ;;  %v4927_v36 = vpop.f32.mrf.mxu1 }
 0x122   : > { %v3243_v42 = vadd.f32 %v3242_v35, %v3241_v31  ;;  %v4791_v44 = vpop.f32.mrf.mxu0  ;;  %4886 = vmatmul.mubr.msk.bf16.gmra.mxu0 %vm1494_vm1, %v5220_v24  ;;  %v2561_v35 = vadd.f32 %v5675_v41, %v2560_v23 }
 0x123   : > { %v2965_v48 = vmax.f32 %v2017_v37, 0.0  ;;  %4889 = vmatprep.mubr.msk.bf16.mxu0 %vm1494_vm1, %v5223_v30  ;;  %v2038_v60 = vadd.f32 %v4791_v44, %v5675_v41  ;;  %v3250_v12 = vsel %vm3196_vm2, %v2967_v53, 0.0  ;;  %v3102_v30 = vmax.f32 %v2566_v5, 0.0  ;;  %v2573_v53 = vpop.f32.mrf.mxu1 }
 0x124   : > { %v3245_v50 = vadd.f32 %v3244_v46, %v3243_v42  ;;  %v2029_v51 = vpop.f32.mrf.mxu0  ;;  %v3101_v52 = vmax.f32 %v2561_v35, 0.0 }
 0x125   : > { %v3246_v54 = vsel %vm3196_vm2, %v2965_v48, 0.0  ;;  %v2030_v57 = vadd.f32 %v5675_v41, %v2029_v51  ;;  %v2970_v16 = vmax.f32 %v2038_v60, 0.0  ;;  %v5228_v48 = vld [vmem:[%s5471_s0 + $0x218] sm:$0xff]   ;;  %v3103_v51 = vmax.f32 %v2569_v22, 0.0 }
 0x126   : > { %v3247_v59 = vadd.f32 %v3246_v54, %v3245_v50  ;;  %v4792_v61 = vpop.f32.mrf.mxu0  ;;  %v3542_v50 = vsel %vm3196_vm2, %v3100_v20, 0.0  ;;  %v2582_v60 = vadd.f32 %v4927_v36, %v5675_v41 }
 0x127   : > { %v2968_v2 = vmax.f32 %v2030_v57, 0.0  ;;  %v2041_v3 = vadd.f32 %v4792_v61, %v5675_v41  ;;  %v3256_v54 = vsel %vm3196_vm2, %v2970_v16, 0.0 }
 0x128   : > { %v3249_v9 = vadd.f32 %v3248_v58, %v3247_v59  ;;  %v2032_v10 = vpop.f32.mrf.mxu0  ;;  %v5231_v58 = vld [vmem:[%s5471_s0 + $0x220] sm:$0xff]   ;;  %v3545_v59 = vsel %vm3196_vm2, %v3102_v30, 0.0  ;;  %v3106_v23 = vmax.f32 %v2582_v60, 0.0 }
 0x129   : > { %v2033_v14 = vadd.f32 %v5675_v41, %v2032_v10  ;;  %v3252_v24 = vsel %vm3196_vm2, %v2968_v2, 0.0  ;;  %v2971_v27 = vmax.f32 %v2041_v3, 0.0  ;;  %v3543_v2 = vsel %vm3196_vm2, %v3101_v52, 0.0 }
 0x12a   : > { %v3251_v17 = vadd.f32 %v3250_v12, %v3249_v9  ;;  %v4795_v18 = vpop.f32.mrf.mxu0  ;;  %4890 = vmatmul.mubr.msk.bf16.gmra.mxu0 %vm1494_vm1, %v5224_v62  ;;  %v2574_v3 = vadd.f32 %v5675_v41, %v2573_v53  ;;  %v3544_v10 = vadd.f32 %v3543_v2, %v3542_v50 }
 0x12b   : > { %v2969_v28 = vmax.f32 %v2033_v14, 0.0  ;;  %4893 = vmatprep.mubr.msk.bf16.mxu0 %vm1494_vm1, %v5227_v4  ;;  %v2054_v40 = vadd.f32 %v4795_v18, %v5675_v41  ;;  %v3258_v57 = vsel %vm3196_vm2, %v2971_v27, 0.0  ;;  %v4928_v4 = vpop.f32.mrf.mxu1  ;;  %v3547_v14 = vsel %vm3196_vm2, %v3103_v51, 0.0 }
 0x12c   : > { %v3253_v31 = vadd.f32 %v3252_v24, %v3251_v17  ;;  %v2045_v32 = vpop.f32.mrf.mxu0  ;;  %v3104_v16 = vmax.f32 %v2574_v3, 0.0  ;;  %v2585_v17 = vadd.f32 %v4928_v4, %v5675_v41  ;;  %v3546_v22 = vadd.f32 %v3545_v59, %v3544_v10 }
 0x12d   : > { %v3254_v37 = vsel %vm3196_vm2, %v2969_v28, 0.0  ;;  %v2046_v42 = vadd.f32 %v5675_v41, %v2045_v32  ;;  %v2974_v5 = vmax.f32 %v2054_v40, 0.0  ;;  %v2576_v18 = vpop.f32.mrf.mxu1 }
 0x12e   : > { %v3255_v44 = vadd.f32 %v3254_v37, %v3253_v31  ;;  %v4796_v46 = vpop.f32.mrf.mxu0  ;;  %v3549_v30 = vsel %vm3196_vm2, %v3104_v16, 0.0  ;;  %v2577_v31 = vadd.f32 %v5675_v41, %v2576_v18  ;;  %v3548_v40 = vadd.f32 %v3547_v14, %v3546_v22 }
 0x12f   : > { %v2972_v62 = vmax.f32 %v2046_v42, 0.0  ;;  %v2057_v6 = vadd.f32 %v4796_v46, %v5675_v41  ;;  %v4931_v32 = vpop.f32.mrf.mxu1  ;;  %v3269_v42 = vsel %vm3196_vm2, %v2974_v5, 0.0  ;;  %v3107_v50 = vmax.f32 %v2585_v17, 0.0 }
 0x130   : > { %v3257_v61 = vadd.f32 %v3256_v54, %v3255_v44  ;;  %v2048_v1 = vpop.f32.mrf.mxu0  ;;  %v3105_v51 = vmax.f32 %v2577_v31, 0.0 }
 0x131   : > { %v2049_v9 = vadd.f32 %v5675_v41, %v2048_v1  ;;  %v3266_v27 = vsel %vm3196_vm2, %v2972_v62, 0.0  ;;  %v2975_v35 = vmax.f32 %v2057_v6, 0.0  ;;  %v2589_v52 = vpop.f32.mrf.mxu1  ;;  %v2598_v6 = vadd.f32 %v4931_v32, %v5675_v41 }
 0x132   : > { %v3259_v11 = vadd.f32 %v3258_v57, %v3257_v61  ;;  %v4799_v12 = vpop.f32.mrf.mxu0  ;;  %4894 = vmatmul.mubr.msk.bf16.gmra.mxu0 %vm1494_vm1, %v5228_v48  ;;  %v5232_v48 = vld [vmem:[%s5471_s0 + $0x228] sm:$0xff]   ;;  %v3553_v57 = vsel %vm3196_vm2, %v3106_v23, 0.0  ;;  %v3551_v1 = vsel %vm3196_vm2, %v3105_v51, 0.0  ;;  %s549_s0 = scalar_lea.vmem [#allocation2], %s4319_s19 }
 0x133   : > { %v2973_v20 = vmax.f32 %v2049_v9, 0.0  ;;  %4897 = vmatprep.mubr.msk.bf16.mxu0 %vm1494_vm1, %v5231_v58  ;;  %v2070_v53 = vadd.f32 %v4799_v12, %v5675_v41  ;;  %v3550_v58 = vadd.f32 %v3549_v30, %v3548_v40  ;;  %v4932_v2 = vpop.f32.mrf.mxu1  ;;  %v3271_v3 = vsel %vm3196_vm2, %v2975_v35, 0.0  ;;  %s4205_s30 = sshll.u32 %s549_s0, 4  ;;  %s4206_s30 = int_to_ptr.vmem [resolvable:$true] %s4205_s30 }
 0x134   : > { %v3260_v24 = vrot.slane %v3259_v11, 4  ;;  %v2061_v28 = vpop.f32.mrf.mxu0  ;;  %v2590_v12 = vadd.f32 %v5675_v41, %v2589_v52  ;;  %v3110_v35 = vmax.f32 %v2598_v6, 0.0  ;;  %s5255_s22 = scalar_lea.vmem %s4206_s30, 128 }
 0x135   : > { %v3267_v36 = vsel %vm3196_vm2, %v2973_v20, 0.0  ;;  %v2062_v37 = vadd.f32 %v5675_v41, %v2061_v28  ;;  %v3552_v5 = vadd.f32 %v3551_v1, %v3550_v58  ;;  %v2592_v14 = vpop.f32.mrf.mxu1  ;;  %v2978_v16 = vmax.f32 %v2070_v53, 0.0  ;;  %p5256_p12 = scmp.ne.s32.totalorder %s4206_s30, %s5255_s22 }
 0x136   : > { %v3268_v44 = vadd.f32 %v3267_v36, %v3266_v27  ;;  %v4800_v46 = vpop.f32.mrf.mxu0  ;;  %v3261_v59 = vadd.f32 %v3260_v24, %v3259_v11  ;;  %v3555_v11 = vsel %vm3196_vm2, %v3107_v50, 0.0  ;;  %v3108_v28 = vmax.f32 %v2590_v12, 0.0 }
 0x137   : > { %v2976_v54 = vmax.f32 %v2062_v37, 0.0  ;;  %v2073_v61 = vadd.f32 %v4800_v46, %v5675_v41  ;;  %v3554_v20 = vadd.f32 %v3553_v57, %v3552_v5  ;;  %v4935_v30 = vpop.f32.mrf.mxu1  ;;  %v2601_v46 = vadd.f32 %v4932_v2, %v5675_v41  ;;  %p5257_p13 = pnand %p5256_p12, %p5448_p5 }
 0x138   : > { %v3270_v60 = vadd.f32 %v3269_v42, %v3268_v44  ;;  %v2064_v62 = vpop.f32.mrf.mxu0  ;;  %v3262_v22 = vrot.slane %v3261_v59, 2  ;;  %v3557_v44 = vsel %vm3196_vm2, %v3108_v28, 0.0  ;;  %v3277_v50 = vsel %vm3196_vm2, %v2978_v16, 0.0 }
 0x139   : > { %v2065_v4 = vadd.f32 %v5675_v41, %v2064_v62  ;;  %v3273_v17 = vsel %vm3196_vm2, %v2976_v54, 0.0  ;;  %v2979_v24 = vmax.f32 %v2073_v61, 0.0  ;;  %v3556_v36 = vadd.f32 %v3555_v11, %v3554_v20  ;;  %p5258_p0 = pneg %p5257_p13 }
 0x13a   : > { %v3272_v9 = vadd.f32 %v3271_v3, %v3270_v60  ;;  %v4803_v10 = vpop.f32.mrf.mxu0  ;;  %4898 = vmatmul.mubr.msk.bf16.gmra.mxu0 %vm1494_vm1, %v5232_v48  ;;  %v2605_v48 = vpop.f32.mrf.mxu1  ;;  %v2593_v58 = vadd.f32 %v5675_v41, %v2592_v14  ;;  %v5882_v61 = vadd.f32 %v3262_v22, %v3261_v59  ;;  %v3561_v2 = vsel %vm3196_vm2, %v3110_v35, 0.0 }
 0x13b   : > { %v2977_v18 = vmax.f32 %v2065_v4, 0.0  ;;  %v2086_v40 = vadd.f32 %v4803_v10, %v5675_v41  ;;  %v3558_v53 = vadd.f32 %v3557_v44, %v3556_v36  ;;  %v3279_v62 = vsel %vm3196_vm2, %v2979_v24, 0.0 }
 0x13c   : > { %v3274_v23 = vadd.f32 %v3273_v17, %v3272_v9  ;;  %v2077_v27 = vpop.f32.mrf.mxu0  ;;  %v4936_v60 = vpop.f32.mrf.mxu1  ;;  %v3111_v6 = vmax.f32 %v2601_v46, 0.0  ;;  %v3109_v9 = vmax.f32 %v2593_v58, 0.0  ;;  %v2614_v14 = vadd.f32 %v4935_v30, %v5675_v41 }
 0x13d   : > { %v3275_v31 = vsel %vm3196_vm2, %v2977_v18, 0.0  ;;  %v2078_v32 = vadd.f32 %v5675_v41, %v2077_v27  ;;  %v2982_v3 = vmax.f32 %v2086_v40, 0.0  ;;  %v2606_v22 = vadd.f32 %v5675_v41, %v2605_v48 }
 0x13e   : > { %v3276_v37 = vadd.f32 %v3275_v31, %v3274_v23  ;;  %v4804_v42 = vpop.f32.mrf.mxu0  ;;  %v2608_v10 = vpop.f32.mrf.mxu1  ;;  %v3559_v20 = vsel %vm3196_vm2, %v3109_v9, 0.0  ;;  %v2617_v31 = vadd.f32 %v4936_v60, %v5675_v41  ;;  %v3563_v36 = vsel %vm3196_vm2, %v3111_v6, 0.0 }
 0x13f   : > { %v2980_v51 = vmax.f32 %v2078_v32, 0.0  ;;  %v2089_v52 = vadd.f32 %v4804_v42, %v5675_v41  ;;  %v3560_v28 = vadd.f32 %v3559_v20, %v3558_v53  ;;  %v3285_v32 = vsel %vm3196_vm2, %v2982_v3, 0.0 }
 0x140   : > { %v3278_v54 = vadd.f32 %v3277_v50, %v3276_v37  ;;  %v2080_v57 = vpop.f32.mrf.mxu0  ;;  %v4939_v23 = vpop.f32.mrf.mxu1  ;;  %v3112_v37 = vmax.f32 %v2606_v22, 0.0  ;;  %v3114_v48 = vmax.f32 %v2614_v14, 0.0 }
 0x141   : > { %v2081_v1 = vadd.f32 %v5675_v41, %v2080_v57  ;;  %v3281_v11 = vsel %vm3196_vm2, %v2980_v51, 0.0  ;;  %v2983_v12 = vmax.f32 %v2089_v52, 0.0  ;;  %v3562_v46 = vadd.f32 %v3561_v2, %v3560_v28 }
 0x142   : > { %v3280_v4 = vadd.f32 %v3279_v62, %v3278_v54  ;;  %v4807_v5 = vpop.f32.mrf.mxu0  ;;  %v2621_v40 = vpop.f32.mrf.mxu1  ;;  %v3565_v53 = vsel %vm3196_vm2, %v3112_v37, 0.0  ;;  %v2609_v54 = vadd.f32 %v5675_v41, %v2608_v10  ;;  %v2630_v2 = vadd.f32 %v4939_v23, %v5675_v41 }
 0x143   : > { %v2981_v16 = vmax.f32 %v2081_v1, 0.0  ;;  %v2102_v17 = vadd.f32 %v4807_v5, %v5675_v41  ;;  %v3287_v42 = vsel %vm3196_vm2, %v2983_v12, 0.0  ;;  %v3564_v62 = vadd.f32 %v3563_v36, %v3562_v46 }
 0x144   : > { %v3282_v59 = vadd.f32 %v3281_v11, %v3280_v4  ;;  %v2093_v18 = vpop.f32.mrf.mxu0  ;;  %v4940_v57 = vpop.f32.mrf.mxu1  ;;  %v3115_v1 = vmax.f32 %v2617_v31, 0.0  ;;  %v3113_v5 = vmax.f32 %v2609_v54, 0.0  ;;  %v2622_v6 = vadd.f32 %v5675_v41, %v2621_v40 }
 0x145   : > { %v3283_v24 = vsel %vm3196_vm2, %v2981_v16, 0.0  ;;  %v2094_v27 = vadd.f32 %v5675_v41, %v2093_v18  ;;  %v2986_v58 = vmax.f32 %v2102_v17, 0.0  ;;  %v3569_v16 = vsel %vm3196_vm2, %v3114_v48, 0.0 }
 0x146   : > { %v3284_v35 = vadd.f32 %v3283_v24, %v3282_v59  ;;  %v4808_v30 = vpop.f32.mrf.mxu0  ;;  %v2624_v9 = vpop.f32.mrf.mxu1  ;;  %v3566_v10 = vadd.f32 %v3565_v53, %v3564_v62  ;;  %v3567_v18 = vsel %vm3196_vm2, %v3113_v5, 0.0  ;;  %v3116_v20 = vmax.f32 %v2622_v6, 0.0 }
 0x147   : > { %v2984_v44 = vmax.f32 %v2094_v27, 0.0  ;;  %v2105_v51 = vadd.f32 %v4808_v30, %v5675_v41  ;;  %v3118_v30 = vmax.f32 %v2630_v2, 0.0  ;;  %v2633_v36 = vadd.f32 %v4940_v57, %v5675_v41 }
 0x148   : > { %v3286_v50 = vadd.f32 %v3285_v32, %v3284_v35  ;;  %v2096_v52 = vpop.f32.mrf.mxu0  ;;  %v4943_v22 = vpop.f32.mrf.mxu1  ;;  %v3568_v28 = vadd.f32 %v3567_v18, %v3566_v10  ;;  %v3571_v35 = vsel %vm3196_vm2, %v3115_v1, 0.0  ;;  %v3293_v40 = vsel %vm3196_vm2, %v2986_v58, 0.0 }
 0x149   : > { %v2097_v60 = vadd.f32 %v5675_v41, %v2096_v52  ;;  %v3289_v11 = vsel %vm3196_vm2, %v2984_v44, 0.0  ;;  %v2987_v59 = vmax.f32 %v2105_v51, 0.0  ;;  %v3573_v51 = vsel %vm3196_vm2, %v3116_v20, 0.0 }
 0x14a   : > { %v3288_v3 = vadd.f32 %v3287_v42, %v3286_v50  ;;  %v4811_v4 = vpop.f32.mrf.mxu0  ;;  %v2637_v37 = vpop.f32.mrf.mxu1  ;;  %v3570_v46 = vadd.f32 %v3569_v16, %v3568_v28  ;;  %v3119_v52 = vmax.f32 %v2633_v36, 0.0  ;;  %v2625_v53 = vadd.f32 %v5675_v41, %v2624_v9 }
 0x14b   : > { %v2985_v12 = vmax.f32 %v2097_v60, 0.0  ;;  %v2118_v23 = vadd.f32 %v4811_v4, %v5675_v41  ;;  %v3295_v60 = vsel %vm3196_vm2, %v2987_v59, 0.0  ;;  %v3577_v4 = vsel %vm3196_vm2, %v3118_v30, 0.0 }
 0x14c   : > { %v3290_v14 = vadd.f32 %v3289_v11, %v3288_v3  ;;  %v2109_v17 = vpop.f32.mrf.mxu0  ;;  %v4944_v54 = vpop.f32.mrf.mxu1  ;;  %v3572_v1 = vadd.f32 %v3571_v35, %v3570_v46  ;;  %v3117_v5 = vmax.f32 %v2625_v53, 0.0  ;;  %v2646_v2 = vadd.f32 %v4943_v22, %v5675_v41 }
 0x14d   : > { %v3291_v24 = vsel %vm3196_vm2, %v2985_v12, 0.0  ;;  %v2110_v27 = vadd.f32 %v5675_v41, %v2109_v17  ;;  %v2990_v62 = vmax.f32 %v2118_v23, 0.0  ;;  %v3579_v59 = vsel %vm3196_vm2, %v3119_v52, 0.0 }
 0x14e   : > { %v3292_v31 = vadd.f32 %v3291_v24, %v3290_v14  ;;  %v4812_v32 = vpop.f32.mrf.mxu0  ;;  %v2640_v6 = vpop.f32.mrf.mxu1  ;;  %v3574_v9 = vadd.f32 %v3573_v51, %v3572_v1  ;;  %v3575_v17 = vsel %vm3196_vm2, %v3117_v5, 0.0  ;;  %v2638_v18 = vadd.f32 %v5675_v41, %v2637_v37 }
 0x14f   : > { %v2988_v42 = vmax.f32 %v2110_v27, 0.0  ;;  %v2121_v44 = vadd.f32 %v4812_v32, %v5675_v41  ;;  %v2649_v35 = vadd.f32 %v4944_v54, %v5675_v41  ;;  %v2641_v30 = vadd.f32 %v5675_v41, %v2640_v6 }
 0x150   : > { %v3294_v48 = vadd.f32 %v3293_v40, %v3292_v31  ;;  %v2112_v50 = vpop.f32.mrf.mxu0  ;;  %v4947_v20 = vpop.f32.mrf.mxu1  ;;  %v3576_v27 = vadd.f32 %v3575_v17, %v3574_v9  ;;  %v3120_v32 = vmax.f32 %v2638_v18, 0.0  ;;  %v3301_v40 = vsel %vm3196_vm2, %v2990_v62, 0.0 }
 0x151   : > { %v2113_v57 = vadd.f32 %v5675_v41, %v2112_v50  ;;  %v3297_v11 = vsel %vm3196_vm2, %v2988_v42, 0.0  ;;  %v2991_v12 = vmax.f32 %v2121_v44, 0.0  ;;  %v3122_v50 = vmax.f32 %v2646_v2, 0.0 }
 0x152   : > { %v3296_v3 = vadd.f32 %v3295_v60, %v3294_v48  ;;  %v4815_v58 = vpop.f32.mrf.mxu0  ;;  %v2653_v36 = vpop.f32.mrf.mxu1  ;;  %v3578_v44 = vadd.f32 %v3577_v4, %v3576_v27  ;;  %v3581_v51 = vsel %vm3196_vm2, %v3120_v32, 0.0  ;;  %v3121_v52 = vmax.f32 %v2641_v30, 0.0 }
 0x153   : > { %v2989_v16 = vmax.f32 %v2113_v57, 0.0  ;;  %v2134_v23 = vadd.f32 %v4815_v58, %v5675_v41  ;;  %v3303_v60 = vsel %vm3196_vm2, %v2991_v12, 0.0  ;;  %v3123_v5 = vmax.f32 %v2649_v35, 0.0 }
 0x154   : > { %v3298_v10 = vadd.f32 %v3297_v11, %v3296_v3  ;;  %v2125_v14 = vpop.f32.mrf.mxu0  ;;  %v4948_v53 = vpop.f32.mrf.mxu1  ;;  %v3580_v1 = vadd.f32 %v3579_v59, %v3578_v44  ;;  %v3583_v4 = vsel %vm3196_vm2, %v3121_v52, 0.0  ;;  %v2662_v9 = vadd.f32 %v4947_v20, %v5675_v41 }
 0x155   : > { %v3299_v24 = vsel %vm3196_vm2, %v2989_v16, 0.0  ;;  %v2126_v22 = vadd.f32 %v5675_v41, %v2125_v14  ;;  %v2994_v57 = vmax.f32 %v2134_v23, 0.0  ;;  %v3585_v17 = vsel %vm3196_vm2, %v3122_v50, 0.0 }
 0x156   : > { %v3300_v28 = vadd.f32 %v3299_v24, %v3298_v10  ;;  %v4816_v31 = vpop.f32.mrf.mxu0  ;;  %v2656_v6 = vpop.f32.mrf.mxu1  ;;  %v3582_v16 = vadd.f32 %v3581_v51, %v3580_v1  ;;  %v2654_v59 = vadd.f32 %v5675_v41, %v2653_v36  ;;  %v5242_v24 = vld [vmem:[%s6619_s3] sm:$0xff]   ;;  %v2665_v20 = vadd.f32 %v4948_v53, %v5675_v41  ;;  %s4203_s3 = scalar_lea.hbm %s6598_s16, %s4605_s29 }
 0x157   : > { %v2992_v42 = vmax.f32 %v2126_v22, 0.0  ;;  %v2137_v37 = vadd.f32 %v4816_v31, %v5675_v41  ;;  %v3587_v35 = vsel %vm3196_vm2, %v3123_v5, 0.0  ;;  %5020 = vmatpush3.bf16.msra.mxu1 %v5242_v24  ;;  %v3126_v44 = vmax.f32 %v2662_v9, 0.0  ;;  %v5957_v5 = vld [vmem:[%s6620_s2] ss:$0 sm:$0xff] }
 0x158   : > { %v3302_v46 = vadd.f32 %v3301_v40, %v3300_v28  ;;  %v2128_v48 = vpop.f32.mrf.mxu0  ;;  %v4951_v18 = vpop.f32.mrf.mxu1  ;;  %v3584_v27 = vadd.f32 %v3583_v4, %v3582_v16  ;;  %v3309_v28 = vsel %vm3196_vm2, %v2994_v57, 0.0  ;;  %v3124_v30 = vmax.f32 %v2654_v59, 0.0  ;;  %5025 = vmatprep.subr.bf16.mxu1 %v5317_v39 }
 0x159   : > { %v2129_v54 = vadd.f32 %v5675_v41, %v2128_v48  ;;  %v3305_v62 = vsel %vm3196_vm2, %v2992_v42, 0.0  ;;  %v2995_v11 = vmax.f32 %v2137_v37, 0.0  ;;  %v2657_v52 = vadd.f32 %v5675_v41, %v2656_v6 }
 0x15a   : > { %v3304_v3 = vadd.f32 %v3303_v60, %v3302_v46  ;;  %v4819_v58 = vpop.f32.mrf.mxu0  ;;  %v2669_v36 = vpop.f32.mrf.mxu1  ;;  %v3586_v37 = vadd.f32 %v3585_v17, %v3584_v27  ;;  %v3589_v51 = vsel %vm3196_vm2, %v3124_v30, 0.0  ;;  %v3127_v1 = vmax.f32 %v2665_v20, 0.0 }
 0x15b   : > { %v2993_v2 = vmax.f32 %v2129_v54, 0.0  ;;  %v2150_v12 = vadd.f32 %v4819_v58, %v5675_v41  ;;  %v3311_v40 = vsel %vm3196_vm2, %v2995_v11, 0.0  ;;  %v3125_v58 = vmax.f32 %v2657_v52, 0.0 }
 0x15c   : > { %v3306_v10 = vadd.f32 %v3305_v62, %v3304_v3  ;;  %v2141_v14 = vpop.f32.mrf.mxu0  ;;  %v4952_v53 = vpop.f32.mrf.mxu1  ;;  %v3588_v54 = vadd.f32 %v3587_v35, %v3586_v37  ;;  %v2678_v4 = vadd.f32 %v5957_v5, %v4951_v18  ;;  %v2670_v11 = vadd.f32 %v5957_v5, %v2669_v36 }
 0x15d   : > { %v3307_v23 = vsel %vm3196_vm2, %v2993_v2, 0.0  ;;  %v2142_v22 = vadd.f32 %v5675_v41, %v2141_v14  ;;  %v2998_v48 = vmax.f32 %v2150_v12, 0.0  ;;  %v3591_v17 = vsel %vm3196_vm2, %v3125_v58, 0.0 }
 0x15e   : > { %v3308_v31 = vadd.f32 %v3307_v23, %v3306_v10  ;;  %v4820_v32 = vpop.f32.mrf.mxu0  ;;  %v2672_v6 = vpop.f32.mrf.mxu1  ;;  %v3590_v9 = vadd.f32 %v3589_v51, %v3588_v54  ;;  %v3128_v59 = vmax.f32 %v2670_v11, 0.0  ;;  %v2681_v35 = vadd.f32 %v5957_v5, %v4952_v53 }
 0x15f   : > { %v2996_v42 = vmax.f32 %v2142_v22, 0.0  ;;  %v2153_v60 = vadd.f32 %v4820_v32, %v5675_v41  ;;  %v3130_v32 = vmax.f32 %v2678_v4, 0.0  ;;  %v3317_v36 = vsel %vm3196_vm2, %v2998_v48, 0.0 }
 0x160   : > { %v3310_v46 = vadd.f32 %v3309_v28, %v3308_v31  ;;  %v2144_v50 = vpop.f32.mrf.mxu0  ;;  %v4955_v24 = vpop.f32.mrf.mxu1  ;;  %v3592_v27 = vadd.f32 %v3591_v17, %v3590_v9  ;;  %v3595_v31 = vsel %vm3196_vm2, %v3127_v1, 0.0  ;;  %v3597_v51 = vsel %vm3196_vm2, %v3128_v59, 0.0 }
 0x161   : > { %v2145_v57 = vadd.f32 %v5675_v41, %v2144_v50  ;;  %v3313_v2 = vsel %vm3196_vm2, %v2996_v42, 0.0  ;;  %v3593_v41 = vsel %vm3196_vm2, %v3126_v44, 0.0  ;;  %v2999_v23 = vmax.f32 %v2153_v60, 0.0 }
 0x162   : > { %v3312_v3 = vadd.f32 %v3311_v40, %v3310_v46  ;;  %v4823_v62 = vpop.f32.mrf.mxu0  ;;  %v2685_v30 = vpop.f32.mrf.mxu1  ;;  %v3594_v37 = vadd.f32 %v3593_v41, %v3592_v27  ;;  %v2673_v52 = vadd.f32 %v5957_v5, %v2672_v6  ;;  %v3131_v1 = vmax.f32 %v2681_v35, 0.0 }
 0x163   : > { %v2997_v16 = vmax.f32 %v2145_v57, 0.0  ;;  %v2166_v12 = vadd.f32 %v5957_v5, %v4823_v62  ;;  %v3319_v57 = vsel %vm3196_vm2, %v2999_v23, 0.0  ;;  %v3601_v62 = vsel %vm3196_vm2, %v3130_v32, 0.0 }
 0x164   : > { %v3314_v10 = vadd.f32 %v3313_v2, %v3312_v3  ;;  %v2157_v14 = vpop.f32.mrf.mxu0  ;;  %v4956_v60 = vpop.f32.mrf.mxu1  ;;  %v3596_v53 = vadd.f32 %v3595_v31, %v3594_v37  ;;  %v3129_v58 = vmax.f32 %v2673_v52, 0.0  ;;  %v2694_v4 = vadd.f32 %v5957_v5, %v4955_v24 }
 0x165   : > { %v3315_v18 = vsel %vm3196_vm2, %v2997_v16, 0.0  ;;  %v2158_v22 = vadd.f32 %v5957_v5, %v2157_v14  ;;  %v3002_v46 = vmax.f32 %v2166_v12, 0.0  ;;  %v2686_v17 = vadd.f32 %v5957_v5, %v2685_v30 }
 0x166   : > { %v3316_v20 = vadd.f32 %v3315_v18, %v3314_v10  ;;  %v4824_v28 = vpop.f32.mrf.mxu0  ;;  %v2688_v11 = vpop.f32.mrf.mxu1  ;;  %v3598_v6 = vadd.f32 %v3597_v51, %v3596_v53  ;;  %v3599_v14 = vsel %vm3196_vm2, %v3129_v58, 0.0  ;;  %v3603_v24 = vsel %vm3196_vm2, %v3131_v1, 0.0 }
 0x167   : > { %v3000_v40 = vmax.f32 %v2158_v22, 0.0  ;;  %v2169_v42 = vadd.f32 %v5957_v5, %v4824_v28  ;;  %v3325_v9 = vsel %vm3196_vm2, %v3002_v46, 0.0  ;;  %v3132_v28 = vmax.f32 %v2686_v17, 0.0 }
 0x168   : > { %v3318_v44 = vadd.f32 %v3317_v36, %v3316_v20  ;;  %v2160_v50 = vpop.f32.mrf.mxu0  ;;  %v4959_v59 = vpop.f32.mrf.mxu1  ;;  %v3600_v22 = vadd.f32 %v3599_v14, %v3598_v6  ;;  %v2697_v31 = vadd.f32 %v5957_v5, %v4956_v60  ;;  %v2689_v32 = vadd.f32 %v5957_v5, %v2688_v11 }
 0x169   : > { %v2161_v54 = vadd.f32 %v5957_v5, %v2160_v50  ;;  %v3321_v2 = vsel %vm3196_vm2, %v3000_v40, 0.0  ;;  %v3003_v16 = vmax.f32 %v2169_v42, 0.0  ;;  %v3134_v42 = vmax.f32 %v2694_v4, 0.0 }
 0x16a   : > { %v3320_v3 = vadd.f32 %v3319_v57, %v3318_v44  ;;  %v4827_v48 = vpop.f32.mrf.mxu0  ;;  %v2701_v35 = vpop.f32.mrf.mxu1  ;;  %v3602_v40 = vadd.f32 %v3601_v62, %v3600_v22  ;;  %v3133_v51 = vmax.f32 %v2689_v32, 0.0  ;;  %v3611_v60 = vsel %vm3196_vm2, %v3132_v28, 0.0 }
 0x16b   : > { %v3001_v41 = vmax.f32 %v2161_v54, 0.0  ;;  %v3327_v36 = vsel %vm3196_vm2, %v3003_v16, 0.0  ;;  %v2182_v30 = vadd.f32 %v5957_v5, %v4827_v48  ;;  %v3135_v53 = vmax.f32 %v2697_v31, 0.0 }
 0x16c   : > { %v3322_v10 = vadd.f32 %v3321_v2, %v3320_v3  ;;  %v2173_v12 = vpop.f32.mrf.mxu0  ;;  %v4960_v52 = vpop.f32.mrf.mxu1  ;;  %v5990_v54 = vadd.f32 %v3603_v24, %v3602_v40  ;;  %v3264_v1 = vrot.slane %v5882_v61, 1  ;;  %v3612_v62 = vsel %vm3196_vm2, %v3133_v51, 0.0 }
 0x16d   : > { %v3323_v23 = vsel %vm3196_vm2, %v3001_v41, 0.0  ;;  %v2174_v18 = vadd.f32 %v5957_v5, %v2173_v12  ;;  %v3006_v4 = vmax.f32 %v2182_v30, 0.0  ;;  %v3614_v2 = vsel %vm3196_vm2, %v3134_v42, 0.0 }
 0x16e   : > { %v3324_v27 = vadd.f32 %v3323_v23, %v3322_v10  ;;  %v4828_v20 = vpop.f32.mrf.mxu0  ;;  %v2704_v58 = vpop.f32.mrf.mxu1  ;;  %v2702_v10 = vadd.f32 %v5957_v5, %v2701_v35  ;;  %v3265_v24 = vadd.f32 %v3264_v1, %v5882_v61  ;;  %v2710_v30 = vadd.f32 %v5957_v5, %v4959_v59 }
 0x16f   : > { %v3004_v44 = vmax.f32 %v2174_v18, 0.0  ;;  %v2185_v46 = vadd.f32 %v5957_v5, %v4828_v20  ;;  %v3616_v18 = vsel %vm3196_vm2, %v3135_v53, 0.0  ;;  %v3338_v32 = vsel %vm3196_vm2, %v3006_v4, 0.0 }
 0x170   : > { %v3326_v37 = vadd.f32 %v3325_v9, %v3324_v27  ;;  %v2176_v50 = vpop.f32.mrf.mxu0  ;;  %v3613_v9 = vadd.f32 %v3612_v62, %v3611_v60  ;;  %v5998_v12 = vpop.f32.mrf.mxu1  ;;  %v3749_v60 = vpack.c.bf16 %v3265_v24, %v3265_v24 }
 0x171   : > { %v2177_v57 = vadd.f32 %v5957_v5, %v2176_v50  ;;  %v3335_v41 = vsel %vm3196_vm2, %v3004_v44, 0.0  ;;  %v3007_v14 = vmax.f32 %v2185_v46, 0.0  ;;  %v3136_v44 = vmax.f32 %v2702_v10, 0.0 }
 0x172   : > { %v3328_v3 = vadd.f32 %v3327_v36, %v3326_v37  ;;  %v4831_v48 = vpop.f32.mrf.mxu0  ;;  %v3615_v28 = vadd.f32 %v3614_v2, %v3613_v9  ;;  %v6004_v31 = vpop.f32.mrf.mxu1  ;;  %v3138_v2 = vmax.f32 %v2710_v30, 0.0  ;;  %v2713_v10 = vadd.f32 %v5957_v5, %v4960_v52 }
 0x173   : > { %v3005_v11 = vmax.f32 %v2177_v57, 0.0  ;;  %v2198_v35 = vadd.f32 %v5957_v5, %v4831_v48  ;;  %v3340_v61 = vsel %vm3196_vm2, %v3007_v14, 0.0  ;;  %v3618_v48 = vsel %vm3196_vm2, %v3136_v44, 0.0 }
 0x174   : > { %v3329_v16 = vrot.slane %v3328_v3, 4  ;;  %v2189_v6 = vpop.f32.mrf.mxu0  ;;  %v3617_v46 = vadd.f32 %v3616_v18, %v3615_v28  ;;  %v6009_v50 = vpop.f32.mrf.mxu1  ;;  %v3139_v28 = vmax.f32 %v2713_v10, 0.0 }
 0x175   : > { %v3336_v17 = vsel %vm3196_vm2, %v3005_v11, 0.0  ;;  %v2190_v23 = vadd.f32 %v5957_v5, %v2189_v6  ;;  %v3010_v62 = vmax.f32 %v2198_v35, 0.0 }
 0x176   : > { %v3330_v22 = vadd.f32 %v3329_v16, %v3328_v3  ;;  %v3337_v27 = vadd.f32 %v3336_v17, %v3335_v41  ;;  %v4832_v20 = vpop.f32.mrf.mxu0  ;;  %v6015_v59 = vpop.f32.mrf.mxu1  ;;  %v3619_v9 = vadd.f32 %v3618_v48, %v3617_v46 }
 0x177   : > { %v3008_v36 = vmax.f32 %v2190_v23, 0.0  ;;  %v2201_v51 = vadd.f32 %v5957_v5, %v4832_v20  ;;  %v3346_v52 = vsel %vm3196_vm2, %v3010_v62, 0.0  ;;  %v3624_v62 = vsel %vm3196_vm2, %v3139_v28, 0.0 }
 0x178   : > { %v3331_v40 = vrot.slane %v3330_v22, 2  ;;  %v3339_v42 = vadd.f32 %v3338_v32, %v3337_v27  ;;  %v2192_v37 = vpop.f32.mrf.mxu0  ;;  %v6019_v14 = vpop.f32.mrf.mxu1  ;;  %v2705_v32 = vadd.f32 %v5957_v5, %v2704_v58 }
 0x179   : > { %v2193_v57 = vadd.f32 %v5957_v5, %v2192_v37  ;;  %v3342_v4 = vsel %vm3196_vm2, %v3008_v36, 0.0  ;;  %v3011_v17 = vmax.f32 %v2201_v51, 0.0 }
 0x17a   : > { %v3332_v53 = vadd.f32 %v3331_v40, %v3330_v22  ;;  %v3341_v1 = vadd.f32 %v3340_v61, %v3339_v42  ;;  %v4835_v3 = vpop.f32.mrf.mxu0  ;;  %v6025_v35 = vpop.f32.mrf.mxu1  ;;  %v3776_v40 = vunpack.c.l.b16 %v3749_v60  ;;  %v3137_v46 = vmax.f32 %v2705_v32, 0.0 }
 0x17b   : > { %v3009_v11 = vmax.f32 %v2193_v57, 0.0  ;;  %v2214_v18 = vadd.f32 %v5957_v5, %v4835_v3  ;;  %v3348_v51 = vsel %vm3196_vm2, %v3011_v17, 0.0 }
 0x17c   : > { %v3333_v16 = vrot.slane %v3332_v53, 1  ;;  %v3343_v41 = vadd.f32 %v3342_v4, %v3341_v1  ;;  %v2205_v6 = vpop.f32.mrf.mxu0  ;;  %v6029_v61 = vpop.f32.mrf.mxu1  ;;  %v3620_v60 = vsel %vm3196_vm2, %v3137_v46, 0.0 }
 0x17d   : > { %v3344_v23 = vsel %vm3196_vm2, %v3009_v11, 0.0  ;;  %v2206_v24 = vadd.f32 %v5957_v5, %v2205_v6  ;;  %v3014_v57 = vmax.f32 %v2214_v18, 0.0  ;;  %v3621_v6 = vadd.f32 %v3620_v60, %v3619_v9 }
 0x17e   : > { %v3334_v22 = vadd.f32 %v3333_v16, %v3332_v53  ;;  %v3345_v27 = vadd.f32 %v3344_v23, %v3343_v41  ;;  %v4836_v20 = vpop.f32.mrf.mxu0  ;;  %v3622_v53 = vsel %vm3196_vm2, %v3138_v2, 0.0  ;;  %v6036_v4 = vpop.f32.mrf.mxu1  ;;  %v2726_v2 = vadd.f32 %v5957_v5, %v5998_v12 }
 0x17f   : > { %v3012_v36 = vmax.f32 %v2206_v24, 0.0  ;;  %v2217_v30 = vadd.f32 %v5957_v5, %v4836_v20  ;;  %v2718_v18 = vadd.f32 %v5957_v5, %v6004_v31  ;;  %v3623_v9 = vadd.f32 %v3622_v53, %v3621_v6 }
 0x180   : > { %v3750_v42 = vpack.c.bf16 %v3334_v22, %v3334_v22  ;;  %v3347_v37 = vadd.f32 %v3346_v52, %v3345_v27  ;;  %v2208_v44 = vpop.f32.mrf.mxu0  ;;  %v6046_v24 = vpop.f32.mrf.mxu1  ;;  %v3354_v12 = vsel %vm3196_vm2, %v3014_v57, 0.0  ;;  %v3142_v46 = vmax.f32 %v2726_v2, 0.0 }
 0x181   : > { %v2209_v58 = vadd.f32 %v5957_v5, %v2208_v44  ;;  %v3350_v11 = vsel %vm3196_vm2, %v3012_v36, 0.0  ;;  %v3015_v16 = vmax.f32 %v2217_v30, 0.0  ;;  %v3140_v52 = vmax.f32 %v2718_v18, 0.0 }
 0x182   : > { %v3777_v1 = vunpack.c.l.b16 %v3750_v42  ;;  %v3349_v3 = vadd.f32 %v3348_v51, %v3347_v37  ;;  %v4839_v48 = vpop.f32.mrf.mxu0  ;;  %v2729_v36 = vadd.f32 %v5957_v5, %v6009_v50  ;;  %v2749_v30 = vpop.f32.mrf.mxu1  ;;  %v3625_v42 = vadd.f32 %v3624_v62, %v3623_v9 }
 0x183   : > { %v3013_v41 = vmax.f32 %v2209_v58, 0.0  ;;  %v2230_v27 = vadd.f32 %v5957_v5, %v4839_v48  ;;  %v3626_v51 = vsel %vm3196_vm2, %v3140_v52, 0.0  ;;  %v2721_v58 = vadd.f32 %v5957_v5, %v6015_v59 }
 0x184   : > { %v6040_v10 = vsel %vm3784_vm3, %v3777_v1, %v3776_v40  ;;  %v3351_v17 = vadd.f32 %v3350_v11, %v3349_v3  ;;  %v2221_v23 = vpop.f32.mrf.mxu0  ;;  %v6058_v53 = vpop.f32.mrf.mxu1  ;;  %v3356_v1 = vsel %vm3196_vm2, %v3015_v16, 0.0  ;;  %v3627_v57 = vadd.f32 %v3626_v51, %v3625_v42 }
 0x185   : > { %v3352_v22 = vsel %vm3196_vm2, %v3013_v41, 0.0  ;;  %v2222_v20 = vadd.f32 %v5957_v5, %v2221_v23  ;;  %v3018_v50 = vmax.f32 %v2230_v27, 0.0  ;;  %v3143_v11 = vmax.f32 %v2729_v36, 0.0 }
 0x186   : > { %v3353_v28 = vadd.f32 %v3352_v22, %v3351_v17  ;;  %v4840_v32 = vpop.f32.mrf.mxu0  ;;  %v3141_v41 = vmax.f32 %v2721_v58, 0.0  ;;  %v6063_v6 = vpop.f32.mrf.mxu1  ;;  %v2742_v59 = vadd.f32 %v5957_v5, %v6019_v14  ;;  %v2734_v16 = vadd.f32 %v5957_v5, %v6025_v35 }
 0x187   : > { %v3016_v40 = vmax.f32 %v2222_v20, 0.0  ;;  %v2233_v31 = vadd.f32 %v5957_v5, %v4840_v32  ;;  %v3630_v27 = vsel %vm3196_vm2, %v3142_v46, 0.0  ;;  %v2745_v14 = vadd.f32 %v5957_v5, %v6029_v61 }
 0x188   : > { %v3355_v37 = vadd.f32 %v3354_v12, %v3353_v28  ;;  %v2224_v44 = vpop.f32.mrf.mxu0  ;;  %v3628_v20 = vsel %vm3196_vm2, %v3141_v41, 0.0  ;;  %v6072_v9 = vpop.f32.mrf.mxu1  ;;  %v3362_v35 = vsel %vm3196_vm2, %v3018_v50, 0.0  ;;  %v3146_v51 = vmax.f32 %v2742_v59, 0.0 }
 0x189   : > { %v2225_v3 = vadd.f32 %v5957_v5, %v2224_v44  ;;  %v3358_v60 = vsel %vm3196_vm2, %v3016_v40, 0.0  ;;  %v3019_v17 = vmax.f32 %v2233_v31, 0.0  ;;  %v3629_v52 = vadd.f32 %v3628_v20, %v3627_v57 }
 0x18a   : > { %v3357_v48 = vadd.f32 %v3356_v1, %v3355_v37  ;;  %v4843_v62 = vpop.f32.mrf.mxu0  ;;  %v3632_v40 = vsel %vm3196_vm2, %v3143_v11, 0.0  ;;  %v3144_v31 = vmax.f32 %v2734_v16, 0.0  ;;  %v6080_v42 = vpop.f32.mrf.mxu1  ;;  %v2737_v50 = vadd.f32 %v5957_v5, %v6036_v4 }
 0x18b   : > { %v3017_v23 = vmax.f32 %v2225_v3, 0.0  ;;  %v2246_v18 = vadd.f32 %v5957_v5, %v4843_v62  ;;  %v3364_v37 = vsel %vm3196_vm2, %v3019_v17, 0.0  ;;  %v3631_v46 = vadd.f32 %v3630_v27, %v3629_v52 }
 0x18c   : > { %v3359_v2 = vadd.f32 %v3358_v60, %v3357_v48  ;;  %v2237_v22 = vpop.f32.mrf.mxu0  ;;  %v3634_v61 = vsel %vm3196_vm2, %v3144_v31, 0.0  ;;  %v6087_v57 = vpop.f32.mrf.mxu1  ;;  %v3147_v11 = vmax.f32 %v2745_v14, 0.0  ;;  %v2758_v59 = vadd.f32 %v5957_v5, %v6046_v24 }
 0x18d   : > { %v3360_v28 = vsel %vm3196_vm2, %v3017_v23, 0.0  ;;  %v2238_v32 = vadd.f32 %v5957_v5, %v2237_v22  ;;  %v3022_v48 = vmax.f32 %v2246_v18, 0.0  ;;  %v3633_v62 = vadd.f32 %v3632_v40, %v3631_v46 }
 0x18e   : > { %v3361_v36 = vadd.f32 %v3360_v28, %v3359_v2  ;;  %v4844_v12 = vpop.f32.mrf.mxu0  ;;  %v3145_v23 = vmax.f32 %v2737_v50, 0.0  ;;  %v2750_v16 = vadd.f32 %v5957_v5, %v2749_v30  ;;  %v2768_v2 = vpop.f32.mrf.mxu1  ;;  %v3638_v4 = vsel %vm3196_vm2, %v3146_v51, 0.0 }
 0x18f   : > { %v3020_v44 = vmax.f32 %v2238_v32, 0.0  ;;  %v2249_v1 = vadd.f32 %v5957_v5, %v4844_v12  ;;  %v3635_v20 = vadd.f32 %v3634_v61, %v3633_v62  ;;  %v2761_v46 = vadd.f32 %v5957_v5, %v6058_v53 }
 0x190   : > { %v3363_v58 = vadd.f32 %v3362_v35, %v3361_v36  ;;  %v2240_v3 = vpop.f32.mrf.mxu0  ;;  %v3636_v52 = vsel %vm3196_vm2, %v3145_v23, 0.0  ;;  %v3148_v14 = vmax.f32 %v2750_v16, 0.0  ;;  %v6096_v35 = vpop.f32.mrf.mxu1 }
 0x191   : > { %v2241_v60 = vadd.f32 %v5957_v5, %v2240_v3  ;;  %v3366_v22 = vsel %vm3196_vm2, %v3020_v44, 0.0  ;;  %v3023_v28 = vmax.f32 %v2249_v1, 0.0  ;;  %v3637_v12 = vadd.f32 %v3636_v52, %v3635_v20 }
 0x192   : > { %v3365_v41 = vadd.f32 %v3364_v37, %v3363_v58  ;;  %v4847_v17 = vpop.f32.mrf.mxu0  ;;  %v3640_v37 = vsel %vm3196_vm2, %v3147_v11, 0.0  ;;  %v3150_v44 = vmax.f32 %v2758_v59, 0.0  ;;  %v6104_v51 = vpop.f32.mrf.mxu1  ;;  %v3370_v58 = vsel %vm3196_vm2, %v3022_v48, 0.0 }
 0x193   : > { %v3021_v27 = vmax.f32 %v2241_v60, 0.0  ;;  %v2262_v24 = vadd.f32 %v5957_v5, %v4847_v17  ;;  %v3639_v61 = vadd.f32 %v3638_v4, %v3637_v12  ;;  %v3642_v62 = vsel %vm3196_vm2, %v3148_v14, 0.0 }
 0x194   : > { %v3367_v18 = vadd.f32 %v3366_v22, %v3365_v41  ;;  %v2253_v32 = vpop.f32.mrf.mxu0  ;;  %v3151_v41 = vmax.f32 %v2761_v46, 0.0  ;;  %v2753_v11 = vadd.f32 %v5957_v5, %v6063_v6  ;;  %v6111_v17 = vpop.f32.mrf.mxu1  ;;  %v3372_v53 = vsel %vm3196_vm2, %v3023_v28, 0.0 }
 0x195   : > { %v3368_v36 = vsel %vm3196_vm2, %v3021_v27, 0.0  ;;  %v2254_v30 = vadd.f32 %v5957_v5, %v2253_v32  ;;  %v3026_v23 = vmax.f32 %v2262_v24, 0.0  ;;  %v3641_v48 = vadd.f32 %v3640_v37, %v3639_v61 }
 0x196   : > { %v3369_v40 = vadd.f32 %v3368_v36, %v3367_v18  ;;  %v4848_v31 = vpop.f32.mrf.mxu0  ;;  %v3646_v27 = vsel %vm3196_vm2, %v3150_v44, 0.0  ;;  %v3149_v4 = vmax.f32 %v2753_v11, 0.0  ;;  %v2774_v20 = vadd.f32 %v5957_v5, %v6072_v9  ;;  %v6118_v18 = vpop.f32.mrf.mxu1 }
 0x197   : > { %v3024_v1 = vmax.f32 %v2254_v30, 0.0  ;;  %v2265_v3 = vadd.f32 %v5957_v5, %v4848_v31  ;;  %v3643_v14 = vadd.f32 %v3642_v62, %v3641_v48  ;;  %v3648_v24 = vsel %vm3196_vm2, %v3151_v41, 0.0 }
 0x198   : > { %v3371_v50 = vadd.f32 %v3370_v58, %v3369_v40  ;;  %v2256_v60 = vpop.f32.mrf.mxu0  ;;  %v3644_v30 = vsel %vm3196_vm2, %v3149_v4, 0.0  ;;  %v2766_v12 = vadd.f32 %v5957_v5, %v6080_v42  ;;  %v6125_v40 = vpop.f32.mrf.mxu1  ;;  %v2769_v61 = vadd.f32 %v5957_v5, %v2768_v2 }
 0x199   : > { %v2257_v59 = vadd.f32 %v5957_v5, %v2256_v60  ;;  %v3374_v6 = vsel %vm3196_vm2, %v3024_v1, 0.0  ;;  %v3027_v32 = vmax.f32 %v2265_v3, 0.0  ;;  %v3645_v44 = vadd.f32 %v3644_v30, %v3643_v14 }
 0x19a   : > { %v3373_v16 = vadd.f32 %v3372_v53, %v3371_v50  ;;  %v4851_v22 = vpop.f32.mrf.mxu0  ;;  %v3152_v1 = vmax.f32 %v2766_v12, 0.0  ;;  %v2777_v3 = vadd.f32 %v5957_v5, %v6087_v57  ;;  %v2797_v50 = vpop.f32.mrf.mxu1  ;;  %v3378_v42 = vsel %vm3196_vm2, %v3026_v23, 0.0 }
 0x19b   : > { %v3025_v52 = vmax.f32 %v2257_v59, 0.0  ;;  %v2278_v31 = vadd.f32 %v5957_v5, %v4851_v22  ;;  %v3647_v41 = vadd.f32 %v3646_v27, %v3645_v44  ;;  %v3154_v59 = vmax.f32 %v2774_v20, 0.0 }
 0x19c   : > { %v3375_v28 = vadd.f32 %v3374_v6, %v3373_v16  ;;  %v2269_v36 = vpop.f32.mrf.mxu0  ;;  %v3650_v48 = vsel %vm3196_vm2, %v3152_v1, 0.0  ;;  %v3153_v16 = vmax.f32 %v2769_v61, 0.0  ;;  %v6136_v22 = vpop.f32.mrf.mxu1  ;;  %v3380_v4 = vsel %vm3196_vm2, %v3027_v32, 0.0 }
 0x19d   : > { %v3376_v9 = vsel %vm3196_vm2, %v3025_v52, 0.0  ;;  %v2270_v37 = vadd.f32 %v5957_v5, %v2269_v36  ;;  %v3649_v2 = vadd.f32 %v3648_v24, %v3647_v41  ;;  %v3030_v6 = vmax.f32 %v2278_v31, 0.0 }
 0x19e   : > { %v3377_v46 = vadd.f32 %v3376_v9, %v3375_v28  ;;  %v4852_v58 = vpop.f32.mrf.mxu0  ;;  %v3155_v14 = vmax.f32 %v2777_v3, 0.0  ;;  %v3652_v28 = vsel %vm3196_vm2, %v3153_v16, 0.0  ;;  %v6141_v27 = vpop.f32.mrf.mxu1  ;;  %v3654_v32 = vsel %vm3196_vm2, %v3154_v59, 0.0 }
 0x19f   : > { %v3028_v60 = vmax.f32 %v2270_v37, 0.0  ;;  %v2281_v62 = vadd.f32 %v5957_v5, %v4852_v58  ;;  %v3651_v12 = vadd.f32 %v3650_v48, %v3649_v2  ;;  %v2790_v24 = vadd.f32 %v5957_v5, %v6096_v35 }
 0x1a0   : > { %v3379_v11 = vadd.f32 %v3378_v42, %v3377_v46  ;;  %v2272_v53 = vpop.f32.mrf.mxu0  ;;  %v2782_v31 = vadd.f32 %v5957_v5, %v6104_v51  ;;  %v6149_v44 = vpop.f32.mrf.mxu1  ;;  %v2793_v35 = vadd.f32 %v5957_v5, %v6111_v17  ;;  %v3386_v51 = vsel %vm3196_vm2, %v3030_v6, 0.0 }
 0x1a1   : > { %v2273_v57 = vadd.f32 %v5957_v5, %v2272_v53  ;;  %v3382_v20 = vsel %vm3196_vm2, %v3028_v60, 0.0  ;;  %v3031_v36 = vmax.f32 %v2281_v62, 0.0  ;;  %v3653_v3 = vadd.f32 %v3652_v28, %v3651_v12 }
 0x1a2   : > { %v3381_v52 = vadd.f32 %v3380_v4, %v3379_v11  ;;  %v4855_v23 = vpop.f32.mrf.mxu0  ;;  %v3656_v60 = vsel %vm3196_vm2, %v3155_v14, 0.0  ;;  %v3156_v62 = vmax.f32 %v2782_v31, 0.0  ;;  %v6157_v41 = vpop.f32.mrf.mxu1  ;;  %v3158_v4 = vmax.f32 %v2790_v24, 0.0 }
 0x1a3   : > { %v3029_v30 = vmax.f32 %v2273_v57, 0.0  ;;  %v2294_v58 = vadd.f32 %v5957_v5, %v4855_v23  ;;  %v3388_v11 = vsel %vm3196_vm2, %v3031_v36, 0.0  ;;  %v3655_v59 = vadd.f32 %v3654_v32, %v3653_v3 }
 0x1a4   : > { %v3383_v9 = vadd.f32 %v3382_v20, %v3381_v52  ;;  %v2285_v37 = vpop.f32.mrf.mxu0  ;;  %v3658_v57 = vsel %vm3196_vm2, %v3156_v62, 0.0  ;;  %v2785_v2 = vadd.f32 %v5957_v5, %v6118_v18  ;;  %v6164_v52 = vpop.f32.mrf.mxu1  ;;  %v3159_v36 = vmax.f32 %v2793_v35, 0.0 }
 0x1a5   : > { %v3384_v46 = vsel %vm3196_vm2, %v3029_v30, 0.0  ;;  %v2286_v1 = vadd.f32 %v5957_v5, %v2285_v37  ;;  %v3034_v23 = vmax.f32 %v2294_v58, 0.0  ;;  %v3657_v6 = vadd.f32 %v3656_v60, %v3655_v59 }
 0x1a6   : > { %v3385_v61 = vadd.f32 %v3384_v46, %v3383_v9  ;;  %v4856_v42 = vpop.f32.mrf.mxu0  ;;  %v3157_v30 = vmax.f32 %v2785_v2, 0.0  ;;  %v2798_v12 = vadd.f32 %v5957_v5, %v2797_v50  ;;  %v6169_v9 = vpop.f32.mrf.mxu1  ;;  %v2806_v24 = vadd.f32 %v5957_v5, %v6125_v40 }
 0x1a7   : > { %v3032_v53 = vmax.f32 %v2286_v1, 0.0  ;;  %v2297_v17 = vadd.f32 %v5957_v5, %v4856_v42  ;;  %v3659_v18 = vadd.f32 %v3658_v57, %v3657_v6  ;;  %v3662_v58 = vsel %vm3196_vm2, %v3158_v4, 0.0 }
 0x1a8   : > { %v3387_v48 = vadd.f32 %v3386_v51, %v3385_v61  ;;  %v2288_v16 = vpop.f32.mrf.mxu0  ;;  %v3660_v1 = vsel %vm3196_vm2, %v3157_v30, 0.0  ;;  %v3160_v3 = vmax.f32 %v2798_v12, 0.0  ;;  %v6176_v61 = vpop.f32.mrf.mxu1  ;;  %v3664_v40 = vsel %vm3196_vm2, %v3159_v36, 0.0 }
 0x1a9   : > { %v2289_v14 = vadd.f32 %v5957_v5, %v2288_v16  ;;  %v3390_v37 = vsel %vm3196_vm2, %v3032_v53, 0.0  ;;  %v3035_v42 = vmax.f32 %v2297_v17, 0.0  ;;  %v3661_v62 = vadd.f32 %v3660_v1, %v3659_v18 }
 0x1aa   : > { %v3389_v28 = vadd.f32 %v3388_v11, %v3387_v48  ;;  %v4859_v20 = vpop.f32.mrf.mxu0  ;;  %v2809_v53 = vadd.f32 %v5957_v5, %v6136_v22  ;;  %v6184_v59 = vpop.f32.mrf.mxu1  ;;  %v3394_v48 = vsel %vm3196_vm2, %v3034_v23, 0.0  ;;  %v3162_v4 = vmax.f32 %v2806_v24, 0.0 }
 0x1ab   : > { %v3033_v32 = vmax.f32 %v2289_v14, 0.0  ;;  %v2310_v51 = vadd.f32 %v5957_v5, %v4859_v20  ;;  %v3663_v16 = vadd.f32 %v3662_v58, %v3661_v62  ;;  %v3666_v14 = vsel %vm3196_vm2, %v3160_v3, 0.0 }
 0x1ac   : > { %v3391_v31 = vadd.f32 %v3390_v37, %v3389_v28  ;;  %v2301_v46 = vpop.f32.mrf.mxu0  ;;  %v2801_v6 = vadd.f32 %v5957_v5, %v6141_v27  ;;  %v6191_v28 = vpop.f32.mrf.mxu1  ;;  %v3396_v20 = vsel %vm3196_vm2, %v3035_v42, 0.0 }
 0x1ad   : > { %v3392_v50 = vsel %vm3196_vm2, %v3033_v32, 0.0  ;;  %v2302_v60 = vadd.f32 %v5957_v5, %v2301_v46  ;;  %v3665_v30 = vadd.f32 %v3664_v40, %v3663_v16  ;;  %v3038_v12 = vmax.f32 %v2310_v51, 0.0 }
 0x1ae   : > { %v3393_v35 = vadd.f32 %v3392_v50, %v3391_v31  ;;  %v4860_v11 = vpop.f32.mrf.mxu0  ;;  %v3163_v32 = vmax.f32 %v2809_v53, 0.0  ;;  %v3161_v18 = vmax.f32 %v2801_v6, 0.0  ;;  %v6195_v24 = vpop.f32.mrf.mxu1  ;;  %v3670_v46 = vsel %vm3196_vm2, %v3162_v4, 0.0 }
 0x1af   : > { %v2313_v2 = vadd.f32 %v5957_v5, %v4860_v11  ;;  %v3036_v22 = vmax.f32 %v2302_v60, 0.0  ;;  %v3667_v58 = vadd.f32 %v3666_v14, %v3665_v30  ;;  %v2814_v50 = vadd.f32 %v5957_v5, %v6157_v41 }
 0x1b0   : > { %v3395_v57 = vadd.f32 %v3394_v48, %v3393_v35  ;;  %v2304_v17 = vpop.f32.mrf.mxu0  ;;  %v3668_v42 = vsel %vm3196_vm2, %v3161_v18, 0.0  ;;  %v6201_v60 = vpop.f32.mrf.mxu1  ;;  %v3407_v53 = vsel %vm3196_vm2, %v3038_v12, 0.0  ;;  %v3672_v4 = vsel %vm3196_vm2, %v3163_v32, 0.0 }
 0x1b1   : > { %v2305_v36 = vadd.f32 %v5957_v5, %v2304_v17  ;;  %v3039_v1 = vmax.f32 %v2313_v2, 0.0  ;;  %v3404_v62 = vsel %vm3196_vm2, %v3036_v22, 0.0  ;;  %v3669_v11 = vadd.f32 %v3668_v42, %v3667_v58 }
 0x1b2   : > { %v3397_v23 = vadd.f32 %v3396_v20, %v3395_v57  ;;  %v4863_v37 = vpop.f32.mrf.mxu0  ;;  %v6208_v57 = vpop.f32.mrf.mxu1  ;;  %v2822_v14 = vadd.f32 %v5957_v5, %v6149_v44  ;;  %v3164_v30 = vmax.f32 %v2814_v50, 0.0  ;;  %v2817_v44 = vadd.f32 %v5957_v5, %v6169_v9 }
 0x1b3   : > { %v3037_v31 = vmax.f32 %v2305_v36, 0.0  ;;  %v2326_v41 = vadd.f32 %v5957_v5, %v4863_v37  ;;  %v3671_v17 = vadd.f32 %v3670_v46, %v3669_v11  ;;  %v3409_v20 = vsel %vm3196_vm2, %v3039_v1, 0.0 }
 0x1b4   : > { %v3398_v27 = vrot.slane %v3397_v23, 4  ;;  %v2317_v3 = vpop.f32.mrf.mxu0  ;;  %v2825_v37 = vadd.f32 %v5957_v5, %v6164_v52  ;;  %v6222_v58 = vpop.f32.mrf.mxu1  ;;  %v3166_v42 = vmax.f32 %v2822_v14, 0.0  ;;  %v3165_v11 = vmax.f32 %v2817_v44, 0.0 }
 0x1b5   : > { %v3405_v35 = vsel %vm3196_vm2, %v3037_v31, 0.0  ;;  %v2318_v51 = vadd.f32 %v5957_v5, %v2317_v3  ;;  %v6216_v32 = vadd.f32 %v3672_v4, %v3671_v17 }
 0x1b6   : > { %v3399_v40 = vadd.f32 %v3398_v27, %v3397_v23  ;;  %v3406_v48 = vadd.f32 %v3405_v35, %v3404_v62  ;;  %v4864_v16 = vpop.f32.mrf.mxu0  ;;  %v3042_v27 = vmax.f32 %v2326_v41, 0.0  ;;  %v3681_v41 = vsel %vm3196_vm2, %v3165_v11, 0.0 }
 0x1b7   : > { %v3040_v2 = vmax.f32 %v2318_v51, 0.0  ;;  %v2329_v23 = vadd.f32 %v5957_v5, %v4864_v16  ;;  %v3680_v51 = vsel %vm3196_vm2, %v3164_v30, 0.0 }
 0x1b8   : > { %v3400_v6 = vrot.slane %v3399_v40, 2  ;;  %v3408_v22 = vadd.f32 %v3407_v53, %v3406_v48  ;;  %v2320_v36 = vpop.f32.mrf.mxu0  ;;  %v3167_v48 = vmax.f32 %v2825_v37, 0.0  ;;  %v3415_v17 = vsel %vm3196_vm2, %v3042_v27, 0.0 }
 0x1b9   : > { %v2321_v12 = vadd.f32 %v5957_v5, %v2320_v36  ;;  %v3411_v1 = vsel %vm3196_vm2, %v3040_v2, 0.0  ;;  %v3043_v52 = vmax.f32 %v2329_v23, 0.0  ;;  %v6229_v2 = vpop.f32.mrf.mxu1  ;;  %v3682_v23 = vadd.f32 %v3681_v41, %v3680_v51 }
 0x1ba   : > { %v3401_v18 = vadd.f32 %v3400_v6, %v3399_v40  ;;  %v3410_v31 = vadd.f32 %v3409_v20, %v3408_v22  ;;  %v4867_v46 = vpop.f32.mrf.mxu0  ;;  %v3683_v20 = vsel %vm3196_vm2, %v3166_v42, 0.0 }
 0x1bb   : > { %v3041_v3 = vmax.f32 %v2321_v12, 0.0  ;;  %v2342_v14 = vadd.f32 %v5957_v5, %v4867_v46  ;;  %v3417_v12 = vsel %vm3196_vm2, %v3043_v52, 0.0  ;;  %v3684_v46 = vadd.f32 %v3683_v20, %v3682_v23  ;;  %v6240_v42 = vpop.f32.mrf.mxu1 }
 0x1bc   : > { %v3402_v50 = vrot.slane %v3401_v18, 1  ;;  %v3412_v62 = vadd.f32 %v3411_v1, %v3410_v31  ;;  %v2333_v35 = vpop.f32.mrf.mxu0  ;;  %v3685_v31 = vsel %vm3196_vm2, %v3167_v48, 0.0 }
 0x1bd   : > { %v3413_v40 = vsel %vm3196_vm2, %v3041_v3, 0.0  ;;  %v2334_v53 = vadd.f32 %v5957_v5, %v2333_v35  ;;  %v2830_v3 = vadd.f32 %v5957_v5, %v6184_v59 }
 0x1be   : > { %v3403_v9 = vadd.f32 %v3402_v50, %v3401_v18  ;;  %v3414_v16 = vadd.f32 %v3413_v40, %v3412_v62  ;;  %v4868_v4 = vpop.f32.mrf.mxu0  ;;  %v3046_v50 = vmax.f32 %v2342_v14, 0.0  ;;  %v2838_v40 = vadd.f32 %v5957_v5, %v6176_v61 }
 0x1bf   : > { %v3044_v6 = vmax.f32 %v2334_v53, 0.0  ;;  %v2345_v37 = vadd.f32 %v5957_v5, %v4868_v4  ;;  %v3168_v53 = vmax.f32 %v2830_v3, 0.0 }
 0x1c0   : > { %v3751_v22 = vpack.c.bf16 %v3403_v9, %v3403_v9  ;;  %v3416_v36 = vadd.f32 %v3415_v17, %v3414_v16  ;;  %v2336_v30 = vpop.f32.mrf.mxu0  ;;  %v3686_v16 = vadd.f32 %v3685_v31, %v3684_v46  ;;  %v3423_v20 = vsel %vm3196_vm2, %v3046_v50, 0.0 }
 0x1c1   : > { %v2337_v18 = vadd.f32 %v5957_v5, %v2336_v30  ;;  %v3419_v62 = vsel %vm3196_vm2, %v3044_v6, 0.0  ;;  %v3047_v48 = vmax.f32 %v2345_v37, 0.0  ;;  %v3687_v14 = vsel %vm3196_vm2, %v3168_v53, 0.0  ;;  %v2861_v6 = vpop.f32.mrf.mxu1 }
 0x1c2   : > { %v3778_v44 = vunpack.c.l.b16 %v3751_v22  ;;  %v3418_v27 = vadd.f32 %v3417_v12, %v3416_v36  ;;  %v4871_v1 = vpop.f32.mrf.mxu0  ;;  %v3170_v23 = vmax.f32 %v2838_v40, 0.0  ;;  %v2833_v12 = vadd.f32 %v5957_v5, %v6195_v24 }
 0x1c3   : > { %v3045_v35 = vmax.f32 %v2337_v18, 0.0  ;;  %v2358_v41 = vadd.f32 %v5957_v5, %v4871_v1  ;;  %v3425_v37 = vsel %vm3196_vm2, %v3047_v48, 0.0  ;;  %v3688_v31 = vadd.f32 %v3687_v14, %v3686_v16  ;;  %v6261_v3 = vpop.f32.mrf.mxu1  ;;  %v6271_v48 = vld [vmem:[%s6620_s2] ss:$0 sm:$0xff]  ;;  %s565_s2 = scalar_lea.vmem %s6597_s15, %s6604_s21 }
 0x1c4   : > { %v6245_v51 = vsel %vm3786_vm4, %v3778_v44, %v6040_v10  ;;  %v3420_v11 = vadd.f32 %v3419_v62, %v3418_v27  ;;  %v2349_v52 = vpop.f32.mrf.mxu0  ;;  %v2841_v10 = vadd.f32 %v5957_v5, %v6191_v28  ;;  %v3169_v46 = vmax.f32 %v2833_v12, 0.0 }
 0x1c5   : > { %v3421_v9 = vsel %vm3196_vm2, %v3045_v35, 0.0  ;;  %v2350_v59 = vadd.f32 %v5957_v5, %v2349_v52  ;;  %v3050_v44 = vmax.f32 %v2358_v41, 0.0  ;;  %v3691_v40 = vsel %vm3196_vm2, %v3170_v23, 0.0 }
 0x1c6   : > { %v3422_v4 = vadd.f32 %v3421_v9, %v3420_v11  ;;  %v4872_v17 = vpop.f32.mrf.mxu0  ;;  %v3171_v1 = vmax.f32 %v2841_v10, 0.0  ;;  %v2846_v11 = vadd.f32 %v5957_v5, %v6208_v57  ;;  %v3689_v53 = vsel %vm3196_vm2, %v3169_v46, 0.0 }
 0x1c7   : > { %v3048_v61 = vmax.f32 %v2350_v59, 0.0  ;;  %v2361_v22 = vadd.f32 %v5957_v5, %v4872_v17  ;;  %v2854_v9 = vadd.f32 %v6271_v48, %v6201_v60  ;;  %v3690_v57 = vadd.f32 %v3689_v53, %v3688_v31 }
 0x1c8   : > { %v3424_v36 = vadd.f32 %v3423_v20, %v3422_v4  ;;  %v2352_v30 = vpop.f32.mrf.mxu0  ;;  %v3693_v17 = vsel %vm3196_vm2, %v3171_v1, 0.0  ;;  %v3172_v14 = vmax.f32 %v2846_v11, 0.0  ;;  %v2857_v10 = vadd.f32 %v6271_v48, %v6222_v58  ;;  %v2864_v20 = vpop.f32.mrf.mxu1 }
 0x1c9   : > { %v2353_v18 = vadd.f32 %v5957_v5, %v2352_v30  ;;  %v3427_v50 = vsel %vm3196_vm2, %v3048_v61, 0.0  ;;  %v3051_v62 = vmax.f32 %v2361_v22, 0.0  ;;  %v3431_v61 = vsel %vm3196_vm2, %v3050_v44, 0.0 }
 0x1ca   : > { %v3426_v27 = vadd.f32 %v3425_v37, %v3424_v36  ;;  %v4875_v28 = vpop.f32.mrf.mxu0  ;;  %v3692_v36 = vadd.f32 %v3691_v40, %v3690_v57  ;;  %v3174_v12 = vmax.f32 %v2854_v9, 0.0  ;;  %v3695_v37 = vsel %vm3196_vm2, %v3172_v14, 0.0 }
 0x1cb   : > { %v3049_v35 = vmax.f32 %v2353_v18, 0.0  ;;  %v2374_v16 = vadd.f32 %v6271_v48, %v4875_v28  ;;  %v3433_v60 = vsel %vm3196_vm2, %v3051_v62, 0.0  ;;  %v2849_v18 = vadd.f32 %v6271_v48, %v6229_v2 }
 0x1cc   : > { %v3428_v24 = vadd.f32 %v3427_v50, %v3426_v27  ;;  %v2365_v52 = vpop.f32.mrf.mxu0  ;;  %v3694_v28 = vadd.f32 %v3693_v17, %v3692_v36  ;;  %v3175_v46 = vmax.f32 %v2857_v10, 0.0  ;;  %v2862_v62 = vadd.f32 %v6271_v48, %v2861_v6 }
 0x1cd   : > { %v3429_v59 = vsel %vm3196_vm2, %v3049_v35, 0.0  ;;  %v2366_v5 = vadd.f32 %v6271_v48, %v2365_v52  ;;  %v3054_v31 = vmax.f32 %v2374_v16, 0.0  ;;  %v3173_v50 = vmax.f32 %v2849_v18, 0.0  ;;  %v6289_v35 = vpop.f32.mrf.mxu1 }
 0x1ce   : > { %v3430_v4 = vadd.f32 %v3429_v59, %v3428_v24  ;;  %v4876_v41 = vpop.f32.mrf.mxu0  ;;  %v3696_v52 = vadd.f32 %v3695_v37, %v3694_v28  ;;  %v2870_v2 = vadd.f32 %v6271_v48, %v6240_v42  ;;  %v3699_v9 = vsel %vm3196_vm2, %v3174_v12, 0.0 }
 0x1cf   : > { %v3052_v22 = vmax.f32 %v2366_v5, 0.0  ;;  %v2377_v27 = vadd.f32 %v6271_v48, %v4876_v41  ;;  %v3697_v59 = vsel %vm3196_vm2, %v3173_v50, 0.0  ;;  %v3176_v16 = vmax.f32 %v2862_v62, 0.0  ;;  %v2877_v42 = vpop.f32.mrf.mxu1 }
 0x1d0   : > { %v3432_v30 = vadd.f32 %v3431_v61, %v3430_v4  ;;  %v2368_v23 = vpop.f32.mrf.mxu0  ;;  %v3698_v4 = vadd.f32 %v3697_v59, %v3696_v52  ;;  %v3701_v10 = vsel %vm3196_vm2, %v3175_v46, 0.0  ;;  %v3439_v61 = vsel %vm3196_vm2, %v3054_v31, 0.0 }
 0x1d1   : > { %v2369_v58 = vadd.f32 %v6271_v48, %v2368_v23  ;;  %v3435_v11 = vsel %vm3196_vm2, %v3052_v22, 0.0  ;;  %v3055_v5 = vmax.f32 %v2377_v27, 0.0  ;;  %v3178_v36 = vmax.f32 %v2870_v2, 0.0  ;;  %v5004_v62 = vpop.f32.mrf.mxu1 }
 0x1d2   : > { %v3434_v1 = vadd.f32 %v3433_v60, %v3432_v30  ;;  %v4879_v44 = vpop.f32.mrf.mxu0  ;;  %v3700_v22 = vadd.f32 %v3699_v9, %v3698_v4  ;;  %v3703_v12 = vsel %vm3196_vm2, %v3176_v16, 0.0  ;;  %v2873_v37 = vadd.f32 %v6271_v48, %v6261_v3 }
 0x1d3   : > { %v3053_v24 = vmax.f32 %v2369_v58, 0.0  ;;  %v2390_v17 = vadd.f32 %v6271_v48, %v4879_v44  ;;  %v2865_v18 = vadd.f32 %v6271_v48, %v2864_v20  ;;  %v3441_v27 = vsel %vm3196_vm2, %v3055_v5, 0.0 }
 0x1d4   : > { %v3436_v40 = vadd.f32 %v3435_v11, %v3434_v1  ;;  %v2381_v53 = vpop.f32.mrf.mxu0  ;;  %v3702_v1 = vadd.f32 %v3701_v10, %v3700_v22  ;;  %v3707_v52 = vsel %vm3196_vm2, %v3178_v36, 0.0  ;;  %v2878_v9 = vadd.f32 %v6271_v48, %v2877_v42 }
 0x1d5   : > { %v3437_v57 = vsel %vm3196_vm2, %v3053_v24, 0.0  ;;  %v2382_v6 = vadd.f32 %v6271_v48, %v2381_v53  ;;  %v3058_v31 = vmax.f32 %v2390_v17, 0.0  ;;  %v3177_v50 = vmax.f32 %v2865_v18, 0.0 }
 0x1d6   : > { %v3438_v41 = vadd.f32 %v3437_v57, %v3436_v40  ;;  %v4880_v14 = vpop.f32.mrf.mxu0  ;;  %v3704_v3 = vadd.f32 %v3703_v12, %v3702_v1  ;;  %v3179_v40 = vmax.f32 %v2873_v37, 0.0  ;;  %v3180_v42 = vmax.f32 %v2878_v9, 0.0 }
 0x1d7   : > { %v3056_v60 = vmax.f32 %v2382_v6, 0.0  ;;  %v2393_v58 = vadd.f32 %v6271_v48, %v4880_v14  ;;  %v3705_v53 = vsel %vm3196_vm2, %v3177_v50, 0.0  ;;  %v3447_v17 = vsel %vm3196_vm2, %v3058_v31, 0.0 }
 0x1d8   : > { %v3440_v30 = vadd.f32 %v3439_v61, %v3438_v41  ;;  %v2384_v23 = vpop.f32.mrf.mxu0  ;;  %v3706_v57 = vadd.f32 %v3705_v53, %v3704_v3  ;;  %v2880_v41 = vpop.f32.mrf.mxu1  ;;  %v3709_v22 = vsel %vm3196_vm2, %v3179_v40, 0.0  ;;  %v2886_v50 = vadd.f32 %v6271_v48, %v6289_v35 }
 0x1d9   : > { %v2385_v28 = vadd.f32 %v6271_v48, %v2384_v23  ;;  %v3443_v11 = vsel %vm3196_vm2, %v3056_v60, 0.0  ;;  %v3059_v59 = vmax.f32 %v2393_v58, 0.0  ;;  %v2881_v37 = vadd.f32 %v6271_v48, %v2880_v41 }
 0x1da   : > { %v3442_v44 = vadd.f32 %v3441_v27, %v3440_v30  ;;  %v4883_v46 = vpop.f32.mrf.mxu0  ;;  %v3708_v36 = vadd.f32 %v3707_v52, %v3706_v57  ;;  %v5007_v31 = vpop.f32.mrf.mxu1  ;;  %v3182_v35 = vmax.f32 %v2886_v50, 0.0  ;;  %v2889_v41 = vadd.f32 %v6271_v48, %v5004_v62 }
 0x1db   : > { %v3057_v24 = vmax.f32 %v2385_v28, 0.0  ;;  %v2406_v14 = vadd.f32 %v6271_v48, %v4883_v46  ;;  %v3449_v30 = vsel %vm3196_vm2, %v3059_v59, 0.0 }
 0x1dc   : > { %v3444_v2 = vadd.f32 %v3443_v11, %v3442_v44  ;;  %v2397_v20 = vpop.f32.mrf.mxu0  ;;  %v3710_v11 = vadd.f32 %v3709_v22, %v3708_v36 }
 0x1dd   : > { %v3445_v16 = vsel %vm3196_vm2, %v3057_v24, 0.0  ;;  %v2398_v5 = vadd.f32 %v6271_v48, %v2397_v20  ;;  %v3062_v58 = vmax.f32 %v2406_v14, 0.0  ;;  %v3711_v24 = vsel %vm3196_vm2, %v3180_v42, 0.0 }
 0x1de   : > { %v3446_v6 = vadd.f32 %v3445_v16, %v3444_v2  ;;  %v4884_v4 = vpop.f32.mrf.mxu0  ;;  %v3181_v20 = vmax.f32 %v2881_v37, 0.0 }
 0x1df   : > { %v3060_v10 = vmax.f32 %v2398_v5, 0.0  ;;  %v2409_v23 = vadd.f32 %v6271_v48, %v4884_v4  ;;  %v3455_v9 = vsel %vm3196_vm2, %v3062_v58, 0.0  ;;  %v2893_v5 = vpop.f32.mrf.mxu1  ;;  %v3712_v4 = vadd.f32 %v3711_v24, %v3710_v11 }
 0x1e0   : > { %v3448_v61 = vadd.f32 %v3447_v17, %v3446_v6  ;;  %v2400_v60 = vpop.f32.mrf.mxu0  ;;  %v2894_v50 = vadd.f32 %v6271_v48, %v2893_v5 }
 0x1e1   : > { %v2401_v12 = vadd.f32 %v6271_v48, %v2400_v60  ;;  %v3451_v28 = vsel %vm3196_vm2, %v3060_v10, 0.0  ;;  %v3063_v52 = vmax.f32 %v2409_v23, 0.0  ;;  %v5008_v23 = vpop.f32.mrf.mxu1 }
 0x1e2   : > { %v3450_v18 = vadd.f32 %v3449_v30, %v3448_v61  ;;  %v4887_v27 = vpop.f32.mrf.mxu0  ;;  %v3713_v61 = vsel %vm3196_vm2, %v3181_v20, 0.0  ;;  %v3184_v5 = vmax.f32 %v2894_v50, 0.0 }
 0x1e3   : > { %v3061_v1 = vmax.f32 %v2401_v12, 0.0  ;;  %v2422_v59 = vadd.f32 %v6271_v48, %v4887_v27  ;;  %v3457_v17 = vsel %vm3196_vm2, %v3063_v52, 0.0  ;;  %v3714_v27 = vadd.f32 %v3713_v61, %v3712_v4  ;;  %v2896_v52 = vpop.f32.mrf.mxu1 }
 0x1e4   : > { %v3452_v44 = vadd.f32 %v3451_v28, %v3450_v18  ;;  %v2413_v46 = vpop.f32.mrf.mxu0  ;;  %v3183_v18 = vmax.f32 %v2889_v41, 0.0  ;;  %v2902_v61 = vadd.f32 %v6271_v48, %v5007_v31 }
 0x1e5   : > { %v3453_v3 = vsel %vm3196_vm2, %v3061_v1, 0.0  ;;  %v2414_v2 = vadd.f32 %v6271_v48, %v2413_v46  ;;  %v3066_v36 = vmax.f32 %v2422_v59, 0.0  ;;  %v3715_v1 = vsel %vm3196_vm2, %v3182_v35, 0.0 }
 0x1e6   : > { %v3454_v40 = vadd.f32 %v3453_v3, %v3452_v44  ;;  %v4888_v53 = vpop.f32.mrf.mxu0  ;;  %v3717_v20 = vsel %vm3196_vm2, %v3183_v18, 0.0  ;;  %v2897_v35 = vadd.f32 %v6271_v48, %v2896_v52 }
 0x1e7   : > { %v3064_v16 = vmax.f32 %v2414_v2, 0.0  ;;  %v2425_v14 = vadd.f32 %v6271_v48, %v4888_v53  ;;  %v3463_v11 = vsel %vm3196_vm2, %v3066_v36, 0.0 }
 0x1e8   : > { %v3456_v57 = vadd.f32 %v3455_v9, %v3454_v40  ;;  %v2416_v6 = vpop.f32.mrf.mxu0  ;;  %v3716_v40 = vadd.f32 %v3715_v1, %v3714_v27  ;;  %v3719_v27 = vsel %vm3196_vm2, %v3184_v5, 0.0 }
 0x1e9   : > { %v2417_v10 = vadd.f32 %v6271_v48, %v2416_v6  ;;  %v3459_v42 = vsel %vm3196_vm2, %v3064_v16, 0.0  ;;  %v3067_v62 = vmax.f32 %v2425_v14, 0.0 }
 0x1ea   : > { %v3458_v60 = vadd.f32 %v3457_v17, %v3456_v57  ;;  %v4891_v22 = vpop.f32.mrf.mxu0  ;;  %v6346_v17 = vpop.f32.mrf.mxu1 }
 0x1eb   : > { %v3065_v30 = vmax.f32 %v2417_v10, 0.0  ;;  %v2438_v24 = vadd.f32 %v6271_v48, %v4891_v22  ;;  %v3465_v53 = vsel %vm3196_vm2, %v3067_v62, 0.0  ;;  %v3185_v62 = vmax.f32 %v2897_v35, 0.0 }
 0x1ec   : > { %v3460_v12 = vadd.f32 %v3459_v42, %v3458_v60  ;;  %v2429_v37 = vpop.f32.mrf.mxu0  ;;  %v3718_v60 = vadd.f32 %v3717_v20, %v3716_v40  ;;  %v2909_v31 = vpop.f32.mrf.mxu1 }
 0x1ed   : > { %v3461_v58 = vsel %vm3196_vm2, %v3065_v30, 0.0  ;;  %v2430_v28 = vadd.f32 %v6271_v48, %v2429_v37  ;;  %v3070_v4 = vmax.f32 %v2438_v24, 0.0 }
 0x1ee   : > { %v3462_v44 = vadd.f32 %v3461_v58, %v3460_v12  ;;  %v4892_v46 = vpop.f32.mrf.mxu0  ;;  %v5012_v5 = vpop.f32.mrf.mxu1 }
 0x1ef   : > { %v3068_v9 = vmax.f32 %v2430_v28, 0.0  ;;  %v2441_v59 = vadd.f32 %v6271_v48, %v4892_v46  ;;  %v3476_v58 = vsel %vm3196_vm2, %v3070_v4, 0.0 }
 0x1f0   : > { %v3464_v3 = vadd.f32 %v3463_v11, %v3462_v44  ;;  %v2432_v2 = vpop.f32.mrf.mxu0  ;;  %v2905_v11 = vadd.f32 %v6271_v48, %v5008_v23 }
 0x1f1   : > { %v2433_v16 = vadd.f32 %v6271_v48, %v2432_v2  ;;  %v3473_v22 = vsel %vm3196_vm2, %v3068_v9, 0.0  ;;  %v3071_v36 = vmax.f32 %v2441_v59, 0.0  ;;  %v3720_v2 = vadd.f32 %v3719_v27, %v3718_v60 }
 0x1f2   : > { %v3466_v57 = vadd.f32 %v3465_v53, %v3464_v3  ;;  %v4895_v6 = vpop.f32.mrf.mxu0  ;;  %v3186_v9 = vmax.f32 %v2902_v61, 0.0  ;;  %v3721_v59 = vsel %vm3196_vm2, %v3185_v62, 0.0  ;;  %v2912_v62 = vpop.f32.mrf.mxu1 }
 0x1f3   : > { %v3069_v41 = vmax.f32 %v2433_v16, 0.0  ;;  %v2454_v28 = vadd.f32 %v6271_v48, %v4895_v6  ;;  %v3478_v24 = vsel %vm3196_vm2, %v3071_v36, 0.0 }
 0x1f4   : > { %v3467_v14 = vrot.slane %v3466_v57, 4  ;;  %v2445_v10 = vpop.f32.mrf.mxu0 }
 0x1f5   : > { %v3474_v42 = vsel %vm3196_vm2, %v3069_v41, 0.0  ;;  %v2446_v30 = vadd.f32 %v6271_v48, %v2445_v10  ;;  %v3074_v16 = vmax.f32 %v2454_v28, 0.0  ;;  %v3187_v41 = vmax.f32 %v2905_v11, 0.0 }
 0x1f6   : > { %v3468_v12 = vadd.f32 %v3467_v14, %v3466_v57  ;;  %v3475_v37 = vadd.f32 %v3474_v42, %v3473_v22  ;;  %v4896_v18 = vpop.f32.mrf.mxu0  ;;  %v3722_v22 = vadd.f32 %v3721_v59, %v3720_v2  ;;  %v2913_v2 = vadd.f32 %v6271_v48, %v2912_v62  ;;  %v5015_v59 = vpop.f32.mrf.mxu1 }
 0x1f7   : > { %v3072_v1 = vmax.f32 %v2446_v30, 0.0  ;;  %v2457_v52 = vadd.f32 %v6271_v48, %v4896_v18  ;;  %v3723_v30 = vsel %vm3196_vm2, %v3186_v9, 0.0 }
 0x1f8   : > { %v3469_v44 = vrot.slane %v3468_v12, 2  ;;  %v3477_v46 = vadd.f32 %v3476_v58, %v3475_v37  ;;  %v2448_v50 = vpop.f32.mrf.mxu0  ;;  %v3484_v37 = vsel %vm3196_vm2, %v3074_v16, 0.0 }
 0x1f9   : > { %v2449_v3 = vadd.f32 %v6271_v48, %v2448_v50  ;;  %v3480_v57 = vsel %vm3196_vm2, %v3072_v1, 0.0  ;;  %v3075_v14 = vmax.f32 %v2457_v52, 0.0 }
 0x1fa   : > { %v3470_v20 = vadd.f32 %v3469_v44, %v3468_v12  ;;  %v3479_v40 = vadd.f32 %v3478_v24, %v3477_v46  ;;  %v4899_v53 = vpop.f32.mrf.mxu0  ;;  %v2910_v12 = vadd.f32 %v6271_v48, %v2909_v31  ;;  %v3725_v44 = vsel %vm3196_vm2, %v3187_v41, 0.0 }
 0x1fb   : > { %v3073_v6 = vmax.f32 %v2449_v3, 0.0  ;;  %v2470_v18 = vadd.f32 %v6271_v48, %v4899_v53  ;;  %v3486_v46 = vsel %vm3196_vm2, %v3075_v14, 0.0  ;;  %v3724_v24 = vadd.f32 %v3723_v30, %v3722_v22 }
 0x1fc   : > { %v3471_v35 = vrot.slane %v3470_v20, 1  ;;  %v3481_v23 = vadd.f32 %v3480_v57, %v3479_v40  ;;  %v2461_v4 = vpop.f32.mrf.mxu0  ;;  %v3188_v3 = vmax.f32 %v2910_v12, 0.0 }
 0x1fd   : > { %v3482_v10 = vsel %vm3196_vm2, %v3073_v6, 0.0  ;;  %v2462_v60 = vadd.f32 %v6271_v48, %v2461_v4  ;;  %v3078_v40 = vmax.f32 %v2470_v18, 0.0  ;;  %v2481_v6 = vadd.f32 %v6271_v48, %v5726_v43 }
 0x1fe   : > { %v3472_v36 = vadd.f32 %v3471_v35, %v3470_v20  ;;  %v3483_v42 = vadd.f32 %v3482_v10, %v3481_v23  ;;  %v4900_v61 = vpop.f32.mrf.mxu0  ;;  %v2478_v20 = vadd.f32 %v6271_v48, %v5713_v26  ;;  %v3726_v4 = vadd.f32 %v3725_v44, %v3724_v24 }
 0x1ff   : > { %v3076_v27 = vmax.f32 %v2462_v60, 0.0  ;;  %v2473_v50 = vadd.f32 %v6271_v48, %v4900_v61  ;;  %v2918_v26 = vadd.f32 %v6271_v48, %v6346_v17  ;;  %v3727_v14 = vsel %vm3196_vm2, %v3188_v3, 0.0 }
 0x200   : > { %v3752_v58 = vpack.c.bf16 %v3472_v36, %v3472_v36  ;;  %v3485_v28 = vadd.f32 %v3484_v37, %v3483_v42  ;;  %v2464_v1 = vpop.f32.mrf.mxu0  ;;  %v3189_v10 = vmax.f32 %v2913_v2, 0.0  ;;  %v2486_v60 = vadd.f32 %v6271_v48, %v5706_v19  ;;  %v2925_v36 = vpop.f32.mrf.mxu1 }
 0x201   : > { %v2465_v11 = vadd.f32 %v6271_v48, %v2464_v1  ;;  %v3488_v53 = vsel %vm3196_vm2, %v3076_v27, 0.0  ;;  %v3079_v35 = vmax.f32 %v2473_v50, 0.0  ;;  %v3492_v22 = vsel %vm3196_vm2, %v3078_v40, 0.0 }
 0x202   : > { %v3779_v31 = vunpack.c.l.b16 %v3752_v58  ;;  %v3487_v52 = vadd.f32 %v3486_v46, %v3485_v28  ;;  %v2489_v43 = vadd.f32 %v6271_v48, %v5718_v33  ;;  %v3081_v61 = vmax.f32 %v2481_v6, 0.0  ;;  %v5016_v28 = vpop.f32.mrf.mxu1 }
 0x203   : > { %v3077_v9 = vmax.f32 %v2465_v11, 0.0  ;;  %v3494_v30 = vsel %vm3196_vm2, %v3079_v35, 0.0  ;;  %v3728_v12 = vadd.f32 %v3727_v14, %v3726_v4  ;;  %v3190_v17 = vmax.f32 %v2918_v26, 0.0 }
 0x204   : > { %v6379_v16 = vsel %vm3788_vm5, %v3779_v31, %v6245_v51  ;;  %v3489_v57 = vadd.f32 %v3488_v53, %v3487_v52  ;;  %v3080_v51 = vmax.f32 %v2478_v20, 0.0  ;;  %v2921_v18 = vadd.f32 %v6271_v48, %v5012_v5  ;;  %v2928_v2 = vpop.f32.mrf.mxu1 }
 0x205   : > { %v3490_v23 = vsel %vm3196_vm2, %v3077_v9, 0.0  ;;  %v3729_v27 = vsel %vm3196_vm2, %v3189_v10, 0.0  ;;  %v3082_v62 = vmax.f32 %v2486_v60, 0.0  ;;  %v2494_v58 = vadd.f32 %v6271_v48, %v5737_v56 }
 0x206   : > { %v3491_v41 = vadd.f32 %v3490_v23, %v3489_v57  ;;  %v3496_v19 = vsel %vm3196_vm2, %v3080_v51, 0.0  ;;  %v3083_v44 = vmax.f32 %v2489_v43, 0.0  ;;  %v3498_v33 = vsel %vm3196_vm2, %v3081_v61, 0.0 }
 0x207   : > { %v2497_v46 = vadd.f32 %v6271_v48, %v5750_v7  ;;  %v3730_v50 = vadd.f32 %v3729_v27, %v3728_v12  ;;  %v3731_v5 = vsel %vm3196_vm2, %v3190_v17, 0.0  ;;  %v3191_v24 = vmax.f32 %v2921_v18, 0.0 }
 0x208   : > { %v3493_v42 = vadd.f32 %v3492_v22, %v3491_v41  ;;  %v2926_v31 = vadd.f32 %v6271_v48, %v2925_v36  ;;  %v3500_v52 = vsel %vm3196_vm2, %v3082_v62, 0.0  ;;  %v2502_v56 = vadd.f32 %v6271_v48, %v5730_v49 }
 0x209   : > { %v3084_v3 = vmax.f32 %v2494_v58, 0.0  ;;  %v3502_v40 = vsel %vm3196_vm2, %v3083_v44, 0.0  ;;  %v2505_v7 = vadd.f32 %v6271_v48, %v5742_v63  ;;  %v3085_v53 = vmax.f32 %v2497_v46, 0.0 }
 0x20a   : > { %v3495_v37 = vadd.f32 %v3494_v30, %v3493_v42  ;;  %v3732_v9 = vadd.f32 %v3731_v5, %v3730_v50  ;;  %v3733_v6 = vsel %vm3196_vm2, %v3191_v24, 0.0  ;;  %v3192_v35 = vmax.f32 %v2926_v31, 0.0 }
 0x20b   : > { %v2929_v23 = vadd.f32 %v6271_v48, %v2928_v2  ;;  %v3086_v4 = vmax.f32 %v2502_v56, 0.0  ;;  %v3504_v41 = vsel %vm3196_vm2, %v3084_v3, 0.0  ;;  %v2510_v49 = vadd.f32 %v6271_v48, %v5761_v21 }
 0x20c   : > { %v3497_v1 = vadd.f32 %v3496_v19, %v3495_v37  ;;  %v3087_v14 = vmax.f32 %v2505_v7, 0.0  ;;  %v3506_v10 = vsel %vm3196_vm2, %v3085_v53, 0.0  ;;  %v2513_v63 = vadd.f32 %v6271_v48, %v5774_v38 }
 0x20d   : > { %v3734_v60 = vadd.f32 %v3733_v6, %v3732_v9  ;;  %v2934_v22 = vadd.f32 %v6271_v48, %v5015_v59  ;;  %v3735_v36 = vsel %vm3196_vm2, %v3192_v35, 0.0  ;;  %v3193_v42 = vmax.f32 %v2929_v23, 0.0 }
 0x20e   : > { %v3499_v11 = vadd.f32 %v3498_v33, %v3497_v1  ;;  %v3508_v43 = vsel %vm3196_vm2, %v3086_v4, 0.0  ;;  %v2518_v61 = vadd.f32 %v6271_v48, %v5754_v13  ;;  %v3088_v21 = vmax.f32 %v2510_v49, 0.0 }
 0x20f   : > { %v3510_v12 = vsel %vm3196_vm2, %v3087_v14, 0.0  ;;  %v2521_v37 = vadd.f32 %v6271_v48, %v5766_v29  ;;  %v3089_v38 = vmax.f32 %v2513_v63, 0.0  ;;  %v3736_v17 = vadd.f32 %v3735_v36, %v3734_v60 }
 0x210   : > { %v3501_v20 = vadd.f32 %v3500_v52, %v3499_v11  ;;  %v3194_v27 = vmax.f32 %v2934_v22, 0.0  ;;  %v2937_v59 = vadd.f32 %v6271_v48, %v5016_v28  ;;  %v3737_v62 = vsel %vm3196_vm2, %v3193_v42, 0.0 }
 0x211   : > { %v3090_v19 = vmax.f32 %v2518_v61, 0.0  ;;  %v3512_v58 = vsel %vm3196_vm2, %v3088_v21, 0.0  ;;  %v2526_v13 = vadd.f32 %v6271_v48, %v5785_v55  ;;  %v3091_v44 = vmax.f32 %v2521_v37, 0.0 }
 0x212   : > { %v3503_v57 = vadd.f32 %v3502_v40, %v3501_v20  ;;  %v3514_v33 = vsel %vm3196_vm2, %v3089_v38, 0.0  ;;  %v2529_v29 = vadd.f32 %v6271_v48, %v5797_v8  ;;  %v3738_v46 = vadd.f32 %v3737_v62, %v3736_v17 }
 0x213   : > { %v3739_v11 = vsel %vm3196_vm2, %v3194_v27, 0.0  ;;  %v3195_v28 = vmax.f32 %v2937_v59, 0.0  ;;  %v3516_v5 = vsel %vm3196_vm2, %v3090_v19, 0.0  ;;  %v2534_v24 = vadd.f32 %v6271_v48, %v5778_v47 }
 0x214   : > { %v3505_v26 = vadd.f32 %v3504_v41, %v3503_v57  ;;  %v3092_v31 = vmax.f32 %v2526_v13, 0.0  ;;  %v3518_v55 = vsel %vm3196_vm2, %v3091_v44, 0.0  ;;  %v2537_v56 = vadd.f32 %v6271_v48, %v5790_v0 }
 0x215   : > { %v3093_v3 = vmax.f32 %v2529_v29, 0.0  ;;  %v3740_v2 = vadd.f32 %v3739_v11, %v3738_v46  ;;  %v3741_v20 = vsel %vm3196_vm2, %v3195_v28, 0.0  ;;  %v3094_v40 = vmax.f32 %v2534_v24, 0.0 }
 0x216   : > { %v3507_v51 = vadd.f32 %v3506_v10, %v3505_v26  ;;  %v3520_v7 = vsel %vm3196_vm2, %v3092_v31, 0.0  ;;  %v2542_v53 = vadd.f32 %v6271_v48, %v5808_v25  ;;  %v3095_v47 = vmax.f32 %v2537_v56, 0.0 }
 0x217   : > { %v3522_v57 = vsel %vm3196_vm2, %v3093_v3, 0.0  ;;  %v2545_v6 = vadd.f32 %v6271_v48, %v5818_v45  ;;  %v3742_v35 = vadd.f32 %v3741_v20, %v3740_v2  ;;  %v3524_v23 = vsel %vm3196_vm2, %v3094_v40, 0.0 }
 0x218   : > { %v3509_v30 = vadd.f32 %v3508_v43, %v3507_v51  ;;  %v2550_v4 = vadd.f32 %v6271_v48, %v5801_v15  ;;  %v3096_v41 = vmax.f32 %v2542_v53, 0.0  ;;  %v3605_v49 = vrot.slane %v5990_v54, 4 }
 0x219   : > { %v3674_v26 = vrot.slane %v6216_v32, 4  ;;  %v3526_v14 = vsel %vm3196_vm2, %v3095_v47, 0.0  ;;  %v2553_v10 = vadd.f32 %v6271_v48, %v5812_v34  ;;  %v3097_v63 = vmax.f32 %v2545_v6, 0.0  ;;  %v5246_v47 = vld [vmem:[%s6589_s7] sm:$0xff]  }
 0x21a   : > { %v3511_v18 = vadd.f32 %v3510_v12, %v3509_v30  ;;  %v3743_v45 = vrot.slane %v3742_v35, 4  ;;  %v3098_v51 = vmax.f32 %v2550_v4, 0.0  ;;  %v3528_v22 = vsel %vm3196_vm2, %v3096_v41, 0.0  ;;  %v4588_v41 = vld [vmem:[%s6623_s6] ss:$0 sm:$0xff] }
 0x21b   : > { %v3606_v36 = vadd.f32 %v3605_v49, %v5990_v54  ;;  %v3675_v15 = vadd.f32 %v3674_v26, %v6216_v32  ;;  %v3099_v43 = vmax.f32 %v2553_v10, 0.0  ;;  %v3530_v61 = vsel %vm3196_vm2, %v3097_v63, 0.0  ;;  %v5247_v63 = vld [vmem:[%s6591_s9 + $0x8] sm:$0xff]  }
 0x21c   : > { %v3513_v1 = vadd.f32 %v3512_v58, %v3511_v18  ;;  %v3744_v21 = vadd.f32 %v3743_v45, %v3742_v35  ;;  %v3532_v12 = vsel %vm3196_vm2, %v3098_v51, 0.0  ;;  %v5248_v51 = vld [vmem:[%s6591_s9] sm:$0xff]  }
 0x21d   : > { %v3607_v37 = vrot.slane %v3606_v36, 2  ;;  %v3676_v34 = vrot.slane %v3675_v15, 2  ;;  %v3534_v38 = vsel %vm3196_vm2, %v3099_v43, 0.0 }
 0x21e   : > { %v3515_v50 = vadd.f32 %v3514_v33, %v3513_v1  ;;  %v3745_v17 = vrot.slane %v3744_v21, 2 }
 0x21f   : > { %v3608_v27 = vadd.f32 %v3607_v37, %v3606_v36  ;;  %v3677_v59 = vadd.f32 %v3676_v34, %v3675_v15  ;;  %v4592_v15 = vld [vmem:[%s6590_s8] ss:$0 sm:$0xff] }
 0x220   : > { %v3517_v52 = vadd.f32 %v3516_v5, %v3515_v50  ;;  %v3746_v62 = vadd.f32 %v3745_v17, %v3744_v21  ;;  %v4596_v34 = vld [vmem:[%s6592_s10] ss:$0 sm:$0xff] }
 0x221   : > { %v3609_v19 = vrot.slane %v3608_v27, 1  ;;  %v3678_v58 = vrot.slane %v3677_v59, 1 }
 0x222   : > { %v3519_v8 = vadd.f32 %v3518_v55, %v3517_v52  ;;  %v3747_v1 = vrot.slane %v3746_v62, 1 }
 0x223   : > { %v3610_v33 = vadd.f32 %v3609_v19, %v3608_v27  ;;  %v3679_v29 = vadd.f32 %v3678_v58, %v3677_v59 }
 0x224   : > { %v3521_v9 = vadd.f32 %v3520_v7, %v3519_v8  ;;  %v3748_v50 = vadd.f32 %v3747_v1, %v3746_v62  ;;  %v5243_v7 = vld [vmem:[%s6621_s5 + $0x8] sm:$0xff]   ;;  %v4125_v62 = vld [vmem:[%s6595_s13] sm:$0xf] }
 0x225   : > { %v3754_v28 = vpack.c.bf16 %v3610_v33, %v3610_v33  ;;  %v3755_v5 = vpack.c.bf16 %v3679_v29, %v3679_v29 }
 0x226   : > { %v3523_v0 = vadd.f32 %v3522_v57, %v3521_v9  ;;  %v3756_v31 = vpack.c.bf16 %v3748_v50, %v3748_v50  ;;  %v5244_v9 = vld [vmem:[%s6621_s5] sm:$0xff]  }
 0x227   : > { %v3781_v55 = vunpack.c.l.b16 %v3754_v28  ;;  %v3782_v56 = vunpack.c.l.b16 %v3755_v5  ;;  %v4584_v57 = vld [vmem:[%s6622_s4] ss:$0 sm:$0xff]  ;;  %s4185_s4 = scalar_lea.sflag [#allocation3], %s547_s26 }
 0x228   : > { %v3525_v25 = vadd.f32 %v3524_v23, %v3523_v0  ;;  %v3783_v2 = vunpack.c.l.b16 %v3756_v31  ;;  %v4600_v50 = vld [vmem:[%s6594_s12] ss:$0 sm:$0xff] }
 0x22a   : > { %v3527_v60 = vadd.f32 %v3526_v14, %v3525_v25 }
 0x22c   : > { %v3529_v42 = vadd.f32 %v3528_v22, %v3527_v60  ;;  %v4068_v22 = vld [vmem:[%s6593_s11] sm:$0xf] }
 0x22d   : > { %v4081_v36 = vsel %vm4079_vm12, %v4068_v22, 0 }
 0x22e   : > { %v3531_v30 = vadd.f32 %v3530_v61, %v3529_v42 }
 0x230   : > { %v3533_v48 = vadd.f32 %v3532_v12, %v3531_v30 }
 0x232   : > { %v3535_v18 = vadd.f32 %v3534_v38, %v3533_v48 }
 0x234   : > { %v3536_v54 = vrot.slane %v3535_v18, 4 }
 0x236   : > { %v3537_v32 = vadd.f32 %v3536_v54, %v3535_v18 }
 0x238   : > { %v3538_v13 = vrot.slane %v3537_v32, 2 }
 0x23a   : > { %v3539_v44 = vadd.f32 %v3538_v13, %v3537_v32  ;;  %v4137_v32 = vsel %vm4079_vm12, %v4125_v62, 0 }
 0x23c   : > { %v3540_v46 = vrot.slane %v3539_v44, 1 }
 0x23e   : > { %v3541_v11 = vadd.f32 %v3540_v46, %v3539_v44 }
 0x240   : > { %v3753_v24 = vpack.c.bf16 %v3541_v11, %v3541_v11 }
 0x242   : > { %v3780_v52 = vunpack.c.l.b16 %v3753_v24 }
 0x244   : > { %v3791_v3 = vsel %vm3790_vm7, %v3780_v52, %v6379_v16  ;;  %v5245_v16 = vld [vmem:[%s6589_s7 + $0x8] sm:$0xff]  }
 0x245   : > { %v3793_v8 = vsel %vm3792_vm8, %v3781_v55, %v3791_v3 }
 0x246   : > { %v3795_v20 = vsel %vm3794_vm9, %v3782_v56, %v3793_v8 }
 0x247   : > { %v3797_v40 = vsel %vm3796_vm10, %v3783_v2, %v3795_v20 }
 0x248   : > { %v3798_v53 = vpack.c.b16 %v3797_v40, %v3797_v40 }
 0x24a   : > { %5022 = vmatmul.mubr.msk.bf16.vlgmr.msra.gmra.mxu1 %vm3196_vm2, %v3798_v53 }
 0x24b   : > { %5026 = vmatpush3.bf16.msra.mxu1 %v5243_v7  ;;  %5029 = vmatprep.mubr.msk.bf16.mxu1 %vm5318_vm6, %v5317_v39 }
 0x24c   : > { %5027 = vmatprep.subr.bf16.mxu1 %v5317_v39 }
 0x24f   : > { %5028 = vmatpush3.bf16.msra.mxu1 %v5244_v9 }
 0x250   : > { %5033 = vmatprep.subr.bf16.mxu1 %v5317_v39 }
 0x252   : > { %5030 = vmatmul.mubr.msk.bf16.vlgmr.msra.gmra.mxu1 %vm3196_vm2, %v3798_v53 }
 0x253   : > { %5037 = vmatprep.mubr.msk.bf16.mxu1 %vm5318_vm6, %v5317_v39  ;;  %5034 = vmatpush3.bf16.msra.mxu1 %v5245_v16 }
 0x254   : > { %5035 = vmatprep.subr.bf16.mxu1 %v5317_v39 }
 0x257   : > { %5036 = vmatpush3.bf16.msra.mxu1 %v5246_v47 }
 0x258   : > { %5041 = vmatprep.subr.bf16.mxu1 %v5317_v39 }
 0x30a   : > { %v3848_v6 = vpop.f32.mrf.mxu1 }
 0x30b   : > { %v3849_v35 = vadd.f32 %v4584_v57, %v3848_v6 }
 0x30c   : > { %v5023_v0 = vpop.f32.mrf.mxu1 }
 0x30d   : > { %3855 = vst.msk [vmem:[%s565_s2] sm:$0xff] %vm3854_vm11, %v3849_v35  ;;  %s5319_s2 = smov [#allocation2]  }
 0x30e   : > { %v3851_v23 = vpop.f32.mrf.mxu1  ;;  %s5259_s5 = sshll.u32 %s5319_s2, 4  ;;  %s5260_s5 = int_to_ptr.vmem [resolvable:$false] %s5259_s5 }
 0x30f   : > { %s5261_s6 = scalar_lea.vmem %s5260_s5, 256  ;;  %p5262_p1 = scmp.lt.s32.totalorder %s4206_s30, %s5260_s5 }
 0x310   : > { %v5024_v4 = vpop.f32.mrf.mxu1  ;;  %p5263_p2 = scmp.lt.s32.totalorder %s5261_s6, %s5255_s22 }
 0x312   : > { %v3913_v49 = vpop.f32.mrf.mxu1  ;;  %p5264_p3 = por %p5263_p2, %p5262_p1 }
 0x313   : > { %v3914_v26 = vadd.f32 %v4588_v41, %v3913_v49 }
 0x314   : > { %v5031_v25 = vpop.f32.mrf.mxu1  ;;  %p5265_p4 = pnand %p5264_p3, %p5258_p0 }
 0x315   : > { %v3919_v14 = vmax.f32 %v3914_v26, 0.0 }
 0x316   : > { %v3916_v10 = vpop.f32.mrf.mxu1 }
 0x317   : > { %v3920_v45 = vpack.c.bf16 %v3919_v14, %v3919_v14 }
 0x318   : > { %v5032_v60 = vpop.f32.mrf.mxu1 }
 0x319   : > { %5038 = vmatmul.mubr.msk.bf16.vlgmr.msra.gmra.mxu1 %vm3196_vm2, %v3920_v45 }
 0x31a   : > { %5042 = vmatpush3.bf16.msra.mxu1 %v5247_v63  ;;  %5045 = vmatprep.mubr.msk.bf16.mxu1 %vm5318_vm6, %v5317_v39 }
 0x31b   : > { %5043 = vmatprep.subr.bf16.mxu1 %v5317_v39 }
 0x31e   : > { %5044 = vmatpush3.bf16.msra.mxu1 %v5248_v51 }
 0x31f   : > { %5049 = vmatprep.subr.bf16.mxu1 %v5317_v39 }
 0x321   : > { %5046 = vmatmul.mubr.msk.bf16.vlgmr.msra.gmra.mxu1 %vm3196_vm2, %v3798_v53 }
 0x322   : > { %5051 = vmatprep.mubr.msk.bf16.mxu1 %vm5318_vm6, %v5317_v39  ;;  %5050 = vmatpush3.bf16.msra.mxu1 %v4081_v36 }
 0x323   : > { %5055 = vmatprep.subr.bf16.mxu1 %v5317_v39 }
 0x3d9   : > { %v3981_v42 = vpop.f32.mrf.mxu1 }
 0x3da   : > { %v3982_v43 = vadd.f32 %v4592_v15, %v3981_v42 }
 0x3db   : > { %v5039_v61 = vpop.f32.mrf.mxu1 }
 0x3dc   : > { %v3987_v21 = vmul.f32 %v3982_v43, %v3982_v43 }
 0x3dd   : > { %v3984_v30 = vpop.f32.mrf.mxu1 }
 0x3de   : > { %v3989_v12 = vsel %vm3988_vm13, %v3987_v21, 0.0 }
 0x3df   : > { %v5040_v37 = vpop.f32.mrf.mxu1  ;;  %3990 = vadd.xlane.f32.xlu0 %v3989_v12 }
 0x3e1   : > { %v4060_v48 = vpop.f32.mrf.mxu1 }
 0x3e2   : > { %v4061_v38 = vadd.f32 %v4596_v34, %v4060_v48 }
 0x3e3   : > { %v5047_v17 = vpop.f32.mrf.mxu1 }
 0x3e4   : > { %v4066_v18 = vmax.f32 %v4061_v38, 0.0 }
 0x3e5   : > { %v4063_v27 = vpop.f32.mrf.mxu1 }
 0x3e6   : > { %v4067_v59 = vpack.c.bf16 %v4066_v18, %v4066_v18 }
 0x3e7   : > { %v5048_v54 = vpop.f32.mrf.mxu1 }
 0x3e8   : > { %5052 = vmatmul.mubr.msk.bf16.vlgmr.msra.gmra.mxu1 %vm3854_vm11, %v4067_v59 }
 0x3e9   : > { %5057 = vmatprep.mubr.msk.bf16.mxu1 %vm5318_vm6, %v5317_v39  ;;  %5056 = vmatpush3.bf16.msra.mxu1 %v4137_v32 }
 0x468   : > { %v3991_v19 = vpop.xlane.xlu0 %3990 }
 0x469   : > { %5249 = vrsqrt.f32 %v3991_v19  ;;  %vm3994_vm14 = vcmp.eq.f32.partialorder %v3991_v19, inf  ;;  %v3997_v1 = vand.u32 2147483648, %v3991_v19  ;;  %vm3996_vm15 = vcmp.eq.f32.partialorder %v3991_v19, 0.0 }
 0x476   : > { %v5250_v58 = vpop.eup %5249 }
 0x477   : > { %v3993_v13 = vmul.f32 %v5250_v58, %v3991_v19 }
 0x479   : > { %v3995_v44 = vsel %vm3994_vm14, %v3991_v19, %v3993_v13 }
 0x47a   : > { %v3998_v33 = vsel %vm3996_vm15, %v3997_v1, %v3995_v44 }
 0x47b   : > { %v3999_v29 = vmax.f32 %v3998_v33, 1e-12 }
 0x47d   : > { %5251 = vrcp.f32 %v3999_v29 }
 0x48a   : > { %v5252_v39 = vpop.eup %5251 }
 0x48b   : > { %v4001_v46 = vmul.f32 %v5252_v39, %v3982_v43 }
 0x48d   : > { %4002 = vst.msk [vmem:[%s549_s0] sm:$0xff] %vm3988_vm13, %v4001_v46 }
 0x4a8   : > { %v4117_v11 = vpop.f32.mrf.mxu1 }
 0x4a9   : > { %v4118_v28 = vadd.f32 %v4600_v50, %v4117_v11 }
 0x4aa   : > { %v5053_v5 = vpop.f32.mrf.mxu1 }
 0x4ab   : > { %v4123_v24 = vmax.f32 %v4118_v28, 0.0 }
 0x4ac   : > { %v4120_v31 = vpop.f32.mrf.mxu1 }
 0x4ad   : > { %v4124_v52 = vpack.c.bf16 %v4123_v24, %v4123_v24 }
 0x4ae   : > { %v5054_v55 = vpop.f32.mrf.mxu1 }
 0x4af   : > { %5058 = vmatmul.mubr.msk.bf16.vlgmr.msra.gmra.mxu1 %vm3854_vm11, %v4124_v52 }
 0x4b0   : > { %5268 = shalt.err (!%p5265_p4)
}
 0x4b1   : > { %s5269_s28 = scalar_lea.hbm %s4203_s3, 128  ;;  %s5273_s0 = scalar_lea.hbm %s6598_s16, 256 }
 0x4b2   : > { %p5270_p7 = scmp.ne.s32.totalorder %s4203_s3, %s5269_s28  ;;  %p5274_p10 = scmp.lt.s32.totalorder %s4203_s3, %s6598_s16 }
 0x4b3   : > { %p5275_p11 = scmp.lt.s32.totalorder %s5273_s0, %s5269_s28 }
 0x4b4   : > { %p5271_p8 = pnand %p5270_p7, %p5448_p5 }
 0x4b5   : > { %p5276_p12 = por %p5275_p11, %p5274_p10 }
 0x4b6   : > { %p5272_p9 = pneg %p5271_p8 }
 0x4b8   : > { %p5277_p13 = pnand %p5276_p12, %p5272_p9 }
 0x4ba   : > { %5280 = shalt.err (!%p5277_p13)
}
 0x4bb   : > { %5069 = dma.vmem_to_hbm [thread:$0]  (%p5448_p5), %s4206_s30, 128, %s4203_s3, %s4185_s4   ;;  %v4602_v56 = vld [vmem:[%s6596_s14] ss:$0 sm:$0xff] }
 0x4bc   : > { %s6624_s22 = sshll.u32 %s6486_s18, 3 }
 0x4bd   : > { %s569_s26 = scalar_lea.vmem %s6599_s17, %s6624_s22 }
 0x56f   : > { %v4173_v3 = vpop.f32.mrf.mxu1 }
 0x570   : > { %v4174_v2 = vadd.f32 %v4602_v56, %v4173_v3 }
 0x571   : > { %v5059_v8 = vpop.f32.mrf.mxu1 }
 0x572   : > { %4179 = vst.msk [vmem:[%s569_s26] sm:$0xff] %vm3854_vm11, %v4174_v2 }
 0x573   : > { %v4176_v20 = vpop.f32.mrf.mxu1 }
 0x575   : > { %v5060_v40 = vpop.f32.mrf.mxu1 }
 0x576 PF: > { %p5075_p5 = scmp.ge.s32.totalorder %s5315_s27, 2  ;;  %s4227_s3 = sand.u32 1, %s5303_s24  }
 0x577   : > { %s4228_s4 = scalar_lea.sflag [#allocation3], %s4227_s3 }
 0x578   : > { %p5072_p0 = pnand %p5075_p5, %p5452_p6 }
 0x57a   : > { %p5073_p1 = pneg %p5072_p0 }
 0x57c   : > { %5298 = dma.done.wait (%p5073_p1), %s4228_s4, 128  }
 0x57d   : > { %5300 = vsyncadd (%p5073_p1), %s4228_s4, 4294967168  ;;  %s6625_s27 = sld [smem:[#allocation6_spill]]  ;;  %s6628_s24 = smov %s5307_s25 }
 0x57e   : > { %s6626_s1 = sld [smem:[#allocation5_spill]] }
 0x57f   : > { %s6627_s26 = sld [smem:[#allocation7_spill]] }
 0x583   : > { %p28_p2 = scmp.ge.s32.totalorder %s6625_s27, 4  }
 0x584   : > { %s6629_s25 = smov %s6626_s1 }
 0x585   :  { %30 = sbr.rel (!%p28_p2) target bundleno = 11 (0xb), region = 139 }
 0x58a   :  { %4240 = vsyncpa [#allocation3], 1 }
 0x58b   :  { %4242 = vsyncpa [#allocation3 + $0x1], 1 }

</bundles_post_ra>
